<compile_context>
chip_gen: v7x
topology: tpu7x:2x2x1
jax: 0.10.0
libtpu: 0.0.40
codegen_flags: <defaults>
</compile_context>

<pallas_src>
import math
from functools import partial

import jax
import jax.numpy as jnp
from jax.experimental import pallas as pl
from jax.experimental.pallas import tpu as pltpu

EPS_LN = 1e-5          # F.layer_norm default eps
EPS_L2 = 1e-12         # F.normalize default eps
MM_DTYPE = jnp.bfloat16  # MXU operand dtype; accumulation stays f32


# ----------------------------- in-kernel helpers -----------------------------

def _layernorm(x, gamma):
    # F.layer_norm over the last dim; beta buffer is zeros in the torch module.
    mu = jnp.mean(x, axis=-1, keepdims=True)
    xc = x - mu
    var = jnp.mean(xc * xc, axis=-1, keepdims=True)
    return xc * jax.lax.rsqrt(var + EPS_LN) * gamma


def _l2norm(x):
    # F.normalize(dim=-1): x / max(||x||, eps) == x * rsqrt(max(||x||^2, eps^2))
    ss = jnp.sum(x * x, axis=-1, keepdims=True)
    return x * jax.lax.rsqrt(jnp.maximum(ss, EPS_L2 * EPS_L2))


# erf via Abramowitz-Stegun 7.1.26 (max abs err ~1.5e-7) -> effectively-exact erf-GELU
_ERF_P = 0.3275911
_A1, _A2, _A3, _A4, _A5 = 0.254829592, -0.284496736, 1.421413741, -1.453152027, 1.061405429


def _erf(x):
    ax = jnp.abs(x)
    t = 1.0 / (1.0 + _ERF_P * ax)
    poly = t * (_A1 + t * (_A2 + t * (_A3 + t * (_A4 + t * _A5))))
    y = 1.0 - poly * jnp.exp(-ax * ax)
    return jnp.where(x >= 0.0, y, -y)


def _gelu_erf(x):
    return 0.5 * x * (1.0 + _erf(x * (1.0 / math.sqrt(2.0))))


def _mha(q_in, kv_in, wq, wk, wv, wo, null_k, null_v, scl, *, bt, nq, nk, scale):
    """qk-normed multi-head attention, head-batched (feedback #5).

    q_in:(bt*nq,dim) f32, kv_in:(bt*nk,dim) f32; wq/wk/wv:(h,dim,dh) bf16; wo:(h,dh,dim) bf16;
    null_k/null_v:(h,1,dh) f32; scl:(2,dh) f32 (q_scale / k_scale).
    NOTE: the reference multiplies q by `scale` before l2norm; l2norm cancels any positive
    scalar so that multiply is dropped here (exact modulo F.normalize's eps clamp).
    """
    heads = wq.shape[0]
    # Broadcast the activation once (bf16) and reuse it for k and v (broadcasts are not CSE'd).
    qb3 = jnp.broadcast_to(q_in.astype(MM_DTYPE)[None], (heads,) + q_in.shape)
    kb3 = qb3 if kv_in is q_in else jnp.broadcast_to(
        kv_in.astype(MM_DTYPE)[None], (heads,) + kv_in.shape)

    qh = jnp.einsum('hmk,hkd->hmd', qb3, wq, preferred_element_type=jnp.float32)
    kh = jnp.einsum('hmk,hkd->hmd', kb3, wk, preferred_element_type=jnp.float32)
    vh = jnp.einsum('hmk,hkd->hmd', kb3, wv, preferred_element_type=jnp.float32)

    qs = scl[0:1, :][None]            # (1,1,dh)
    ks = scl[1:2, :][None]            # (1,1,dh)
    qn = _l2norm(qh) * qs             # (h, bt*nq, dh)
    kn = _l2norm(kh) * ks             # (h, bt*nk, dh)
    nkn = _l2norm(null_k) * ks        # (h, 1, dh)   null key also l2-normed + k-scaled (per reference)

    outs = []
    for bi in range(bt):              # bt is small & static
        qm = qn[:, bi * nq:(bi + 1) * nq, :]
        km = kn[:, bi * nk:(bi + 1) * nk, :]
        vm = vh[:, bi * nk:(bi + 1) * nk, :]
        # TODO(synk): at production seq lengths, produce K in (dh, Nk) layout to avoid the
        # implicit XLU transpose in this contraction (feedback #9); negligible at toy Nk.
        sim = jnp.einsum('hqd,hkd->hqk', qm.astype(MM_DTYPE), km.astype(MM_DTYPE),
                         preferred_element_type=jnp.float32) * scale
        # Learned null key/value column handled analytically (no concatenate).
        sim_null = jnp.sum(qm * nkn, axis=-1, keepdims=True) * scale     # (h, nq, 1)
        m = jnp.maximum(jnp.max(sim, axis=-1, keepdims=True), sim_null)
        p = jnp.exp(sim - m)
        p_null = jnp.exp(sim_null - m)
        inv = pl.reciprocal(jnp.sum(p, axis=-1, keepdims=True) + p_null, approx=True)
        o = jnp.einsum('hqk,hkd->hqd', p.astype(MM_DTYPE), vm.astype(MM_DTYPE),
                       preferred_element_type=jnp.float32)
        o = (o + p_null * null_v) * inv                                  # (h, nq, dh)
        # Fold the head-merge into the output projection: sum_h (o_h @ wo_h).
        y = jnp.einsum('hnd,hde->hne', o.astype(MM_DTYPE), wo,
                       preferred_element_type=jnp.float32)               # (h, nq, dim)
        outs.append(jnp.sum(y, axis=0))
    return outs[0] if bt == 1 else jnp.concatenate(outs, axis=0)


# ----------------------------- fused transformer kernel -----------------------------

def _stack_kernel(x_ref, ctx_ref, g_dim_ref, g_ffi_ref,
                  wq_s_ref, wk_s_ref, wv_s_ref, wo_s_ref, nk_s_ref, nv_s_ref, scl_s_ref,
                  wq_c_ref, wk_c_ref, wv_c_ref, wo_c_ref, nk_c_ref, nv_c_ref, scl_c_ref,
                  w1a_ref, w1b_ref, w2_ref, final_g_ref, wlog_ref,
                  logits_ref, embed_ref, x_sc,
                  *, bt, n_img, n_ctx, dim, dim_out, emb_pad, scale):
    il = pl.program_id(1)            # layer index (depth axis, "arbitrary")

    @pl.when(il == 0)
    def _():
        x_sc[...] = x_ref[...].reshape(bt * n_img, dim)   # activation resident in VMEM

    x = x_sc[...]                                          # (bt*N, dim) f32
    ctx = ctx_ref[...].reshape(bt * n_ctx, dim)            # (bt*Nc, dim) f32
    gam = g_dim_ref[0]                                     # (3, dim): [self-norm, cross-norm, ff-norm-1]

    # ---- self-attention + residual ----
    xn = _layernorm(x, gam[0:1, :])
    x = x + _mha(xn, xn,
                 wq_s_ref[0], wk_s_ref[0], wv_s_ref[0], wo_s_ref[0],
                 nk_s_ref[0], nv_s_ref[0], scl_s_ref[0],
                 bt=bt, nq=n_img, nk=n_img, scale=scale)

    # ---- cross-attention + residual (kv input = raw context, per reference) ----
    # context_mask is all-True (eval, cond_drop_prob=0) and attn_bias is None: exact no-ops.
    xn = _layernorm(x, gam[1:2, :])
    x = x + _mha(xn, ctx,
                 wq_c_ref[0], wk_c_ref[0], wv_c_ref[0], wo_c_ref[0],
                 nk_c_ref[0], nv_c_ref[0], scl_c_ref[0],
                 bt=bt, nq=n_img, nk=n_ctx, scale=scale)

    # ---- feed-forward + residual: LN -> (W1a, W1b) -> GEGLU -> LN -> W2 ----
    h = _layernorm(x, gam[2:3, :])
    hb = h.astype(MM_DTYPE)
    a = jnp.dot(hb, w1a_ref[0], preferred_element_type=jnp.float32)
    g = jnp.dot(hb, w1b_ref[0], preferred_element_type=jnp.float32)
    hg = _layernorm(g * _gelu_erf(a), g_ffi_ref[0])
    x = x + jnp.dot(hg.astype(MM_DTYPE), w2_ref[0], preferred_element_type=jnp.float32)

    x_sc[...] = x

    # ---- final LayerNorm + logits head, fused on the last layer step ----
    @pl.when(il == pl.num_programs(1) - 1)
    def _():
        e = _layernorm(x, final_g_ref[...])
        logits = jnp.dot(e.astype(MM_DTYPE), wlog_ref[...], preferred_element_type=jnp.float32)
        logits_ref[...] = logits.reshape(bt, n_img, dim_out)     # lane-dense (256)
        if emb_pad > dim:   # pad embed writeback to a 128-lane slab (unmasked vst), slice outside
            e = jnp.concatenate(
                [e, jnp.zeros((bt * n_img, emb_pad - dim), jnp.float32)], axis=-1)
        embed_ref[...] = e.reshape(bt, n_img, emb_pad)


def _cost_estimate(cfg, b, N, Nc, nb):
    dim, heads, dh = cfg['dim'], cfg['heads'], cfg['dim_head']
    inner = heads * dh
    ffi, dim_out, depth = cfg['ff_inner'], cfg['dim_out'], cfg['depth']
    M, Mc = b * N, b * Nc
    attn_self = 3 * 2 * M * dim * inner + 2 * 2 * heads * b * N * N * dh + 2 * M * inner * dim
    attn_cross = (2 * M * dim * inner + 2 * 2 * Mc * dim * inner
                  + 2 * 2 * heads * b * N * Nc * dh + 2 * M * inner * dim)
    ff = 2 * M * dim * (2 * ffi) + 2 * M * ffi * dim
    flops = depth * (attn_self + attn_cross + ff) + 2 * M * dim * dim_out
    transcendentals = depth * (heads * b * N * (N + Nc + 2) + M * ffi) + 8 * depth * M
    w_layer = 2 * (2 * (4 * dim * inner) + dim * 2 * ffi + ffi * dim)      # bf16 bytes / layer
    bytes_accessed = (depth * w_layer * nb + 2 * dim * dim_out
                      + 4 * (2 * M * dim + Mc * dim + M * dim_out + M * 128))
    return pl.CostEstimate(flops=int(flops), transcendentals=int(transcendentals),
                           bytes_accessed=int(bytes_accessed))


def transformer_stack(params, x, context, *, cfg):
    b, N, dim = x.shape
    Nc = context.shape[1]
    depth = cfg['depth']
    heads, dh = cfg['heads'], cfg['dim_head']
    ffi = cfg['ff_inner']
    dim_out = cfg['dim_out']
    emb_pad = ((dim + 127) // 128) * 128

    # Batch-tile merge (feedback #2): weights are re-fetched once per batch *block*, not per row.
    # Default: one block (max amortization, best on v5e/v6e's single TC).  On v7x set
    # cfg['batch_tile'] = ceil(b/2) so both TensorCores get a block along the "parallel" axis.
    bt = cfg.get('batch_tile') or b
    assert b % bt == 0, "batch must be divisible by batch_tile"
    nb = b // bt

    kernel = partial(_stack_kernel, bt=bt, n_img=N, n_ctx=Nc, dim=dim,
                     dim_out=dim_out, emb_pad=emb_pad, scale=cfg['attn_scale'])

    bmap = lambda ib, il: (ib, 0, 0)        # per-batch-block activation tiles
    lmap3 = lambda ib, il: (il, 0, 0)       # depth-stacked per-layer weights
    lmap4 = lambda ib, il: (il, 0, 0, 0)
    cmap = lambda ib, il: (0, 0)            # shared 2-D tensors (final LN, to_logits)

    def attn_specs():
        # TODO(synk): if bundle shows exposed weight DMA at production sizes, bump the heaviest
        # specs to pipeline_mode=pl.Buffered(3) (re-check against v7x's 64 MiB VMEM).
        return [
            pl.BlockSpec((1, heads, dim, dh), lmap4),   # wq  (bf16)
            pl.BlockSpec((1, heads, dim, dh), lmap4),   # wk  (bf16)
            pl.BlockSpec((1, heads, dim, dh), lmap4),   # wv  (bf16)
            pl.BlockSpec((1, heads, dh, dim), lmap4),   # wo  (bf16)
            pl.BlockSpec((1, heads, 1, dh), lmap4),     # null_k (f32)
            pl.BlockSpec((1, heads, 1, dh), lmap4),     # null_v (f32)
            pl.BlockSpec((1, 2, dh), lmap3),            # q/k scales (f32)
        ]

    in_specs = (
        [pl.BlockSpec((bt, N, dim), bmap),              # x (token+pos embedded)
         pl.BlockSpec((bt, Nc, dim), bmap),             # context
         pl.BlockSpec((1, 3, dim), lmap3),              # LN gammas (dim-sized)
         pl.BlockSpec((1, 1, ffi), lmap3)]              # FF second LN gamma
        + attn_specs()                                  # self-attention weights
        + attn_specs()                                  # cross-attention weights
        + [pl.BlockSpec((1, dim, ffi), lmap3),          # ff w1a (bf16)
           pl.BlockSpec((1, dim, ffi), lmap3),          # ff w1b (bf16)
           pl.BlockSpec((1, ffi, dim), lmap3),          # ff w2  (bf16)
           pl.BlockSpec((1, dim), cmap),                # final LN gamma
           pl.BlockSpec((dim, dim_out), cmap)]          # to_logits (bf16)
    )
    out_specs = (
        pl.BlockSpec((bt, N, dim_out), bmap),           # logits (lane-dense)
        pl.BlockSpec((bt, N, emb_pad), bmap),           # embed, padded to 128 lanes
    )
    out_shape = (
        jax.ShapeDtypeStruct((b, N, dim_out), jnp.float32),
        jax.ShapeDtypeStruct((b, N, emb_pad), jnp.float32),
    )

    logits, embed_pad = pl.pallas_call(
        kernel,
        grid=(nb, depth),
        in_specs=in_specs,
        out_specs=out_specs,
        out_shape=out_shape,
        scratch_shapes=[pltpu.VMEM((bt * N, dim), jnp.float32)],   # resident activation
        compiler_params=pltpu.CompilerParams(
            dimension_semantics=("parallel", "arbitrary"),
            # Explicit scoped-VMEM budget (feedback #3/#11); stays under v7x's 64 MiB physical.
            vmem_limit_bytes=48 * 1024 * 1024),
        cost_estimate=_cost_estimate(cfg, b, N, Nc, nb),
    )(x, context,
      params['g_dim'], params['g_ffi'],
      params['wq_s'], params['wk_s'], params['wv_s'], params['wo_s'],
      params['nk_s'], params['nv_s'], params['scl_s'],
      params['wq_c'], params['wk_c'], params['wv_c'], params['wo_c'],
      params['nk_c'], params['nv_c'], params['scl_c'],
      params['w1a'], params['w1b'], params['w2'],
      params['final_gamma'], params['to_logits'])
    return logits, embed_pad[..., :dim]


# ------------------------------ full forward ------------------------------

def transformer_multi_view_forward(params, x_tokens, conditioning_token_ids, *, cfg):
    b_cam, n = x_tokens.shape
    assert n <= cfg['seq_len']
    num_cams = cfg['num_cams']
    b = b_cam // num_cams
    dim = cfg['dim']

    # '(b cam) n' -> token_emb -> 'b (cam h w) d'   (embedding gathers kept in plain JAX)
    x = jnp.take(params['token_emb'], x_tokens, axis=0)            # (b*cam, n, dim)
    x = x.reshape(b, num_cams * n, dim)
    # TODO(synk): cfg.image_embed geometric path (generate_grid / 1x1 convs) not translated (flag off)
    x = x + params['pos_emb'][: num_cams * n]

    context = jnp.take(params['cond_token_emb'], conditioning_token_ids, axis=0)
    # TODO(synk): cfg.bev_embed path (get_bev_grid) not translated (flag off)
    context = context + params['cond_pos_emb'][: context.shape[1]]
    # TODO(synk): self_cond branch (self_cond_to_init_embed) not translated (flag off)
    # context_mask is all-True (eval, cond_drop_prob=0) and attn_bias is None (camera_bias off).

    logits, embed = transformer_stack(params, x, context, cfg=cfg)

    # 'b (cam h w) ... -> (b cam) (h w) ...'
    embed = embed.reshape(b * num_cams, n, dim)
    logits = logits.reshape(b * num_cams, n, cfg['dim_out'])
    return logits, embed


# ------------------------------ parameter init ------------------------------

def init_params(key, cfg):
    dim, heads, dh = cfg['dim'], cfg['heads'], cfg['dim_head']
    inner = heads * dh
    ffi = cfg['ff_inner']
    depth = cfg['depth']
    keys = iter(jax.random.split(key, 64))
    nxt = lambda: next(keys)

    def emb(num, d):
        return jax.random.normal(nxt(), (num, d), jnp.float32) * 0.02

    def w(shape, fan_in):
        # Matmul weights stored in HBM as bf16 (feedback #1); f32 accumulation on the MXU.
        return (jax.random.normal(nxt(), shape, jnp.float32) / math.sqrt(fan_in)).astype(MM_DTYPE)

    def attn(suffix):
        return {
            f'wq_{suffix}': w((depth, heads, dim, dh), dim),     # head-major projections
            f'wk_{suffix}': w((depth, heads, dim, dh), dim),
            f'wv_{suffix}': w((depth, heads, dim, dh), dim),
            f'wo_{suffix}': w((depth, heads, dh, dim), inner),
            f'nk_{suffix}': jax.random.normal(nxt(), (depth, heads, 1, dh), jnp.float32),
            f'nv_{suffix}': jax.random.normal(nxt(), (depth, heads, 1, dh), jnp.float32),
            f'scl_{suffix}': jnp.ones((depth, 2, dh), jnp.float32),   # [q_scale, k_scale]
        }

    params = dict(
        token_emb=emb(cfg['num_tokens'], dim),
        pos_emb=emb(cfg['num_img_tokens'], dim),
        cond_token_emb=emb(cfg['cond_vocab_size'], dim),
        cond_pos_emb=emb(cfg['num_cond_tokens'], dim),
        # depth-stacked per-layer weights (streamed layer-by-layer by the fused kernel)
        g_dim=jnp.ones((depth, 3, dim), jnp.float32),    # [self-norm, cross-norm, ff-norm-1]
        g_ffi=jnp.ones((depth, 1, ffi), jnp.float32),    # ff second LN gamma
        w1a=w((depth, dim, ffi), dim),                   # GEGLU value branch
        w1b=w((depth, dim, ffi), dim),                   # GEGLU gate branch
        w2=w((depth, ffi, dim), ffi),
        final_gamma=jnp.ones((1, dim), jnp.float32),
        to_logits=w((dim, cfg['dim_out']), dim),
    )
    params.update(attn('s'))
    params.update(attn('c'))
    return params


# ------------------------------ main ------------------------------

if __name__ == "__main__":
    CFG = dict(
        num_tokens=256, dim=32, heads=2, dim_head=16, depth=2, ff_mult=3,
        num_cams=2, cam_latent_h=4, cam_latent_w=4,
        num_cond_tokens=8, cond_vocab_size=64,
        attn_scale=8.0,
    )
    CFG['seq_len'] = CFG['cam_latent_h'] * CFG['cam_latent_w']            # per-camera tokens
    CFG['num_img_tokens'] = CFG['num_cams'] * CFG['seq_len']              # full positional table
    CFG['dim_out'] = CFG['num_tokens']                                    # default(dim_out, num_tokens)
    CFG['ff_inner'] = int(CFG['dim'] * CFG['ff_mult'] * 2 / 3)            # GEGLU inner dim
    # batch_tile: None -> one block (max weight-DMA amortization; v5e/v6e).  On v7x use ceil(b/2).
    CFG['batch_tile'] = None

    key = jax.random.PRNGKey(0)
    pkey, xkey, ckey = jax.random.split(key, 3)
    params = init_params(pkey, CFG)

    b = 2
    x_tokens = jax.random.randint(
        xkey, (b * CFG['num_cams'], CFG['seq_len']), 0, CFG['num_tokens'], dtype=jnp.int32)
    cond_ids = jax.random.randint(
        ckey, (b, CFG['num_cond_tokens']), 0, CFG['cond_vocab_size'], dtype=jnp.int32)

    fwd = jax.jit(partial(transformer_multi_view_forward, cfg=CFG))
    logits, embed = fwd(params, x_tokens, cond_ids)
    jax.block_until_ready((logits, embed))

    assert logits.shape == (b * CFG['num_cams'], CFG['seq_len'], CFG['dim_out'])
    assert embed.shape == (b * CFG['num_cams'], CFG['seq_len'], CFG['dim'])
    assert logits.dtype == jnp.float32 and embed.dtype == jnp.float32
    assert bool(jnp.all(jnp.isfinite(logits))) and bool(jnp.all(jnp.isfinite(embed)))
    print("KERNEL_OK")
</pallas_src>

<mosaic_0001>
module attributes {stable_mosaic.version = 11 : i64} {
  func.func @_stack_kernel(%arg0: i32, %arg1: i32, %arg2: memref<2x32x32xf32, #tpu.memory_space<vmem>>, %arg3: memref<2x8x32xf32, #tpu.memory_space<vmem>>, %arg4: memref<1x3x32xf32, #tpu.memory_space<vmem>>, %arg5: memref<1x1x64xf32, #tpu.memory_space<vmem>>, %arg6: memref<1x2x32x16xbf16, #tpu.memory_space<vmem>>, %arg7: memref<1x2x32x16xbf16, #tpu.memory_space<vmem>>, %arg8: memref<1x2x32x16xbf16, #tpu.memory_space<vmem>>, %arg9: memref<1x2x16x32xbf16, #tpu.memory_space<vmem>>, %arg10: memref<1x2x1x16xf32, #tpu.memory_space<vmem>>, %arg11: memref<1x2x1x16xf32, #tpu.memory_space<vmem>>, %arg12: memref<1x2x16xf32, #tpu.memory_space<vmem>>, %arg13: memref<1x2x32x16xbf16, #tpu.memory_space<vmem>>, %arg14: memref<1x2x32x16xbf16, #tpu.memory_space<vmem>>, %arg15: memref<1x2x32x16xbf16, #tpu.memory_space<vmem>>, %arg16: memref<1x2x16x32xbf16, #tpu.memory_space<vmem>>, %arg17: memref<1x2x1x16xf32, #tpu.memory_space<vmem>>, %arg18: memref<1x2x1x16xf32, #tpu.memory_space<vmem>>, %arg19: memref<1x2x16xf32, #tpu.memory_space<vmem>>, %arg20: memref<1x32x64xbf16, #tpu.memory_space<vmem>>, %arg21: memref<1x32x64xbf16, #tpu.memory_space<vmem>>, %arg22: memref<1x64x32xbf16, #tpu.memory_space<vmem>>, %arg23: memref<1x32xf32, #tpu.memory_space<vmem>>, %arg24: memref<32x256xbf16, #tpu.memory_space<vmem>>, %arg25: memref<2x32x256xf32, #tpu.memory_space<vmem>>, %arg26: memref<2x32x128xf32, #tpu.memory_space<vmem>>, %arg27: memref<64x32xf32, #tpu.memory_space<vmem>>) attributes {dimension_semantics = [#tpu.dimension_semantics<parallel>, #tpu.dimension_semantics<arbitrary>], iteration_bounds = array<i64: 1, 2>, scalar_prefetch = 0 : i64, scratch_operands = 1 : i64, tpu.core_type = #tpu.core_type<tc>, window_params = [{transform_indices = @transform_0, window_bounds = array<i64: 2, 32, 32>}, {transform_indices = @transform_1, window_bounds = array<i64: 2, 8, 32>}, {transform_indices = @transform_2, window_bounds = array<i64: 1, 3, 32>}, {transform_indices = @transform_3, window_bounds = array<i64: 1, 1, 64>}, {transform_indices = @transform_4, window_bounds = array<i64: 1, 2, 32, 16>}, {transform_indices = @transform_5, window_bounds = array<i64: 1, 2, 32, 16>}, {transform_indices = @transform_6, window_bounds = array<i64: 1, 2, 32, 16>}, {transform_indices = @transform_7, window_bounds = array<i64: 1, 2, 16, 32>}, {transform_indices = @transform_8, window_bounds = array<i64: 1, 2, 1, 16>}, {transform_indices = @transform_9, window_bounds = array<i64: 1, 2, 1, 16>}, {transform_indices = @transform_10, window_bounds = array<i64: 1, 2, 16>}, {transform_indices = @transform_11, window_bounds = array<i64: 1, 2, 32, 16>}, {transform_indices = @transform_12, window_bounds = array<i64: 1, 2, 32, 16>}, {transform_indices = @transform_13, window_bounds = array<i64: 1, 2, 32, 16>}, {transform_indices = @transform_14, window_bounds = array<i64: 1, 2, 16, 32>}, {transform_indices = @transform_15, window_bounds = array<i64: 1, 2, 1, 16>}, {transform_indices = @transform_16, window_bounds = array<i64: 1, 2, 1, 16>}, {transform_indices = @transform_17, window_bounds = array<i64: 1, 2, 16>}, {transform_indices = @transform_18, window_bounds = array<i64: 1, 32, 64>}, {transform_indices = @transform_19, window_bounds = array<i64: 1, 32, 64>}, {transform_indices = @transform_20, window_bounds = array<i64: 1, 64, 32>}, {pipeline_mode = #tpu.pipeline_mode<synchronous>, transform_indices = @transform_21, window_bounds = array<i64: 1, 32>}, {pipeline_mode = #tpu.pipeline_mode<synchronous>, transform_indices = @transform_22, window_bounds = array<i64: 32, 256>}, {transform_indices = @transform_23, window_bounds = array<i64: 2, 32, 256>}, {transform_indices = @transform_24, window_bounds = array<i64: 2, 32, 128>}]} {
    %c0_i32 = arith.constant 0 : i32
    %0 = arith.cmpi eq, %arg1, %c0_i32 : i32
    %1 = arith.extui %0 : i1 to i32
    %c0_i32_0 = arith.constant 0 : i32
    %2 = arith.cmpi ne, %1, %c0_i32_0 : i32
    scf.if %2 {
      %c0_168 = arith.constant 0 : index
      %c0_169 = arith.constant 0 : index
      %c0_170 = arith.constant 0 : index
      %412 = vector.load %arg2[%c0_168, %c0_169, %c0_170] : memref<2x32x32xf32, #tpu.memory_space<vmem>>, vector<2x32x32xf32>
      %413 = vector.shape_cast %412 : vector<2x32x32xf32> to vector<64x32xf32>
      %c0_171 = arith.constant 0 : index
      %c0_172 = arith.constant 0 : index
      %414 = vector.load %arg27[%c0_171, %c0_172] : memref<64x32xf32, #tpu.memory_space<vmem>>, vector<64x32xf32>
      tpu.vector_store %arg27[%c0_171, %c0_172], %413 {strides = array<i32>} : memref<64x32xf32, #tpu.memory_space<vmem>>, vector<64x32xf32>,
    } else {
    }
    %c0 = arith.constant 0 : index
    %c0_1 = arith.constant 0 : index
    %3 = vector.load %arg27[%c0, %c0_1] : memref<64x32xf32, #tpu.memory_space<vmem>>, vector<64x32xf32>
    %c0_2 = arith.constant 0 : index
    %c0_3 = arith.constant 0 : index
    %c0_4 = arith.constant 0 : index
    %4 = vector.load %arg3[%c0_2, %c0_3, %c0_4] : memref<2x8x32xf32, #tpu.memory_space<vmem>>, vector<2x8x32xf32>
    %5 = vector.shape_cast %4 : vector<2x8x32xf32> to vector<16x32xf32>
    %c0_5 = arith.constant 0 : index
    %c0_6 = arith.constant 0 : index
    %c0_7 = arith.constant 0 : index
    %6 = vector.load %arg4[%c0_5, %c0_6, %c0_7] : memref<1x3x32xf32, #tpu.memory_space<vmem>>, vector<1x3x32xf32>
    %7 = vector.shape_cast %6 : vector<1x3x32xf32> to vector<3x32xf32>
    %8 = vector.extract_strided_slice %7 {offsets = [0, 0], sizes = [1, 32], strides = [1, 1]} : vector<3x32xf32> to vector<1x32xf32>
    %cst = arith.constant dense<0.000000e+00> : vector<64xf32>
    %9 = vector.multi_reduction <add>, %3, %cst [1] : vector<64x32xf32> to vector<64xf32>
    %10 = vector.shape_cast %9 : vector<64xf32> to vector<64x1xf32>
    %cst_8 = arith.constant 3.200000e+01 : f32
    %11 = vector.broadcast %cst_8 : f32 to vector<64x1xf32>
    %12 = arith.divf %10, %11 : vector<64x1xf32>
    %13 = vector.broadcast %12 : vector<64x1xf32> to vector<64x32xf32>
    %14 = arith.subf %3, %13 : vector<64x32xf32>
    %15 = arith.mulf %14, %14 : vector<64x32xf32>
    %cst_9 = arith.constant dense<0.000000e+00> : vector<64xf32>
    %16 = vector.multi_reduction <add>, %15, %cst_9 [1] : vector<64x32xf32> to vector<64xf32>
    %17 = vector.shape_cast %16 : vector<64xf32> to vector<64x1xf32>
    %cst_10 = arith.constant 3.200000e+01 : f32
    %18 = vector.broadcast %cst_10 : f32 to vector<64x1xf32>
    %19 = arith.divf %17, %18 : vector<64x1xf32>
    %cst_11 = arith.constant 9.99999974E-6 : f32
    %20 = vector.broadcast %cst_11 : f32 to vector<64x1xf32>
    %21 = arith.addf %19, %20 : vector<64x1xf32>
    %22 = math.rsqrt %21 : vector<64x1xf32>
    %23 = vector.broadcast %22 : vector<64x1xf32> to vector<64x32xf32>
    %24 = arith.mulf %14, %23 : vector<64x32xf32>
    %25 = vector.broadcast %8 : vector<1x32xf32> to vector<64x32xf32>
    %26 = arith.mulf %24, %25 : vector<64x32xf32>
    %c0_12 = arith.constant 0 : index
    %c0_13 = arith.constant 0 : index
    %c0_14 = arith.constant 0 : index
    %c0_15 = arith.constant 0 : index
    %27 = vector.load %arg6[%c0_12, %c0_13, %c0_14, %c0_15] : memref<1x2x32x16xbf16, #tpu.memory_space<vmem>>, vector<1x2x32x16xbf16>
    %28 = vector.shape_cast %27 : vector<1x2x32x16xbf16> to vector<2x32x16xbf16>
    %c0_16 = arith.constant 0 : index
    %c0_17 = arith.constant 0 : index
    %c0_18 = arith.constant 0 : index
    %c0_19 = arith.constant 0 : index
    %29 = vector.load %arg7[%c0_16, %c0_17, %c0_18, %c0_19] : memref<1x2x32x16xbf16, #tpu.memory_space<vmem>>, vector<1x2x32x16xbf16>
    %30 = vector.shape_cast %29 : vector<1x2x32x16xbf16> to vector<2x32x16xbf16>
    %c0_20 = arith.constant 0 : index
    %c0_21 = arith.constant 0 : index
    %c0_22 = arith.constant 0 : index
    %c0_23 = arith.constant 0 : index
    %31 = vector.load %arg8[%c0_20, %c0_21, %c0_22, %c0_23] : memref<1x2x32x16xbf16, #tpu.memory_space<vmem>>, vector<1x2x32x16xbf16>
    %32 = vector.shape_cast %31 : vector<1x2x32x16xbf16> to vector<2x32x16xbf16>
    %c0_24 = arith.constant 0 : index
    %c0_25 = arith.constant 0 : index
    %c0_26 = arith.constant 0 : index
    %c0_27 = arith.constant 0 : index
    %33 = vector.load %arg9[%c0_24, %c0_25, %c0_26, %c0_27] : memref<1x2x16x32xbf16, #tpu.memory_space<vmem>>, vector<1x2x16x32xbf16>
    %34 = vector.shape_cast %33 : vector<1x2x16x32xbf16> to vector<2x16x32xbf16>
    %c0_28 = arith.constant 0 : index
    %c0_29 = arith.constant 0 : index
    %c0_30 = arith.constant 0 : index
    %c0_31 = arith.constant 0 : index
    %35 = vector.load %arg10[%c0_28, %c0_29, %c0_30, %c0_31] : memref<1x2x1x16xf32, #tpu.memory_space<vmem>>, vector<1x2x1x16xf32>
    %36 = vector.shape_cast %35 : vector<1x2x1x16xf32> to vector<2x1x16xf32>
    %c0_32 = arith.constant 0 : index
    %c0_33 = arith.constant 0 : index
    %c0_34 = arith.constant 0 : index
    %c0_35 = arith.constant 0 : index
    %37 = vector.load %arg11[%c0_32, %c0_33, %c0_34, %c0_35] : memref<1x2x1x16xf32, #tpu.memory_space<vmem>>, vector<1x2x1x16xf32>
    %38 = vector.shape_cast %37 : vector<1x2x1x16xf32> to vector<2x1x16xf32>
    %c0_36 = arith.constant 0 : index
    %c0_37 = arith.constant 0 : index
    %c0_38 = arith.constant 0 : index
    %39 = vector.load %arg12[%c0_36, %c0_37, %c0_38] : memref<1x2x16xf32, #tpu.memory_space<vmem>>, vector<1x2x16xf32>
    %40 = vector.shape_cast %39 : vector<1x2x16xf32> to vector<2x16xf32>
    %41 = arith.truncf %26 : vector<64x32xf32> to vector<64x32xbf16>
    %42 = vector.shape_cast %41 : vector<64x32xbf16> to vector<1x64x32xbf16>
    %43 = vector.shape_cast %42 : vector<1x64x32xbf16> to vector<1x64x32xbf16>
    %44 = vector.broadcast %43 : vector<1x64x32xbf16> to vector<2x64x32xbf16>
    "tpu.trace_start"() <{level = 10 : i32, message = "hmk,hkd->hmd"}> : () -> ()
    %cst_39 = arith.constant dense<0.000000e+00> : vector<2x64x16xf32>
    %45 = tpu.matmul %44, %28, %cst_39 {dimension_numbers = #tpu.dot_dimension_numbers<[2], [1], [1], [2], [0, 0, 0, 1, 1, 2], [0], [0]>} : vector<2x64x32xbf16>, vector<2x32x16xbf16>, vector<2x64x16xf32> -> vector<2x64x16xf32>
    %cst_40 = arith.constant dense<0.000000e+00> : vector<2x64x16xf32>
    %46 = tpu.matmul %44, %30, %cst_40 {dimension_numbers = #tpu.dot_dimension_numbers<[2], [1], [1], [2], [0, 0, 0, 1, 1, 2], [0], [0]>} : vector<2x64x32xbf16>, vector<2x32x16xbf16>, vector<2x64x16xf32> -> vector<2x64x16xf32>
    %cst_41 = arith.constant dense<0.000000e+00> : vector<2x64x16xf32>
    %47 = tpu.matmul %44, %32, %cst_41 {dimension_numbers = #tpu.dot_dimension_numbers<[2], [1], [1], [2], [0, 0, 0, 1, 1, 2], [0], [0]>} : vector<2x64x32xbf16>, vector<2x32x16xbf16>, vector<2x64x16xf32> -> vector<2x64x16xf32>
    "tpu.trace_stop"() : () -> ()
    %48 = vector.extract_strided_slice %40 {offsets = [0, 0], sizes = [1, 16], strides = [1, 1]} : vector<2x16xf32> to vector<1x16xf32>
    %49 = vector.shape_cast %48 : vector<1x16xf32> to vector<1x1x16xf32>
    %50 = vector.extract_strided_slice %40 {offsets = [1, 0], sizes = [1, 16], strides = [1, 1]} : vector<2x16xf32> to vector<1x16xf32>
    %51 = vector.shape_cast %50 : vector<1x16xf32> to vector<1x1x16xf32>
    %52 = arith.mulf %45, %45 : vector<2x64x16xf32>
    %cst_42 = arith.constant dense<0.000000e+00> : vector<2x64xf32>
    %53 = vector.multi_reduction <add>, %52, %cst_42 [2] : vector<2x64x16xf32> to vector<2x64xf32>
    %54 = vector.shape_cast %53 : vector<2x64xf32> to vector<2x64x1xf32>
    %cst_43 = arith.constant 1.000000e-24 : f32
    %55 = vector.broadcast %cst_43 : f32 to vector<2x64x1xf32>
    %56 = arith.maximumf %54, %55 : vector<2x64x1xf32>
    %57 = math.rsqrt %56 : vector<2x64x1xf32>
    %58 = vector.broadcast %57 : vector<2x64x1xf32> to vector<2x64x16xf32>
    %59 = arith.mulf %45, %58 : vector<2x64x16xf32>
    %60 = vector.broadcast %49 : vector<1x1x16xf32> to vector<2x64x16xf32>
    %61 = arith.mulf %59, %60 : vector<2x64x16xf32>
    %62 = arith.mulf %46, %46 : vector<2x64x16xf32>
    %cst_44 = arith.constant dense<0.000000e+00> : vector<2x64xf32>
    %63 = vector.multi_reduction <add>, %62, %cst_44 [2] : vector<2x64x16xf32> to vector<2x64xf32>
    %64 = vector.shape_cast %63 : vector<2x64xf32> to vector<2x64x1xf32>
    %cst_45 = arith.constant 1.000000e-24 : f32
    %65 = vector.broadcast %cst_45 : f32 to vector<2x64x1xf32>
    %66 = arith.maximumf %64, %65 : vector<2x64x1xf32>
    %67 = math.rsqrt %66 : vector<2x64x1xf32>
    %68 = vector.broadcast %67 : vector<2x64x1xf32> to vector<2x64x16xf32>
    %69 = arith.mulf %46, %68 : vector<2x64x16xf32>
    %70 = vector.broadcast %51 : vector<1x1x16xf32> to vector<2x64x16xf32>
    %71 = arith.mulf %69, %70 : vector<2x64x16xf32>
    %72 = arith.mulf %36, %36 : vector<2x1x16xf32>
    %cst_46 = arith.constant dense<0.000000e+00> : vector<2x1xf32>
    %73 = vector.multi_reduction <add>, %72, %cst_46 [2] : vector<2x1x16xf32> to vector<2x1xf32>
    %74 = vector.shape_cast %73 : vector<2x1xf32> to vector<2x1x1xf32>
    %cst_47 = arith.constant 1.000000e-24 : f32
    %75 = vector.broadcast %cst_47 : f32 to vector<2x1x1xf32>
    %76 = arith.maximumf %74, %75 : vector<2x1x1xf32>
    %77 = math.rsqrt %76 : vector<2x1x1xf32>
    %78 = vector.broadcast %77 : vector<2x1x1xf32> to vector<2x1x16xf32>
    %79 = arith.mulf %36, %78 : vector<2x1x16xf32>
    %80 = vector.broadcast %51 : vector<1x1x16xf32> to vector<2x1x16xf32>
    %81 = arith.mulf %79, %80 : vector<2x1x16xf32>
    %82 = vector.extract_strided_slice %61 {offsets = [0, 0, 0], sizes = [2, 32, 16], strides = [1, 1, 1]} : vector<2x64x16xf32> to vector<2x32x16xf32>
    %83 = vector.extract_strided_slice %71 {offsets = [0, 0, 0], sizes = [2, 32, 16], strides = [1, 1, 1]} : vector<2x64x16xf32> to vector<2x32x16xf32>
    %84 = vector.extract_strided_slice %47 {offsets = [0, 0, 0], sizes = [2, 32, 16], strides = [1, 1, 1]} : vector<2x64x16xf32> to vector<2x32x16xf32>
    %85 = arith.truncf %82 : vector<2x32x16xf32> to vector<2x32x16xbf16>
    %86 = arith.truncf %83 : vector<2x32x16xf32> to vector<2x32x16xbf16>
    "tpu.trace_start"() <{level = 10 : i32, message = "hqd,hkd->hqk"}> : () -> ()
    %cst_48 = arith.constant dense<0.000000e+00> : vector<2x32x32xf32>
    %87 = tpu.matmul %85, %86, %cst_48 {dimension_numbers = #tpu.dot_dimension_numbers<[2], [2], [1], [1], [0, 0, 0, 1, 1, 1], [0], [0]>} : vector<2x32x16xbf16>, vector<2x32x16xbf16>, vector<2x32x32xf32> -> vector<2x32x32xf32>
    "tpu.trace_stop"() : () -> ()
    %cst_49 = arith.constant 8.000000e+00 : f32
    %88 = vector.broadcast %cst_49 : f32 to vector<2x32x32xf32>
    %89 = arith.mulf %87, %88 : vector<2x32x32xf32>
    %90 = vector.broadcast %81 : vector<2x1x16xf32> to vector<2x32x16xf32>
    %91 = arith.mulf %82, %90 : vector<2x32x16xf32>
    %cst_50 = arith.constant dense<0.000000e+00> : vector<2x32xf32>
    %92 = vector.multi_reduction <add>, %91, %cst_50 [2] : vector<2x32x16xf32> to vector<2x32xf32>
    %93 = vector.shape_cast %92 : vector<2x32xf32> to vector<2x32x1xf32>
    %cst_51 = arith.constant 8.000000e+00 : f32
    %94 = vector.broadcast %cst_51 : f32 to vector<2x32x1xf32>
    %95 = arith.mulf %93, %94 : vector<2x32x1xf32>
    %cst_52 = arith.constant dense<0xFF800000> : vector<2x32xf32>
    %96 = vector.multi_reduction <maximumf>, %89, %cst_52 [2] : vector<2x32x32xf32> to vector<2x32xf32>
    %97 = vector.shape_cast %96 : vector<2x32xf32> to vector<2x32x1xf32>
    %98 = arith.maximumf %97, %95 : vector<2x32x1xf32>
    %99 = vector.broadcast %98 : vector<2x32x1xf32> to vector<2x32x32xf32>
    %100 = arith.subf %89, %99 : vector<2x32x32xf32>
    %101 = math.exp %100 : vector<2x32x32xf32>
    %102 = arith.subf %95, %98 : vector<2x32x1xf32>
    %103 = math.exp %102 : vector<2x32x1xf32>
    %cst_53 = arith.constant dense<0.000000e+00> : vector<2x32xf32>
    %104 = vector.multi_reduction <add>, %101, %cst_53 [2] : vector<2x32x32xf32> to vector<2x32xf32>
    %105 = vector.shape_cast %104 : vector<2x32xf32> to vector<2x32x1xf32>
    %106 = arith.addf %105, %103 : vector<2x32x1xf32>
    %107 = tpu.reciprocal %106 {approx = true} : vector<2x32x1xf32> -> vector<2x32x1xf32>
    %108 = arith.truncf %101 : vector<2x32x32xf32> to vector<2x32x32xbf16>
    %109 = arith.truncf %84 : vector<2x32x16xf32> to vector<2x32x16xbf16>
    "tpu.trace_start"() <{level = 10 : i32, message = "hqk,hkd->hqd"}> : () -> ()
    %cst_54 = arith.constant dense<0.000000e+00> : vector<2x32x16xf32>
    %110 = tpu.matmul %108, %109, %cst_54 {dimension_numbers = #tpu.dot_dimension_numbers<[2], [1], [1], [2], [0, 0, 0, 1, 1, 2], [0], [0]>} : vector<2x32x32xbf16>, vector<2x32x16xbf16>, vector<2x32x16xf32> -> vector<2x32x16xf32>
    "tpu.trace_stop"() : () -> ()
    %111 = vector.broadcast %103 : vector<2x32x1xf32> to vector<2x32x16xf32>
    %112 = vector.broadcast %38 : vector<2x1x16xf32> to vector<2x32x16xf32>
    %113 = arith.mulf %111, %112 : vector<2x32x16xf32>
    %114 = arith.addf %110, %113 : vector<2x32x16xf32>
    %115 = vector.broadcast %107 : vector<2x32x1xf32> to vector<2x32x16xf32>
    %116 = arith.mulf %114, %115 : vector<2x32x16xf32>
    %117 = arith.truncf %116 : vector<2x32x16xf32> to vector<2x32x16xbf16>
    "tpu.trace_start"() <{level = 10 : i32, message = "hnd,hde->hne"}> : () -> ()
    %cst_55 = arith.constant dense<0.000000e+00> : vector<2x32x32xf32>
    %118 = tpu.matmul %117, %34, %cst_55 {dimension_numbers = #tpu.dot_dimension_numbers<[2], [1], [1], [2], [0, 0, 0, 1, 1, 2], [0], [0]>} : vector<2x32x16xbf16>, vector<2x16x32xbf16>, vector<2x32x32xf32> -> vector<2x32x32xf32>
    "tpu.trace_stop"() : () -> ()
    %cst_56 = arith.constant dense<0.000000e+00> : vector<32x32xf32>
    %119 = vector.multi_reduction <add>, %118, %cst_56 [0] : vector<2x32x32xf32> to vector<32x32xf32>
    %120 = vector.extract_strided_slice %61 {offsets = [0, 32, 0], sizes = [2, 32, 16], strides = [1, 1, 1]} : vector<2x64x16xf32> to vector<2x32x16xf32>
    %121 = vector.extract_strided_slice %71 {offsets = [0, 32, 0], sizes = [2, 32, 16], strides = [1, 1, 1]} : vector<2x64x16xf32> to vector<2x32x16xf32>
    %122 = vector.extract_strided_slice %47 {offsets = [0, 32, 0], sizes = [2, 32, 16], strides = [1, 1, 1]} : vector<2x64x16xf32> to vector<2x32x16xf32>
    %123 = arith.truncf %120 : vector<2x32x16xf32> to vector<2x32x16xbf16>
    %124 = arith.truncf %121 : vector<2x32x16xf32> to vector<2x32x16xbf16>
    "tpu.trace_start"() <{level = 10 : i32, message = "hqd,hkd->hqk"}> : () -> ()
    %cst_57 = arith.constant dense<0.000000e+00> : vector<2x32x32xf32>
    %125 = tpu.matmul %123, %124, %cst_57 {dimension_numbers = #tpu.dot_dimension_numbers<[2], [2], [1], [1], [0, 0, 0, 1, 1, 1], [0], [0]>} : vector<2x32x16xbf16>, vector<2x32x16xbf16>, vector<2x32x32xf32> -> vector<2x32x32xf32>
    "tpu.trace_stop"() : () -> ()
    %cst_58 = arith.constant 8.000000e+00 : f32
    %126 = vector.broadcast %cst_58 : f32 to vector<2x32x32xf32>
    %127 = arith.mulf %125, %126 : vector<2x32x32xf32>
    %128 = vector.broadcast %81 : vector<2x1x16xf32> to vector<2x32x16xf32>
    %129 = arith.mulf %120, %128 : vector<2x32x16xf32>
    %cst_59 = arith.constant dense<0.000000e+00> : vector<2x32xf32>
    %130 = vector.multi_reduction <add>, %129, %cst_59 [2] : vector<2x32x16xf32> to vector<2x32xf32>
    %131 = vector.shape_cast %130 : vector<2x32xf32> to vector<2x32x1xf32>
    %cst_60 = arith.constant 8.000000e+00 : f32
    %132 = vector.broadcast %cst_60 : f32 to vector<2x32x1xf32>
    %133 = arith.mulf %131, %132 : vector<2x32x1xf32>
    %cst_61 = arith.constant dense<0xFF800000> : vector<2x32xf32>
    %134 = vector.multi_reduction <maximumf>, %127, %cst_61 [2] : vector<2x32x32xf32> to vector<2x32xf32>
    %135 = vector.shape_cast %134 : vector<2x32xf32> to vector<2x32x1xf32>
    %136 = arith.maximumf %135, %133 : vector<2x32x1xf32>
    %137 = vector.broadcast %136 : vector<2x32x1xf32> to vector<2x32x32xf32>
    %138 = arith.subf %127, %137 : vector<2x32x32xf32>
    %139 = math.exp %138 : vector<2x32x32xf32>
    %140 = arith.subf %133, %136 : vector<2x32x1xf32>
    %141 = math.exp %140 : vector<2x32x1xf32>
    %cst_62 = arith.constant dense<0.000000e+00> : vector<2x32xf32>
    %142 = vector.multi_reduction <add>, %139, %cst_62 [2] : vector<2x32x32xf32> to vector<2x32xf32>
    %143 = vector.shape_cast %142 : vector<2x32xf32> to vector<2x32x1xf32>
    %144 = arith.addf %143, %141 : vector<2x32x1xf32>
    %145 = tpu.reciprocal %144 {approx = true} : vector<2x32x1xf32> -> vector<2x32x1xf32>
    %146 = arith.truncf %139 : vector<2x32x32xf32> to vector<2x32x32xbf16>
    %147 = arith.truncf %122 : vector<2x32x16xf32> to vector<2x32x16xbf16>
    "tpu.trace_start"() <{level = 10 : i32, message = "hqk,hkd->hqd"}> : () -> ()
    %cst_63 = arith.constant dense<0.000000e+00> : vector<2x32x16xf32>
    %148 = tpu.matmul %146, %147, %cst_63 {dimension_numbers = #tpu.dot_dimension_numbers<[2], [1], [1], [2], [0, 0, 0, 1, 1, 2], [0], [0]>} : vector<2x32x32xbf16>, vector<2x32x16xbf16>, vector<2x32x16xf32> -> vector<2x32x16xf32>
    "tpu.trace_stop"() : () -> ()
    %149 = vector.broadcast %141 : vector<2x32x1xf32> to vector<2x32x16xf32>
    %150 = vector.broadcast %38 : vector<2x1x16xf32> to vector<2x32x16xf32>
    %151 = arith.mulf %149, %150 : vector<2x32x16xf32>
    %152 = arith.addf %148, %151 : vector<2x32x16xf32>
    %153 = vector.broadcast %145 : vector<2x32x1xf32> to vector<2x32x16xf32>
    %154 = arith.mulf %152, %153 : vector<2x32x16xf32>
    %155 = arith.truncf %154 : vector<2x32x16xf32> to vector<2x32x16xbf16>
    "tpu.trace_start"() <{level = 10 : i32, message = "hnd,hde->hne"}> : () -> ()
    %cst_64 = arith.constant dense<0.000000e+00> : vector<2x32x32xf32>
    %156 = tpu.matmul %155, %34, %cst_64 {dimension_numbers = #tpu.dot_dimension_numbers<[2], [1], [1], [2], [0, 0, 0, 1, 1, 2], [0], [0]>} : vector<2x32x16xbf16>, vector<2x16x32xbf16>, vector<2x32x32xf32> -> vector<2x32x32xf32>
    "tpu.trace_stop"() : () -> ()
    %cst_65 = arith.constant dense<0.000000e+00> : vector<32x32xf32>
    %157 = vector.multi_reduction <add>, %156, %cst_65 [0] : vector<2x32x32xf32> to vector<32x32xf32>
    %158 = tpu.concatenate %119, %157 in 0 : vector<32x32xf32>, vector<32x32xf32> -> vector<64x32xf32>
    %159 = arith.addf %3, %158 : vector<64x32xf32>
    %160 = vector.extract_strided_slice %7 {offsets = [1, 0], sizes = [1, 32], strides = [1, 1]} : vector<3x32xf32> to vector<1x32xf32>
    %cst_66 = arith.constant dense<0.000000e+00> : vector<64xf32>
    %161 = vector.multi_reduction <add>, %159, %cst_66 [1] : vector<64x32xf32> to vector<64xf32>
    %162 = vector.shape_cast %161 : vector<64xf32> to vector<64x1xf32>
    %cst_67 = arith.constant 3.200000e+01 : f32
    %163 = vector.broadcast %cst_67 : f32 to vector<64x1xf32>
    %164 = arith.divf %162, %163 : vector<64x1xf32>
    %165 = vector.broadcast %164 : vector<64x1xf32> to vector<64x32xf32>
    %166 = arith.subf %159, %165 : vector<64x32xf32>
    %167 = arith.mulf %166, %166 : vector<64x32xf32>
    %cst_68 = arith.constant dense<0.000000e+00> : vector<64xf32>
    %168 = vector.multi_reduction <add>, %167, %cst_68 [1] : vector<64x32xf32> to vector<64xf32>
    %169 = vector.shape_cast %168 : vector<64xf32> to vector<64x1xf32>
    %cst_69 = arith.constant 3.200000e+01 : f32
    %170 = vector.broadcast %cst_69 : f32 to vector<64x1xf32>
    %171 = arith.divf %169, %170 : vector<64x1xf32>
    %cst_70 = arith.constant 9.99999974E-6 : f32
    %172 = vector.broadcast %cst_70 : f32 to vector<64x1xf32>
    %173 = arith.addf %171, %172 : vector<64x1xf32>
    %174 = math.rsqrt %173 : vector<64x1xf32>
    %175 = vector.broadcast %174 : vector<64x1xf32> to vector<64x32xf32>
    %176 = arith.mulf %166, %175 : vector<64x32xf32>
    %177 = vector.broadcast %160 : vector<1x32xf32> to vector<64x32xf32>
    %178 = arith.mulf %176, %177 : vector<64x32xf32>
    %c0_71 = arith.constant 0 : index
    %c0_72 = arith.constant 0 : index
    %c0_73 = arith.constant 0 : index
    %c0_74 = arith.constant 0 : index
    %179 = vector.load %arg13[%c0_71, %c0_72, %c0_73, %c0_74] : memref<1x2x32x16xbf16, #tpu.memory_space<vmem>>, vector<1x2x32x16xbf16>
    %180 = vector.shape_cast %179 : vector<1x2x32x16xbf16> to vector<2x32x16xbf16>
    %c0_75 = arith.constant 0 : index
    %c0_76 = arith.constant 0 : index
    %c0_77 = arith.constant 0 : index
    %c0_78 = arith.constant 0 : index
    %181 = vector.load %arg14[%c0_75, %c0_76, %c0_77, %c0_78] : memref<1x2x32x16xbf16, #tpu.memory_space<vmem>>, vector<1x2x32x16xbf16>
    %182 = vector.shape_cast %181 : vector<1x2x32x16xbf16> to vector<2x32x16xbf16>
    %c0_79 = arith.constant 0 : index
    %c0_80 = arith.constant 0 : index
    %c0_81 = arith.constant 0 : index
    %c0_82 = arith.constant 0 : index
    %183 = vector.load %arg15[%c0_79, %c0_80, %c0_81, %c0_82] : memref<1x2x32x16xbf16, #tpu.memory_space<vmem>>, vector<1x2x32x16xbf16>
    %184 = vector.shape_cast %183 : vector<1x2x32x16xbf16> to vector<2x32x16xbf16>
    %c0_83 = arith.constant 0 : index
    %c0_84 = arith.constant 0 : index
    %c0_85 = arith.constant 0 : index
    %c0_86 = arith.constant 0 : index
    %185 = vector.load %arg16[%c0_83, %c0_84, %c0_85, %c0_86] : memref<1x2x16x32xbf16, #tpu.memory_space<vmem>>, vector<1x2x16x32xbf16>
    %186 = vector.shape_cast %185 : vector<1x2x16x32xbf16> to vector<2x16x32xbf16>
    %c0_87 = arith.constant 0 : index
    %c0_88 = arith.constant 0 : index
    %c0_89 = arith.constant 0 : index
    %c0_90 = arith.constant 0 : index
    %187 = vector.load %arg17[%c0_87, %c0_88, %c0_89, %c0_90] : memref<1x2x1x16xf32, #tpu.memory_space<vmem>>, vector<1x2x1x16xf32>
    %188 = vector.shape_cast %187 : vector<1x2x1x16xf32> to vector<2x1x16xf32>
    %c0_91 = arith.constant 0 : index
    %c0_92 = arith.constant 0 : index
    %c0_93 = arith.constant 0 : index
    %c0_94 = arith.constant 0 : index
    %189 = vector.load %arg18[%c0_91, %c0_92, %c0_93, %c0_94] : memref<1x2x1x16xf32, #tpu.memory_space<vmem>>, vector<1x2x1x16xf32>
    %190 = vector.shape_cast %189 : vector<1x2x1x16xf32> to vector<2x1x16xf32>
    %c0_95 = arith.constant 0 : index
    %c0_96 = arith.constant 0 : index
    %c0_97 = arith.constant 0 : index
    %191 = vector.load %arg19[%c0_95, %c0_96, %c0_97] : memref<1x2x16xf32, #tpu.memory_space<vmem>>, vector<1x2x16xf32>
    %192 = vector.shape_cast %191 : vector<1x2x16xf32> to vector<2x16xf32>
    %193 = arith.truncf %178 : vector<64x32xf32> to vector<64x32xbf16>
    %194 = vector.shape_cast %193 : vector<64x32xbf16> to vector<1x64x32xbf16>
    %195 = vector.shape_cast %194 : vector<1x64x32xbf16> to vector<1x64x32xbf16>
    %196 = vector.broadcast %195 : vector<1x64x32xbf16> to vector<2x64x32xbf16>
    %197 = arith.truncf %5 : vector<16x32xf32> to vector<16x32xbf16>
    %198 = vector.shape_cast %197 : vector<16x32xbf16> to vector<1x16x32xbf16>
    %199 = vector.shape_cast %198 : vector<1x16x32xbf16> to vector<1x16x32xbf16>
    %200 = vector.broadcast %199 : vector<1x16x32xbf16> to vector<2x16x32xbf16>
    "tpu.trace_start"() <{level = 10 : i32, message = "hmk,hkd->hmd"}> : () -> ()
    %cst_98 = arith.constant dense<0.000000e+00> : vector<2x64x16xf32>
    %201 = tpu.matmul %196, %180, %cst_98 {dimension_numbers = #tpu.dot_dimension_numbers<[2], [1], [1], [2], [0, 0, 0, 1, 1, 2], [0], [0]>} : vector<2x64x32xbf16>, vector<2x32x16xbf16>, vector<2x64x16xf32> -> vector<2x64x16xf32>
    %cst_99 = arith.constant dense<0.000000e+00> : vector<2x16x16xf32>
    %202 = tpu.matmul %200, %182, %cst_99 {dimension_numbers = #tpu.dot_dimension_numbers<[2], [1], [1], [2], [0, 0, 0, 1, 1, 2], [0], [0]>} : vector<2x16x32xbf16>, vector<2x32x16xbf16>, vector<2x16x16xf32> -> vector<2x16x16xf32>
    %cst_100 = arith.constant dense<0.000000e+00> : vector<2x16x16xf32>
    %203 = tpu.matmul %200, %184, %cst_100 {dimension_numbers = #tpu.dot_dimension_numbers<[2], [1], [1], [2], [0, 0, 0, 1, 1, 2], [0], [0]>} : vector<2x16x32xbf16>, vector<2x32x16xbf16>, vector<2x16x16xf32> -> vector<2x16x16xf32>
    "tpu.trace_stop"() : () -> ()
    %204 = vector.extract_strided_slice %192 {offsets = [0, 0], sizes = [1, 16], strides = [1, 1]} : vector<2x16xf32> to vector<1x16xf32>
    %205 = vector.shape_cast %204 : vector<1x16xf32> to vector<1x1x16xf32>
    %206 = vector.extract_strided_slice %192 {offsets = [1, 0], sizes = [1, 16], strides = [1, 1]} : vector<2x16xf32> to vector<1x16xf32>
    %207 = vector.shape_cast %206 : vector<1x16xf32> to vector<1x1x16xf32>
    %208 = arith.mulf %201, %201 : vector<2x64x16xf32>
    %cst_101 = arith.constant dense<0.000000e+00> : vector<2x64xf32>
    %209 = vector.multi_reduction <add>, %208, %cst_101 [2] : vector<2x64x16xf32> to vector<2x64xf32>
    %210 = vector.shape_cast %209 : vector<2x64xf32> to vector<2x64x1xf32>
    %cst_102 = arith.constant 1.000000e-24 : f32
    %211 = vector.broadcast %cst_102 : f32 to vector<2x64x1xf32>
    %212 = arith.maximumf %210, %211 : vector<2x64x1xf32>
    %213 = math.rsqrt %212 : vector<2x64x1xf32>
    %214 = vector.broadcast %213 : vector<2x64x1xf32> to vector<2x64x16xf32>
    %215 = arith.mulf %201, %214 : vector<2x64x16xf32>
    %216 = vector.broadcast %205 : vector<1x1x16xf32> to vector<2x64x16xf32>
    %217 = arith.mulf %215, %216 : vector<2x64x16xf32>
    %218 = arith.mulf %202, %202 : vector<2x16x16xf32>
    %cst_103 = arith.constant dense<0.000000e+00> : vector<2x16xf32>
    %219 = vector.multi_reduction <add>, %218, %cst_103 [2] : vector<2x16x16xf32> to vector<2x16xf32>
    %220 = vector.shape_cast %219 : vector<2x16xf32> to vector<2x16x1xf32>
    %cst_104 = arith.constant 1.000000e-24 : f32
    %221 = vector.broadcast %cst_104 : f32 to vector<2x16x1xf32>
    %222 = arith.maximumf %220, %221 : vector<2x16x1xf32>
    %223 = math.rsqrt %222 : vector<2x16x1xf32>
    %224 = vector.broadcast %223 : vector<2x16x1xf32> to vector<2x16x16xf32>
    %225 = arith.mulf %202, %224 : vector<2x16x16xf32>
    %226 = vector.broadcast %207 : vector<1x1x16xf32> to vector<2x16x16xf32>
    %227 = arith.mulf %225, %226 : vector<2x16x16xf32>
    %228 = arith.mulf %188, %188 : vector<2x1x16xf32>
    %cst_105 = arith.constant dense<0.000000e+00> : vector<2x1xf32>
    %229 = vector.multi_reduction <add>, %228, %cst_105 [2] : vector<2x1x16xf32> to vector<2x1xf32>
    %230 = vector.shape_cast %229 : vector<2x1xf32> to vector<2x1x1xf32>
    %cst_106 = arith.constant 1.000000e-24 : f32
    %231 = vector.broadcast %cst_106 : f32 to vector<2x1x1xf32>
    %232 = arith.maximumf %230, %231 : vector<2x1x1xf32>
    %233 = math.rsqrt %232 : vector<2x1x1xf32>
    %234 = vector.broadcast %233 : vector<2x1x1xf32> to vector<2x1x16xf32>
    %235 = arith.mulf %188, %234 : vector<2x1x16xf32>
    %236 = vector.broadcast %207 : vector<1x1x16xf32> to vector<2x1x16xf32>
    %237 = arith.mulf %235, %236 : vector<2x1x16xf32>
    %238 = vector.extract_strided_slice %217 {offsets = [0, 0, 0], sizes = [2, 32, 16], strides = [1, 1, 1]} : vector<2x64x16xf32> to vector<2x32x16xf32>
    %239 = vector.extract_strided_slice %227 {offsets = [0, 0, 0], sizes = [2, 8, 16], strides = [1, 1, 1]} : vector<2x16x16xf32> to vector<2x8x16xf32>
    %240 = vector.extract_strided_slice %203 {offsets = [0, 0, 0], sizes = [2, 8, 16], strides = [1, 1, 1]} : vector<2x16x16xf32> to vector<2x8x16xf32>
    %241 = arith.truncf %238 : vector<2x32x16xf32> to vector<2x32x16xbf16>
    %242 = arith.truncf %239 : vector<2x8x16xf32> to vector<2x8x16xbf16>
    "tpu.trace_start"() <{level = 10 : i32, message = "hqd,hkd->hqk"}> : () -> ()
    %cst_107 = arith.constant dense<0.000000e+00> : vector<2x32x8xf32>
    %243 = tpu.matmul %241, %242, %cst_107 {dimension_numbers = #tpu.dot_dimension_numbers<[2], [2], [1], [1], [0, 0, 0, 1, 1, 1], [0], [0]>} : vector<2x32x16xbf16>, vector<2x8x16xbf16>, vector<2x32x8xf32> -> vector<2x32x8xf32>
    "tpu.trace_stop"() : () -> ()
    %cst_108 = arith.constant 8.000000e+00 : f32
    %244 = vector.broadcast %cst_108 : f32 to vector<2x32x8xf32>
    %245 = arith.mulf %243, %244 : vector<2x32x8xf32>
    %246 = vector.broadcast %237 : vector<2x1x16xf32> to vector<2x32x16xf32>
    %247 = arith.mulf %238, %246 : vector<2x32x16xf32>
    %cst_109 = arith.constant dense<0.000000e+00> : vector<2x32xf32>
    %248 = vector.multi_reduction <add>, %247, %cst_109 [2] : vector<2x32x16xf32> to vector<2x32xf32>
    %249 = vector.shape_cast %248 : vector<2x32xf32> to vector<2x32x1xf32>
    %cst_110 = arith.constant 8.000000e+00 : f32
    %250 = vector.broadcast %cst_110 : f32 to vector<2x32x1xf32>
    %251 = arith.mulf %249, %250 : vector<2x32x1xf32>
    %cst_111 = arith.constant dense<0xFF800000> : vector<2x32xf32>
    %252 = vector.multi_reduction <maximumf>, %245, %cst_111 [2] : vector<2x32x8xf32> to vector<2x32xf32>
    %253 = vector.shape_cast %252 : vector<2x32xf32> to vector<2x32x1xf32>
    %254 = arith.maximumf %253, %251 : vector<2x32x1xf32>
    %255 = vector.broadcast %254 : vector<2x32x1xf32> to vector<2x32x8xf32>
    %256 = arith.subf %245, %255 : vector<2x32x8xf32>
    %257 = math.exp %256 : vector<2x32x8xf32>
    %258 = arith.subf %251, %254 : vector<2x32x1xf32>
    %259 = math.exp %258 : vector<2x32x1xf32>
    %cst_112 = arith.constant dense<0.000000e+00> : vector<2x32xf32>
    %260 = vector.multi_reduction <add>, %257, %cst_112 [2] : vector<2x32x8xf32> to vector<2x32xf32>
    %261 = vector.shape_cast %260 : vector<2x32xf32> to vector<2x32x1xf32>
    %262 = arith.addf %261, %259 : vector<2x32x1xf32>
    %263 = tpu.reciprocal %262 {approx = true} : vector<2x32x1xf32> -> vector<2x32x1xf32>
    %264 = arith.truncf %257 : vector<2x32x8xf32> to vector<2x32x8xbf16>
    %265 = arith.truncf %240 : vector<2x8x16xf32> to vector<2x8x16xbf16>
    "tpu.trace_start"() <{level = 10 : i32, message = "hqk,hkd->hqd"}> : () -> ()
    %cst_113 = arith.constant dense<0.000000e+00> : vector<2x32x16xf32>
    %266 = tpu.matmul %264, %265, %cst_113 {dimension_numbers = #tpu.dot_dimension_numbers<[2], [1], [1], [2], [0, 0, 0, 1, 1, 2], [0], [0]>} : vector<2x32x8xbf16>, vector<2x8x16xbf16>, vector<2x32x16xf32> -> vector<2x32x16xf32>
    "tpu.trace_stop"() : () -> ()
    %267 = vector.broadcast %259 : vector<2x32x1xf32> to vector<2x32x16xf32>
    %268 = vector.broadcast %190 : vector<2x1x16xf32> to vector<2x32x16xf32>
    %269 = arith.mulf %267, %268 : vector<2x32x16xf32>
    %270 = arith.addf %266, %269 : vector<2x32x16xf32>
    %271 = vector.broadcast %263 : vector<2x32x1xf32> to vector<2x32x16xf32>
    %272 = arith.mulf %270, %271 : vector<2x32x16xf32>
    %273 = arith.truncf %272 : vector<2x32x16xf32> to vector<2x32x16xbf16>
    "tpu.trace_start"() <{level = 10 : i32, message = "hnd,hde->hne"}> : () -> ()
    %cst_114 = arith.constant dense<0.000000e+00> : vector<2x32x32xf32>
    %274 = tpu.matmul %273, %186, %cst_114 {dimension_numbers = #tpu.dot_dimension_numbers<[2], [1], [1], [2], [0, 0, 0, 1, 1, 2], [0], [0]>} : vector<2x32x16xbf16>, vector<2x16x32xbf16>, vector<2x32x32xf32> -> vector<2x32x32xf32>
    "tpu.trace_stop"() : () -> ()
    %cst_115 = arith.constant dense<0.000000e+00> : vector<32x32xf32>
    %275 = vector.multi_reduction <add>, %274, %cst_115 [0] : vector<2x32x32xf32> to vector<32x32xf32>
    %276 = vector.extract_strided_slice %217 {offsets = [0, 32, 0], sizes = [2, 32, 16], strides = [1, 1, 1]} : vector<2x64x16xf32> to vector<2x32x16xf32>
    %277 = vector.extract_strided_slice %227 {offsets = [0, 8, 0], sizes = [2, 8, 16], strides = [1, 1, 1]} : vector<2x16x16xf32> to vector<2x8x16xf32>
    %278 = vector.extract_strided_slice %203 {offsets = [0, 8, 0], sizes = [2, 8, 16], strides = [1, 1, 1]} : vector<2x16x16xf32> to vector<2x8x16xf32>
    %279 = arith.truncf %276 : vector<2x32x16xf32> to vector<2x32x16xbf16>
    %280 = arith.truncf %277 : vector<2x8x16xf32> to vector<2x8x16xbf16>
    "tpu.trace_start"() <{level = 10 : i32, message = "hqd,hkd->hqk"}> : () -> ()
    %cst_116 = arith.constant dense<0.000000e+00> : vector<2x32x8xf32>
    %281 = tpu.matmul %279, %280, %cst_116 {dimension_numbers = #tpu.dot_dimension_numbers<[2], [2], [1], [1], [0, 0, 0, 1, 1, 1], [0], [0]>} : vector<2x32x16xbf16>, vector<2x8x16xbf16>, vector<2x32x8xf32> -> vector<2x32x8xf32>
    "tpu.trace_stop"() : () -> ()
    %cst_117 = arith.constant 8.000000e+00 : f32
    %282 = vector.broadcast %cst_117 : f32 to vector<2x32x8xf32>
    %283 = arith.mulf %281, %282 : vector<2x32x8xf32>
    %284 = vector.broadcast %237 : vector<2x1x16xf32> to vector<2x32x16xf32>
    %285 = arith.mulf %276, %284 : vector<2x32x16xf32>
    %cst_118 = arith.constant dense<0.000000e+00> : vector<2x32xf32>
    %286 = vector.multi_reduction <add>, %285, %cst_118 [2] : vector<2x32x16xf32> to vector<2x32xf32>
    %287 = vector.shape_cast %286 : vector<2x32xf32> to vector<2x32x1xf32>
    %cst_119 = arith.constant 8.000000e+00 : f32
    %288 = vector.broadcast %cst_119 : f32 to vector<2x32x1xf32>
    %289 = arith.mulf %287, %288 : vector<2x32x1xf32>
    %cst_120 = arith.constant dense<0xFF800000> : vector<2x32xf32>
    %290 = vector.multi_reduction <maximumf>, %283, %cst_120 [2] : vector<2x32x8xf32> to vector<2x32xf32>
    %291 = vector.shape_cast %290 : vector<2x32xf32> to vector<2x32x1xf32>
    %292 = arith.maximumf %291, %289 : vector<2x32x1xf32>
    %293 = vector.broadcast %292 : vector<2x32x1xf32> to vector<2x32x8xf32>
    %294 = arith.subf %283, %293 : vector<2x32x8xf32>
    %295 = math.exp %294 : vector<2x32x8xf32>
    %296 = arith.subf %289, %292 : vector<2x32x1xf32>
    %297 = math.exp %296 : vector<2x32x1xf32>
    %cst_121 = arith.constant dense<0.000000e+00> : vector<2x32xf32>
    %298 = vector.multi_reduction <add>, %295, %cst_121 [2] : vector<2x32x8xf32> to vector<2x32xf32>
    %299 = vector.shape_cast %298 : vector<2x32xf32> to vector<2x32x1xf32>
    %300 = arith.addf %299, %297 : vector<2x32x1xf32>
    %301 = tpu.reciprocal %300 {approx = true} : vector<2x32x1xf32> -> vector<2x32x1xf32>
    %302 = arith.truncf %295 : vector<2x32x8xf32> to vector<2x32x8xbf16>
    %303 = arith.truncf %278 : vector<2x8x16xf32> to vector<2x8x16xbf16>
    "tpu.trace_start"() <{level = 10 : i32, message = "hqk,hkd->hqd"}> : () -> ()
    %cst_122 = arith.constant dense<0.000000e+00> : vector<2x32x16xf32>
    %304 = tpu.matmul %302, %303, %cst_122 {dimension_numbers = #tpu.dot_dimension_numbers<[2], [1], [1], [2], [0, 0, 0, 1, 1, 2], [0], [0]>} : vector<2x32x8xbf16>, vector<2x8x16xbf16>, vector<2x32x16xf32> -> vector<2x32x16xf32>
    "tpu.trace_stop"() : () -> ()
    %305 = vector.broadcast %297 : vector<2x32x1xf32> to vector<2x32x16xf32>
    %306 = vector.broadcast %190 : vector<2x1x16xf32> to vector<2x32x16xf32>
    %307 = arith.mulf %305, %306 : vector<2x32x16xf32>
    %308 = arith.addf %304, %307 : vector<2x32x16xf32>
    %309 = vector.broadcast %301 : vector<2x32x1xf32> to vector<2x32x16xf32>
    %310 = arith.mulf %308, %309 : vector<2x32x16xf32>
    %311 = arith.truncf %310 : vector<2x32x16xf32> to vector<2x32x16xbf16>
    "tpu.trace_start"() <{level = 10 : i32, message = "hnd,hde->hne"}> : () -> ()
    %cst_123 = arith.constant dense<0.000000e+00> : vector<2x32x32xf32>
    %312 = tpu.matmul %311, %186, %cst_123 {dimension_numbers = #tpu.dot_dimension_numbers<[2], [1], [1], [2], [0, 0, 0, 1, 1, 2], [0], [0]>} : vector<2x32x16xbf16>, vector<2x16x32xbf16>, vector<2x32x32xf32> -> vector<2x32x32xf32>
    "tpu.trace_stop"() : () -> ()
    %cst_124 = arith.constant dense<0.000000e+00> : vector<32x32xf32>
    %313 = vector.multi_reduction <add>, %312, %cst_124 [0] : vector<2x32x32xf32> to vector<32x32xf32>
    %314 = tpu.concatenate %275, %313 in 0 : vector<32x32xf32>, vector<32x32xf32> -> vector<64x32xf32>
    %315 = arith.addf %159, %314 : vector<64x32xf32>
    %316 = vector.extract_strided_slice %7 {offsets = [2, 0], sizes = [1, 32], strides = [1, 1]} : vector<3x32xf32> to vector<1x32xf32>
    %cst_125 = arith.constant dense<0.000000e+00> : vector<64xf32>
    %317 = vector.multi_reduction <add>, %315, %cst_125 [1] : vector<64x32xf32> to vector<64xf32>
    %318 = vector.shape_cast %317 : vector<64xf32> to vector<64x1xf32>
    %cst_126 = arith.constant 3.200000e+01 : f32
    %319 = vector.broadcast %cst_126 : f32 to vector<64x1xf32>
    %320 = arith.divf %318, %319 : vector<64x1xf32>
    %321 = vector.broadcast %320 : vector<64x1xf32> to vector<64x32xf32>
    %322 = arith.subf %315, %321 : vector<64x32xf32>
    %323 = arith.mulf %322, %322 : vector<64x32xf32>
    %cst_127 = arith.constant dense<0.000000e+00> : vector<64xf32>
    %324 = vector.multi_reduction <add>, %323, %cst_127 [1] : vector<64x32xf32> to vector<64xf32>
    %325 = vector.shape_cast %324 : vector<64xf32> to vector<64x1xf32>
    %cst_128 = arith.constant 3.200000e+01 : f32
    %326 = vector.broadcast %cst_128 : f32 to vector<64x1xf32>
    %327 = arith.divf %325, %326 : vector<64x1xf32>
    %cst_129 = arith.constant 9.99999974E-6 : f32
    %328 = vector.broadcast %cst_129 : f32 to vector<64x1xf32>
    %329 = arith.addf %327, %328 : vector<64x1xf32>
    %330 = math.rsqrt %329 : vector<64x1xf32>
    %331 = vector.broadcast %330 : vector<64x1xf32> to vector<64x32xf32>
    %332 = arith.mulf %322, %331 : vector<64x32xf32>
    %333 = vector.broadcast %316 : vector<1x32xf32> to vector<64x32xf32>
    %334 = arith.mulf %332, %333 : vector<64x32xf32>
    %335 = arith.truncf %334 : vector<64x32xf32> to vector<64x32xbf16>
    %c0_130 = arith.constant 0 : index
    %c0_131 = arith.constant 0 : index
    %c0_132 = arith.constant 0 : index
    %336 = vector.load %arg20[%c0_130, %c0_131, %c0_132] : memref<1x32x64xbf16, #tpu.memory_space<vmem>>, vector<1x32x64xbf16>
    %337 = vector.shape_cast %336 : vector<1x32x64xbf16> to vector<32x64xbf16>
    %cst_133 = arith.constant dense<0.000000e+00> : vector<64x64xf32>
    %338 = tpu.matmul %335, %337, %cst_133 {dimension_numbers = #tpu.dot_dimension_numbers<[1], [0], [0], [1], [0, 0, 1, 1], [], []>} : vector<64x32xbf16>, vector<32x64xbf16>, vector<64x64xf32> -> vector<64x64xf32>
    %c0_134 = arith.constant 0 : index
    %c0_135 = arith.constant 0 : index
    %c0_136 = arith.constant 0 : index
    %339 = vector.load %arg21[%c0_134, %c0_135, %c0_136] : memref<1x32x64xbf16, #tpu.memory_space<vmem>>, vector<1x32x64xbf16>
    %340 = vector.shape_cast %339 : vector<1x32x64xbf16> to vector<32x64xbf16>
    %cst_137 = arith.constant dense<0.000000e+00> : vector<64x64xf32>
    %341 = tpu.matmul %335, %340, %cst_137 {dimension_numbers = #tpu.dot_dimension_numbers<[1], [0], [0], [1], [0, 0, 1, 1], [], []>} : vector<64x32xbf16>, vector<32x64xbf16>, vector<64x64xf32> -> vector<64x64xf32>
    %cst_138 = arith.constant 5.000000e-01 : f32
    %342 = vector.broadcast %cst_138 : f32 to vector<64x64xf32>
    %343 = arith.mulf %342, %338 : vector<64x64xf32>
    %cst_139 = arith.constant 0.707106769 : f32
    %344 = vector.broadcast %cst_139 : f32 to vector<64x64xf32>
    %345 = arith.mulf %338, %344 : vector<64x64xf32>
    %346 = math.absf %345 : vector<64x64xf32>
    %cst_140 = arith.constant 0.327591091 : f32
    %347 = vector.broadcast %cst_140 : f32 to vector<64x64xf32>
    %348 = arith.mulf %347, %346 : vector<64x64xf32>
    %cst_141 = arith.constant 1.000000e+00 : f32
    %349 = vector.broadcast %cst_141 : f32 to vector<64x64xf32>
    %350 = arith.addf %349, %348 : vector<64x64xf32>
    %cst_142 = arith.constant 1.000000e+00 : f32
    %351 = vector.broadcast %cst_142 : f32 to vector<64x64xf32>
    %352 = arith.divf %351, %350 : vector<64x64xf32>
    %cst_143 = arith.constant 1.06140542 : f32
    %353 = vector.broadcast %cst_143 : f32 to vector<64x64xf32>
    %354 = arith.mulf %352, %353 : vector<64x64xf32>
    %cst_144 = arith.constant -1.45315206 : f32
    %355 = vector.broadcast %cst_144 : f32 to vector<64x64xf32>
    %356 = arith.addf %355, %354 : vector<64x64xf32>
    %357 = arith.mulf %352, %356 : vector<64x64xf32>
    %cst_145 = arith.constant 1.42141378 : f32
    %358 = vector.broadcast %cst_145 : f32 to vector<64x64xf32>
    %359 = arith.addf %358, %357 : vector<64x64xf32>
    %360 = arith.mulf %352, %359 : vector<64x64xf32>
    %cst_146 = arith.constant -0.284496725 : f32
    %361 = vector.broadcast %cst_146 : f32 to vector<64x64xf32>
    %362 = arith.addf %361, %360 : vector<64x64xf32>
    %363 = arith.mulf %352, %362 : vector<64x64xf32>
    %cst_147 = arith.constant 0.254829586 : f32
    %364 = vector.broadcast %cst_147 : f32 to vector<64x64xf32>
    %365 = arith.addf %364, %363 : vector<64x64xf32>
    %366 = arith.mulf %352, %365 : vector<64x64xf32>
    %cst_148 = arith.constant 0.000000e+00 : f32
    %367 = vector.broadcast %cst_148 : f32 to vector<64x64xf32>
    %368 = arith.subf %367, %346 : vector<64x64xf32>
    %369 = arith.mulf %368, %346 : vector<64x64xf32>
    %370 = math.exp %369 : vector<64x64xf32>
    %371 = arith.mulf %366, %370 : vector<64x64xf32>
    %cst_149 = arith.constant 1.000000e+00 : f32
    %372 = vector.broadcast %cst_149 : f32 to vector<64x64xf32>
    %373 = arith.subf %372, %371 : vector<64x64xf32>
    %cst_150 = arith.constant 0.000000e+00 : f32
    %374 = vector.broadcast %cst_150 : f32 to vector<64x64xf32>
    %375 = arith.cmpf oge, %345, %374 : vector<64x64xf32>
    %cst_151 = arith.constant 0.000000e+00 : f32
    %376 = vector.broadcast %cst_151 : f32 to vector<64x64xf32>
    %377 = arith.subf %376, %373 : vector<64x64xf32>
    %378 = arith.select %375, %373, %377 : vector<64x64xi1>, vector<64x64xf32>
    %cst_152 = arith.constant 1.000000e+00 : f32
    %379 = vector.broadcast %cst_152 : f32 to vector<64x64xf32>
    %380 = arith.addf %379, %378 : vector<64x64xf32>
    %381 = arith.mulf %343, %380 : vector<64x64xf32>
    %382 = arith.mulf %341, %381 : vector<64x64xf32>
    %c0_153 = arith.constant 0 : index
    %c0_154 = arith.constant 0 : index
    %c0_155 = arith.constant 0 : index
    %383 = vector.load %arg5[%c0_153, %c0_154, %c0_155] : memref<1x1x64xf32, #tpu.memory_space<vmem>>, vector<1x1x64xf32>
    %384 = vector.shape_cast %383 : vector<1x1x64xf32> to vector<1x64xf32>
    %cst_156 = arith.constant dense<0.000000e+00> : vector<64xf32>
    %385 = vector.multi_reduction <add>, %382, %cst_156 [1] : vector<64x64xf32> to vector<64xf32>
    %386 = vector.shape_cast %385 : vector<64xf32> to vector<64x1xf32>
    %cst_157 = arith.constant 6.400000e+01 : f32
    %387 = vector.broadcast %cst_157 : f32 to vector<64x1xf32>
    %388 = arith.divf %386, %387 : vector<64x1xf32>
    %389 = vector.broadcast %388 : vector<64x1xf32> to vector<64x64xf32>
    %390 = arith.subf %382, %389 : vector<64x64xf32>
    %391 = arith.mulf %390, %390 : vector<64x64xf32>
    %cst_158 = arith.constant dense<0.000000e+00> : vector<64xf32>
    %392 = vector.multi_reduction <add>, %391, %cst_158 [1] : vector<64x64xf32> to vector<64xf32>
    %393 = vector.shape_cast %392 : vector<64xf32> to vector<64x1xf32>
    %cst_159 = arith.constant 6.400000e+01 : f32
    %394 = vector.broadcast %cst_159 : f32 to vector<64x1xf32>
    %395 = arith.divf %393, %394 : vector<64x1xf32>
    %cst_160 = arith.constant 9.99999974E-6 : f32
    %396 = vector.broadcast %cst_160 : f32 to vector<64x1xf32>
    %397 = arith.addf %395, %396 : vector<64x1xf32>
    %398 = math.rsqrt %397 : vector<64x1xf32>
    %399 = vector.broadcast %398 : vector<64x1xf32> to vector<64x64xf32>
    %400 = arith.mulf %390, %399 : vector<64x64xf32>
    %401 = vector.broadcast %384 : vector<1x64xf32> to vector<64x64xf32>
    %402 = arith.mulf %400, %401 : vector<64x64xf32>
    %403 = arith.truncf %402 : vector<64x64xf32> to vector<64x64xbf16>
    %c0_161 = arith.constant 0 : index
    %c0_162 = arith.constant 0 : index
    %c0_163 = arith.constant 0 : index
    %404 = vector.load %arg22[%c0_161, %c0_162, %c0_163] : memref<1x64x32xbf16, #tpu.memory_space<vmem>>, vector<1x64x32xbf16>
    %405 = vector.shape_cast %404 : vector<1x64x32xbf16> to vector<64x32xbf16>
    %cst_164 = arith.constant dense<0.000000e+00> : vector<64x32xf32>
    %406 = tpu.matmul %403, %405, %cst_164 {dimension_numbers = #tpu.dot_dimension_numbers<[1], [0], [0], [1], [0, 0, 1, 1], [], []>} : vector<64x64xbf16>, vector<64x32xbf16>, vector<64x32xf32> -> vector<64x32xf32>
    %407 = arith.addf %315, %406 : vector<64x32xf32>
    %c0_165 = arith.constant 0 : index
    %c0_166 = arith.constant 0 : index
    %408 = vector.load %arg27[%c0_165, %c0_166] : memref<64x32xf32, #tpu.memory_space<vmem>>, vector<64x32xf32>
    tpu.vector_store %arg27[%c0_165, %c0_166], %407 {strides = array<i32>} : memref<64x32xf32, #tpu.memory_space<vmem>>, vector<64x32xf32>,
    %c1_i32 = arith.constant 1 : i32
    %409 = arith.cmpi eq, %arg1, %c1_i32 : i32
    %410 = arith.extui %409 : i1 to i32
    %c0_i32_167 = arith.constant 0 : i32
    %411 = arith.cmpi ne, %410, %c0_i32_167 : i32
    scf.if %411 {
      %c0_168 = arith.constant 0 : index
      %c0_169 = arith.constant 0 : index
      %412 = vector.load %arg23[%c0_168, %c0_169] : memref<1x32xf32, #tpu.memory_space<vmem>>, vector<1x32xf32>
      %cst_170 = arith.constant dense<0.000000e+00> : vector<64xf32>
      %413 = vector.multi_reduction <add>, %407, %cst_170 [1] : vector<64x32xf32> to vector<64xf32>
      %414 = vector.shape_cast %413 : vector<64xf32> to vector<64x1xf32>
      %cst_171 = arith.constant 3.200000e+01 : f32
      %415 = vector.broadcast %cst_171 : f32 to vector<64x1xf32>
      %416 = arith.divf %414, %415 : vector<64x1xf32>
      %417 = vector.broadcast %416 : vector<64x1xf32> to vector<64x32xf32>
      %418 = arith.subf %407, %417 : vector<64x32xf32>
      %419 = arith.mulf %418, %418 : vector<64x32xf32>
      %cst_172 = arith.constant dense<0.000000e+00> : vector<64xf32>
      %420 = vector.multi_reduction <add>, %419, %cst_172 [1] : vector<64x32xf32> to vector<64xf32>
      %421 = vector.shape_cast %420 : vector<64xf32> to vector<64x1xf32>
      %cst_173 = arith.constant 3.200000e+01 : f32
      %422 = vector.broadcast %cst_173 : f32 to vector<64x1xf32>
      %423 = arith.divf %421, %422 : vector<64x1xf32>
      %cst_174 = arith.constant 9.99999974E-6 : f32
      %424 = vector.broadcast %cst_174 : f32 to vector<64x1xf32>
      %425 = arith.addf %423, %424 : vector<64x1xf32>
      %426 = math.rsqrt %425 : vector<64x1xf32>
      %427 = vector.broadcast %426 : vector<64x1xf32> to vector<64x32xf32>
      %428 = arith.mulf %418, %427 : vector<64x32xf32>
      %429 = vector.broadcast %412 : vector<1x32xf32> to vector<64x32xf32>
      %430 = arith.mulf %428, %429 : vector<64x32xf32>
      %431 = arith.truncf %430 : vector<64x32xf32> to vector<64x32xbf16>
      %c0_175 = arith.constant 0 : index
      %c0_176 = arith.constant 0 : index
      %432 = vector.load %arg24[%c0_175, %c0_176] : memref<32x256xbf16, #tpu.memory_space<vmem>>, vector<32x256xbf16>
      %cst_177 = arith.constant dense<0.000000e+00> : vector<64x256xf32>
      %433 = tpu.matmul %431, %432, %cst_177 {dimension_numbers = #tpu.dot_dimension_numbers<[1], [0], [0], [1], [0, 0, 1, 1], [], []>} : vector<64x32xbf16>, vector<32x256xbf16>, vector<64x256xf32> -> vector<64x256xf32>
      %434 = vector.shape_cast %433 : vector<64x256xf32> to vector<2x32x256xf32>
      %c0_178 = arith.constant 0 : index
      %c0_179 = arith.constant 0 : index
      %c0_180 = arith.constant 0 : index
      %435 = vector.load %arg25[%c0_178, %c0_179, %c0_180] : memref<2x32x256xf32, #tpu.memory_space<vmem>>, vector<2x32x256xf32>
      tpu.vector_store %arg25[%c0_178, %c0_179, %c0_180], %434 {strides = array<i32>} : memref<2x32x256xf32, #tpu.memory_space<vmem>>, vector<2x32x256xf32>,
      %cst_181 = arith.constant 0.000000e+00 : f32
      %436 = vector.broadcast %cst_181 : f32 to vector<64x96xf32>
      %437 = tpu.concatenate %430, %436 in 1 : vector<64x32xf32>, vector<64x96xf32> -> vector<64x128xf32>
      %438 = vector.shape_cast %437 : vector<64x128xf32> to vector<2x32x128xf32>
      %c0_182 = arith.constant 0 : index
      %c0_183 = arith.constant 0 : index
      %c0_184 = arith.constant 0 : index
      %439 = vector.load %arg26[%c0_182, %c0_183, %c0_184] : memref<2x32x128xf32, #tpu.memory_space<vmem>>, vector<2x32x128xf32>
      tpu.vector_store %arg26[%c0_182, %c0_183, %c0_184], %438 {strides = array<i32>} : memref<2x32x128xf32, #tpu.memory_space<vmem>>, vector<2x32x128xf32>,
    } else {
    }
    return
  }
  func.func @transform_0(%arg0: i32, %arg1: i32) -> (i32, i32, i32) {
    %c0_i32 = arith.constant 0 : i32
    %c0_i32_0 = arith.constant 0 : i32
    %c0_i32_1 = arith.constant 0 : i32
    return %arg0, %c0_i32, %c0_i32_0 : i32, i32, i32
  }
  func.func @transform_1(%arg0: i32, %arg1: i32) -> (i32, i32, i32) {
    %c0_i32 = arith.constant 0 : i32
    %c0_i32_0 = arith.constant 0 : i32
    %c0_i32_1 = arith.constant 0 : i32
    return %arg0, %c0_i32, %c0_i32_0 : i32, i32, i32
  }
  func.func @transform_2(%arg0: i32, %arg1: i32) -> (i32, i32, i32) {
    %c0_i32 = arith.constant 0 : i32
    %c0_i32_0 = arith.constant 0 : i32
    %c0_i32_1 = arith.constant 0 : i32
    return %arg1, %c0_i32, %c0_i32_0 : i32, i32, i32
  }
  func.func @transform_3(%arg0: i32, %arg1: i32) -> (i32, i32, i32) {
    %c0_i32 = arith.constant 0 : i32
    %c0_i32_0 = arith.constant 0 : i32
    %c0_i32_1 = arith.constant 0 : i32
    return %arg1, %c0_i32, %c0_i32_0 : i32, i32, i32
  }
  func.func @transform_4(%arg0: i32, %arg1: i32) -> (i32, i32, i32, i32) {
    %c0_i32 = arith.constant 0 : i32
    %c0_i32_0 = arith.constant 0 : i32
    %c0_i32_1 = arith.constant 0 : i32
    %c0_i32_2 = arith.constant 0 : i32
    return %arg1, %c0_i32, %c0_i32_0, %c0_i32_1 : i32, i32, i32, i32
  }
  func.func @transform_5(%arg0: i32, %arg1: i32) -> (i32, i32, i32, i32) {
    %c0_i32 = arith.constant 0 : i32
    %c0_i32_0 = arith.constant 0 : i32
    %c0_i32_1 = arith.constant 0 : i32
    %c0_i32_2 = arith.constant 0 : i32
    return %arg1, %c0_i32, %c0_i32_0, %c0_i32_1 : i32, i32, i32, i32
  }
  func.func @transform_6(%arg0: i32, %arg1: i32) -> (i32, i32, i32, i32) {
    %c0_i32 = arith.constant 0 : i32
    %c0_i32_0 = arith.constant 0 : i32
    %c0_i32_1 = arith.constant 0 : i32
    %c0_i32_2 = arith.constant 0 : i32
    return %arg1, %c0_i32, %c0_i32_0, %c0_i32_1 : i32, i32, i32, i32
  }
  func.func @transform_7(%arg0: i32, %arg1: i32) -> (i32, i32, i32, i32) {
    %c0_i32 = arith.constant 0 : i32
    %c0_i32_0 = arith.constant 0 : i32
    %c0_i32_1 = arith.constant 0 : i32
    %c0_i32_2 = arith.constant 0 : i32
    return %arg1, %c0_i32, %c0_i32_0, %c0_i32_1 : i32, i32, i32, i32
  }
  func.func @transform_8(%arg0: i32, %arg1: i32) -> (i32, i32, i32, i32) {
    %c0_i32 = arith.constant 0 : i32
    %c0_i32_0 = arith.constant 0 : i32
    %c0_i32_1 = arith.constant 0 : i32
    %c0_i32_2 = arith.constant 0 : i32
    return %arg1, %c0_i32, %c0_i32_0, %c0_i32_1 : i32, i32, i32, i32
  }
  func.func @transform_9(%arg0: i32, %arg1: i32) -> (i32, i32, i32, i32) {
    %c0_i32 = arith.constant 0 : i32
    %c0_i32_0 = arith.constant 0 : i32
    %c0_i32_1 = arith.constant 0 : i32
    %c0_i32_2 = arith.constant 0 : i32
    return %arg1, %c0_i32, %c0_i32_0, %c0_i32_1 : i32, i32, i32, i32
  }
  func.func @transform_10(%arg0: i32, %arg1: i32) -> (i32, i32, i32) {
    %c0_i32 = arith.constant 0 : i32
    %c0_i32_0 = arith.constant 0 : i32
    %c0_i32_1 = arith.constant 0 : i32
    return %arg1, %c0_i32, %c0_i32_0 : i32, i32, i32
  }
  func.func @transform_11(%arg0: i32, %arg1: i32) -> (i32, i32, i32, i32) {
    %c0_i32 = arith.constant 0 : i32
    %c0_i32_0 = arith.constant 0 : i32
    %c0_i32_1 = arith.constant 0 : i32
    %c0_i32_2 = arith.constant 0 : i32
    return %arg1, %c0_i32, %c0_i32_0, %c0_i32_1 : i32, i32, i32, i32
  }
  func.func @transform_12(%arg0: i32, %arg1: i32) -> (i32, i32, i32, i32) {
    %c0_i32 = arith.constant 0 : i32
    %c0_i32_0 = arith.constant 0 : i32
    %c0_i32_1 = arith.constant 0 : i32
    %c0_i32_2 = arith.constant 0 : i32
    return %arg1, %c0_i32, %c0_i32_0, %c0_i32_1 : i32, i32, i32, i32
  }
  func.func @transform_13(%arg0: i32, %arg1: i32) -> (i32, i32, i32, i32) {
    %c0_i32 = arith.constant 0 : i32
    %c0_i32_0 = arith.constant 0 : i32
    %c0_i32_1 = arith.constant 0 : i32
    %c0_i32_2 = arith.constant 0 : i32
    return %arg1, %c0_i32, %c0_i32_0, %c0_i32_1 : i32, i32, i32, i32
  }
  func.func @transform_14(%arg0: i32, %arg1: i32) -> (i32, i32, i32, i32) {
    %c0_i32 = arith.constant 0 : i32
    %c0_i32_0 = arith.constant 0 : i32
    %c0_i32_1 = arith.constant 0 : i32
    %c0_i32_2 = arith.constant 0 : i32
    return %arg1, %c0_i32, %c0_i32_0, %c0_i32_1 : i32, i32, i32, i32
  }
  func.func @transform_15(%arg0: i32, %arg1: i32) -> (i32, i32, i32, i32) {
    %c0_i32 = arith.constant 0 : i32
    %c0_i32_0 = arith.constant 0 : i32
    %c0_i32_1 = arith.constant 0 : i32
    %c0_i32_2 = arith.constant 0 : i32
    return %arg1, %c0_i32, %c0_i32_0, %c0_i32_1 : i32, i32, i32, i32
  }
  func.func @transform_16(%arg0: i32, %arg1: i32) -> (i32, i32, i32, i32) {
    %c0_i32 = arith.constant 0 : i32
    %c0_i32_0 = arith.constant 0 : i32
    %c0_i32_1 = arith.constant 0 : i32
    %c0_i32_2 = arith.constant 0 : i32
    return %arg1, %c0_i32, %c0_i32_0, %c0_i32_1 : i32, i32, i32, i32
  }
  func.func @transform_17(%arg0: i32, %arg1: i32) -> (i32, i32, i32) {
    %c0_i32 = arith.constant 0 : i32
    %c0_i32_0 = arith.constant 0 : i32
    %c0_i32_1 = arith.constant 0 : i32
    return %arg1, %c0_i32, %c0_i32_0 : i32, i32, i32
  }
  func.func @transform_18(%arg0: i32, %arg1: i32) -> (i32, i32, i32) {
    %c0_i32 = arith.constant 0 : i32
    %c0_i32_0 = arith.constant 0 : i32
    %c0_i32_1 = arith.constant 0 : i32
    return %arg1, %c0_i32, %c0_i32_0 : i32, i32, i32
  }
  func.func @transform_19(%arg0: i32, %arg1: i32) -> (i32, i32, i32) {
    %c0_i32 = arith.constant 0 : i32
    %c0_i32_0 = arith.constant 0 : i32
    %c0_i32_1 = arith.constant 0 : i32
    return %arg1, %c0_i32, %c0_i32_0 : i32, i32, i32
  }
  func.func @transform_20(%arg0: i32, %arg1: i32) -> (i32, i32, i32) {
    %c0_i32 = arith.constant 0 : i32
    %c0_i32_0 = arith.constant 0 : i32
    %c0_i32_1 = arith.constant 0 : i32
    return %arg1, %c0_i32, %c0_i32_0 : i32, i32, i32
  }
  func.func @transform_21(%arg0: i32, %arg1: i32) -> (i32, i32) {
    %c0_i32 = arith.constant 0 : i32
    %c0_i32_0 = arith.constant 0 : i32
    %c0_i32_1 = arith.constant 0 : i32
    return %c0_i32, %c0_i32_0 : i32, i32
  }
  func.func @transform_22(%arg0: i32, %arg1: i32) -> (i32, i32) {
    %c0_i32 = arith.constant 0 : i32
    %c0_i32_0 = arith.constant 0 : i32
    %c0_i32_1 = arith.constant 0 : i32
    return %c0_i32, %c0_i32_0 : i32, i32
  }
  func.func @transform_23(%arg0: i32, %arg1: i32) -> (i32, i32, i32) {
    %c0_i32 = arith.constant 0 : i32
    %c0_i32_0 = arith.constant 0 : i32
    %c0_i32_1 = arith.constant 0 : i32
    return %arg0, %c0_i32, %c0_i32_0 : i32, i32, i32
  }
  func.func @transform_24(%arg0: i32, %arg1: i32) -> (i32, i32, i32) {
    %c0_i32 = arith.constant 0 : i32
    %c0_i32_0 = arith.constant 0 : i32
    %c0_i32_1 = arith.constant 0 : i32
    return %arg0, %c0_i32, %c0_i32_0 : i32, i32, i32
  }
}

</mosaic_0001>

<bundles_post_ra>
// kernel: transformer_multi_view_forward.1
= control target key start
LH: loop header
LB: loop body
LE: loop exit
PB: predicated region body
PF: predicated region fallthrough
CT: control target
= control target key end

     0   :  { %s10263_s0 = inlined_call_operand.vmem [shape: f32[2,32,32], index: 0, kind: input, shape index: {}]   ;;  %s10264_s1 = inlined_call_operand.vmem [shape: f32[2,8,32], index: 1, kind: input, shape index: {}]   ;;  %s10265_s2 = inlined_call_operand.vmem [shape: f32[2,3,32], index: 2, kind: input, shape index: {}]   ;;  %s10266_s3 = inlined_call_operand.vmem [shape: f32[2,1,64], index: 3, kind: input, shape index: {}]   ;;  %s10267_s4 = inlined_call_operand.vmem [shape: bf16[2,2,32,16], index: 4, kind: input, shape index: {}]   ;;  %s10268_s5 = inlined_call_operand.vmem [shape: bf16[2,2,32,16], index: 5, kind: input, shape index: {}]   ;;  %s10269_s6 = inlined_call_operand.vmem [shape: bf16[2,2,32,16], index: 6, kind: input, shape index: {}]   ;;  %s10270_s7 = inlined_call_operand.vmem [shape: bf16[2,2,16,32], index: 7, kind: input, shape index: {}]   ;;  %s10271_s8 = inlined_call_operand.vmem [shape: f32[2,2,1,16], index: 8, kind: input, shape index: {}]   ;;  %s10272_s9 = inlined_call_operand.vmem [shape: f32[2,2,1,16], index: 9, kind: input, shape index: {}]   ;;  %s10273_s10 = inlined_call_operand.vmem [shape: f32[2,2,16], index: 10, kind: input, shape index: {}]   ;;  %s10274_s11 = inlined_call_operand.vmem [shape: bf16[2,2,32,16], index: 11, kind: input, shape index: {}]   ;;  %s10275_s12 = inlined_call_operand.vmem [shape: bf16[2,2,32,16], index: 12, kind: input, shape index: {}]   ;;  %s10276_s13 = inlined_call_operand.vmem [shape: bf16[2,2,32,16], index: 13, kind: input, shape index: {}]   ;;  %s10277_s14 = inlined_call_operand.vmem [shape: bf16[2,2,16,32], index: 14, kind: input, shape index: {}]   ;;  %s10278_s15 = inlined_call_operand.vmem [shape: f32[2,2,1,16], index: 15, kind: input, shape index: {}]   ;;  %s10279_s16 = inlined_call_operand.vmem [shape: f32[2,2,1,16], index: 16, kind: input, shape index: {}]   ;;  %s10280_s17 = inlined_call_operand.vmem [shape: f32[2,2,16], index: 17, kind: input, shape index: {}]   ;;  %s10281_s18 = inlined_call_operand.vmem [shape: bf16[2,32,64], index: 18, kind: input, shape index: {}]   ;;  %s10282_s19 = inlined_call_operand.vmem [shape: bf16[2,32,64], index: 19, kind: input, shape index: {}]   ;;  %s10283_s20 = inlined_call_operand.vmem [shape: bf16[2,64,32], index: 20, kind: input, shape index: {}]   ;;  %s10284_s21 = inlined_call_operand.vmem [shape: f32[1,32], index: 21, kind: input, shape index: {}]   ;;  %s10285_s22 = inlined_call_operand.vmem [shape: bf16[32,256], index: 22, kind: input, shape index: {}]   ;;  %s10286_s23 = inlined_call_operand.hbm [shape: f32[2,32,256], index: 23, kind: output, shape index: {0}]   ;;  %s10287_s24 = inlined_call_operand.hbm [shape: f32[2,32,128], index: 24, kind: output, shape index: {1}]  }
   0x1   :  { %10302 = sst [smem:[#allocation19_spill]] %s10263_s0 }
   0x2   :  { %10303 = sst [smem:[#allocation20_spill]] %s10264_s1 }
   0x3   :  { %10304 = sst [smem:[#allocation21_spill]] %s10265_s2 }
   0x4   :  { %10305 = sst [smem:[#allocation22_spill]] %s10266_s3 }
   0x5   :  { %10306 = sst [smem:[#allocation23_spill]] %s10267_s4 }
   0x6   :  { %10307 = sst [smem:[#allocation24_spill]] %s10268_s5 }
   0x7   :  { %10308 = sst [smem:[#allocation25_spill]] %s10269_s6 }
   0x8   :  { %10309 = sst [smem:[#allocation26_spill]] %s10270_s7 }
   0x9   :  { %10310 = sst [smem:[#allocation27_spill]] %s10271_s8 }
   0xa   :  { %10311 = sst [smem:[#allocation28_spill]] %s10272_s9 }
   0xb   :  { %10312 = sst [smem:[#allocation29_spill]] %s10274_s11 }
   0xc   :  { %10313 = sst [smem:[#allocation30_spill]] %s10275_s12 }
   0xd   :  { %10314 = sst [smem:[#allocation31_spill]] %s10276_s13 }
   0xe   :  { %10315 = sst [smem:[#allocation32_spill]] %s10277_s14 }
   0xf   :  { %10316 = sst [smem:[#allocation33_spill]] %s10278_s15 }
  0x10   :  { %10317 = sst [smem:[#allocation34_spill]] %s10282_s19 }
  0x11   :  { %10318 = sst [smem:[#allocation35_spill]] %s10283_s20 }
  0x12   :  { %10319 = sst [smem:[#allocation36_spill]] %s10284_s21 }
  0x13   :  { %10320 = sst [smem:[#allocation37_spill]] %s10285_s22 }
  0x14   :  { %10321 = sst [smem:[#allocation38_spill]] %s10286_s23 }
  0x15   :  { %10322 = sst [smem:[#allocation39_spill]] %s10287_s24 }
  0x16   :  { %30 = vsyncpa [#allocation4], 0 }
  0x17   :  { %31 = vsyncpa [#allocation6], 0  ;;  %s7957_s5 = smov 0   ;;  %s7959_s26 = smov 0  }
  0x18   :  { %s7961_s27 = smov 0  }
  0x19 LB: > { %10323 = sst [smem:[#allocation9_spill]] %s7812_s5  ;;  %s46_s6 = sadd.s32 1, %s7816_s26  ;;  %s7820_s27 = sphi %s7961_s27, %s37_s27   ;;  %s7816_s26 = sphi %s7959_s26, %s10385_s26   ;;  %s7812_s5 = sphi %s7957_s5, %s10384_s5  }
  0x1a   : > { %10324 = sst [smem:[#allocation10_spill]] %s7816_s26  ;;  %p47_p0 = scmp.ge.s32.totalorder %s46_s6, 2 }
  0x1b   : > { %10325 = sst [smem:[#allocation11_spill]] %s7820_s27  ;;  %p6515_p1 = scmp.ge.s32.totalorder %s7820_s27, 1 }
  0x1c   : > { %p873_p2 = scmp.lt.s32.totalorder %s7820_s27, 3  ;;  %s10387_s6 = smov (%p47_p0, %s46_s6), 0 }
  0x1d   : > { %10326 = sst [smem:[#allocation12_spill]] %s10387_s6 }
  0x1e   : > { %p874_p3 = pnand %p6515_p1, %p873_p2 }
  0x20   : > { %877 = sbr.rel (%p874_p3) target bundleno = 6149 (0x1805), region = 112 }
  0x27   : > { %p1039_p4 = scmp.lt.s32.totalorder %s7812_s5, 1  ;;  %s10329_s4 = sld [smem:[#allocation21_spill]] }
  0x28   : > { %s10330_s24 = sld [smem:[#allocation23_spill]]  ;;  %s10331_s22 = sld [smem:[#allocation24_spill]] }
  0x29   : > { %s7980_s2 = scalar_select %p1039_p4, %s7812_s5, 1 }
  0x2a   : > { %s10332_s0 = sld [smem:[#allocation25_spill]]  ;;  %s10333_s8 = sld [smem:[#allocation26_spill]] }
  0x2b   : > { %10327 = sst [smem:[#allocation13_spill]] %s7980_s2  ;;  %s6516_s29 = sshll.u32 %s7980_s2, 2 }
  0x2c   : > { %s6699_s28 = sshll.u32 %s7980_s2, 5  ;;  %s6702_s30 = sshll.u32 %s7980_s2, 4 }
  0x2d   : > { %s7990_s1 = scalar_lea.vmem %s10329_s4, %s6516_s29  ;;  %s8015_s3 = sshll.u32 %s7980_s2, 1 }
  0x2e   : > { %s7996_s23 = scalar_lea.vmem %s10330_s24, %s6699_s28  ;;  %s8001_s5 = scalar_lea.vmem %s10331_s22, %s6699_s28 }
  0x2f   : > { %s10335_s6 = sld [smem:[#allocation27_spill]]  ;;  %s10337_s9 = sld [smem:[#allocation28_spill]] }
  0x30   : > { %s8006_s7 = scalar_lea.vmem %s10332_s0, %s6699_s28  ;;  %s8012_s4 = scalar_lea.vmem %s10333_s8, %s6702_s30 }
  0x31   : > { %10334 = sst [smem:[#allocation14_spill]] %s8012_s4  ;;  %s10339_s12 = sld [smem:[#allocation30_spill]] }
  0x32   : > { %s10338_s11 = sld [smem:[#allocation29_spill]]  ;;  %s10340_s13 = sld [smem:[#allocation31_spill]] }
  0x33   : > { %s10341_s14 = sld [smem:[#allocation32_spill]]  ;;  %s10343_s15 = sld [smem:[#allocation33_spill]] }
  0x34   : > { %s8063_s2 = scalar_lea.vmem %s10279_s16, %s8015_s3  ;;  %s10347_s8 = sld [smem:[#allocation9_spill]] }
  0x35   : > { %s8021_s19 = scalar_lea.vmem %s10335_s6, %s8015_s3  ;;  %s8027_s22 = scalar_lea.vmem %s10337_s9, %s8015_s3 }
  0x36   : > { %10336 = sst [smem:[#allocation15_spill]] %s8021_s19  ;;  %s8072_s9 = scalar_lea.vmem %s10281_s18, %s6702_s30 }
  0x37   : > { %s8041_s4 = scalar_lea.vmem %s10339_s12, %s6699_s28 }
  0x38   : > { %s8036_s24 = scalar_lea.vmem %s10338_s11, %s6699_s28  ;;  %s8046_s20 = scalar_lea.vmem %s10340_s13, %s6699_s28 }
  0x39   : > { %s8051_s27 = scalar_lea.vmem %s10341_s14, %s6702_s30  ;;  %s8057_s29 = scalar_lea.vmem %s10343_s15, %s8015_s3 }
  0x3a   : > { %10342 = sst [smem:[#allocation16_spill]] %s8051_s27  ;;  %s10345_s27 = sld [smem:[#allocation34_spill]] }
  0x3b   : > { %10344 = sst [smem:[#allocation17_spill]] %s8057_s29  ;;  %s10346_s29 = sld [smem:[#allocation35_spill]] }
  0x3c   : > { %p6545_p5 = scmp.ne.s32.totalorder %s10347_s8, 0 }
  0x3d   : > { %s10348_s19 = sld [smem:[#allocation19_spill]] (!%p6545_p5)  ;;  %vm1140_vm0 = vcmask (!%p6545_p5), 261120  }
  0x3e   : > { %1131 = sbr.rel (%p6545_p5) target bundleno = 72 (0x48), region = 116 }
  0x40   : > { %s8077_s25 = scalar_lea.vmem %s10345_s27, %s6702_s30 }
  0x41   : > { %s8082_s11 = scalar_lea.vmem %s10346_s29, %s6699_s28 }
  0x43   : > { %v1132_v0 = vld [vmem:[%s10348_s19] sm:$0xff] (!%p6545_p5)  ;;  %v1133_v1 = vld [vmem:[%s10348_s19 + $0x8] sm:$0xff] (!%p6545_p5)  ;;  %v1134_v2 = vld [vmem:[%s10348_s19 + $0x10] sm:$0xff] (!%p6545_p5) }
  0x44   : > { %1141 = vst.msk [vmem:[#allocation2] sm:$0xff] (!%p6545_p5), %vm1140_vm0, %v1132_v0  ;;  %1142 = vst.msk [vmem:[#allocation2 + $0x8] sm:$0xff] (!%p6545_p5), %vm1140_vm0, %v1133_v1  ;;  %v1135_v3 = vld [vmem:[%s10348_s19 + $0x18] sm:$0xff] (!%p6545_p5)  ;;  %v1136_v4 = vld [vmem:[%s10348_s19 + $0x20] sm:$0xff] (!%p6545_p5) }
  0x45   : > { %1143 = vst.msk [vmem:[#allocation2 + $0x10] sm:$0xff] %vm1140_vm0, %v1134_v2  ;;  %v1137_v5 = vld [vmem:[%s10348_s19 + $0x28] sm:$0xff]  ;;  %1144 = vst.msk [vmem:[#allocation2 + $0x18] sm:$0xff] %vm1140_vm0, %v1135_v3  ;;  %v1138_v6 = vld [vmem:[%s10348_s19 + $0x30] sm:$0xff] }
  0x46   : > { %1145 = vst.msk [vmem:[#allocation2 + $0x20] sm:$0xff] %vm1140_vm0, %v1136_v4  ;;  %1146 = vst.msk [vmem:[#allocation2 + $0x28] sm:$0xff] %vm1140_vm0, %v1137_v5  ;;  %v1139_v7 = vld [vmem:[%s10348_s19 + $0x38] sm:$0xff] }
  0x47   : > { %1147 = vst.msk [vmem:[#allocation2 + $0x30] sm:$0xff] %vm1140_vm0, %v1138_v6  ;;  %1148 = vst.msk [vmem:[#allocation2 + $0x38] sm:$0xff] %vm1140_vm0, %v1139_v7 }
  0x48 PF: > { %vm1160_vm1 = vcmask 261120   ;;  %v7268_v0 = vld [vmem:[%s7996_s23] sm:$0xff]   ;;  %v7269_v1 = vld [vmem:[%s7996_s23 + $0x8] sm:$0xff]   ;;  %v8160_v2 = vld [vmem:[%s7996_s23 + $0x10] sm:$0xff]   ;;  %vm1805_vm2 = vcmask 130048   ;;  %vm2056_vm3 = vcmask 122880   ;;  %s10351_s6 = scalar_lea.vmem %s10273_s10, %s8015_s3  ;;  %s10363_s29 = scalar_lea.vmem %s10280_s17, %s8015_s3 }
  0x49   : > { %7198 = vmatprep.subr.bf16.mxu1 %v7268_v0  ;;  %6870 = vmatprep.subr.bf16.mxu0 %v7268_v0  ;;  %v8164_v3 = vld [vmem:[%s8001_s5] sm:$0xff]   ;;  %s10352_s14 = sld [smem:[#allocation14_spill]]  ;;  %vm7824_vm4 = vmmov 0   ;;  %vm4319_vm5 = vcmask 1043456   ;;  %vm4166_vm6 = vcmask 64512   ;;  %s10364_s3 = sld [smem:[#allocation16_spill]] }
  0x4a   : > { %7200 = vmatpush3.bf16.msra.mxu1 %v7268_v0  ;;  %6871 = vmatpush3.bf16.msra.mxu0 %v7268_v0  ;;  %v7274_v0 = vld [vmem:[%s8001_s5 + $0x8] sm:$0xff]   ;;  %vm5657_vm10 = vcmask 523264   ;;  %s10375_s21 = sld [smem:[#allocation9_spill]] }
  0x4b   : > { %7199 = vmatprep.subr.bf16.mxu1 %v7269_v1  ;;  %6872 = vmatprep.subr.bf16.mxu0 %v7269_v1 }
  0x4d   : > { %v1153_v8 = vld [vmem:[#allocation2 + $0x20] sm:$0xff]  ;;  %v1154_v10 = vld [vmem:[#allocation2 + $0x28] sm:$0xff] }
  0x4e   : > { %v1155_v9 = vld [vmem:[#allocation2 + $0x30] sm:$0xff]  ;;  %v1173_v11 = vsel %vm1160_vm1, %v1153_v8, 0.0  ;;  %v1156_v13 = vld [vmem:[#allocation2 + $0x38] sm:$0xff]  ;;  %v1149_v14 = vld [vmem:[#allocation2] sm:$0xff]  ;;  %v1176_v16 = vsel %vm1160_vm1, %v1154_v10, 0.0  ;;  %7201 = vmatpush3.bf16.msra.mxu1 %v7269_v1  ;;  %6873 = vmatpush3.bf16.msra.mxu0 %v7269_v1 }
  0x4f   : > { %v1179_v12 = vsel %vm1160_vm1, %v1155_v9, 0.0  ;;  %v1150_v15 = vld [vmem:[#allocation2 + $0x8] sm:$0xff]  ;;  %1174 = vadd.xlane.f32.xlu0 %v1173_v11  ;;  %v1182_v17 = vsel %vm1160_vm1, %v1156_v13, 0.0  ;;  %v1161_v18 = vsel %vm1160_vm1, %v1149_v14, 0.0  ;;  %v1151_v20 = vld [vmem:[#allocation2 + $0x10] sm:$0xff]  ;;  %v1152_v21 = vld [vmem:[#allocation2 + $0x18] sm:$0xff]  ;;  %6882 = vmatprep.subr.bf16.mxu1 %v8160_v2  ;;  %v1266_v11 = vlaneseq }
  0x50   : > { %1180 = vadd.xlane.f32.xlu1 %v1179_v12  ;;  %v1164_v19 = vsel %vm1160_vm1, %v1150_v15, 0.0  ;;  %v1167_v22 = vsel %vm1160_vm1, %v1151_v20, 0.0  ;;  %v1170_v23 = vsel %vm1160_vm1, %v1152_v21, 0.0  ;;  %6894 = vmatprep.subr.bf16.mxu0 %v8164_v3  ;;  %v7275_v1 = vld [vmem:[%s8001_s5 + $0x18] sm:$0xff]   ;;  %p6683_p6 = scmp.ne.s32.totalorder %s10375_s21, 1 }
  0x51   : > { %s10376_s12 = sld [smem:[#allocation37_spill]] (!%p6683_p6) }
  0x53   : > { %1177 = vadd.xlane.f32.xlu0 %v1176_v16 }
  0x54   : > { %1183 = vadd.xlane.f32.xlu1 %v1182_v17 }
  0x57   : > { %1162 = vadd.xlane.f32.xlu0 %v1161_v18  ;;  %v8167_v18 = vshrl.u32 %v1266_v11, 7 }
  0x58   : > { %1165 = vadd.xlane.f32.xlu1 %v1164_v19 }
  0x59   : > { %10349 = vst [vmem:[#allocation18_spill] sm:$0xff] %v8167_v18 }
  0x5b   : > { %1168 = vadd.xlane.f32.xlu0 %v1167_v22 }
  0x5c   : > { %1171 = vadd.xlane.f32.xlu1 %v1170_v23 }
  0xdc   : > { %v1175_v24 = vpop.xlane.xlu0 %1174 }
  0xdd   : > { %v1181_v25 = vpop.xlane.xlu1 %1180  ;;  %v1190_v26 = vmul.f32 0.03125, %v1175_v24 }
  0xde   : > { %v1192_v27 = vmul.f32 0.03125, %v1181_v25  ;;  %v8170_v25 = vsub.s32 0, %v8167_v18 }
  0xdf   : > { %v8117_v28 = vsub.f32 %v1153_v8, %v1190_v26 }
  0xe0   : > { %v8119_v29 = vsub.f32 %v1155_v9, %v1192_v27  ;;  %v1178_v30 = vpop.xlane.xlu0 %1177  ;;  %v1159_v27 = vld [vmem:[%s7990_s1] sm:$0x7] }
  0xe1   : > { %v1184_v31 = vpop.xlane.xlu1 %1183  ;;  %v1191_v32 = vmul.f32 0.03125, %v1178_v30  ;;  %v1206_v34 = vmul.f32 %v8117_v28, %v8117_v28 }
  0xe2   : > { %v1193_v33 = vmul.f32 0.03125, %v1184_v31  ;;  %v1208_v35 = vmul.f32 %v8119_v29, %v8119_v29 }
  0xe3   : > { %v8125_v36 = vsub.f32 %v1154_v10, %v1191_v32  ;;  %v1222_v38 = vsel %vm1160_vm1, %v1206_v34, 0.0  ;;  %v1269_v34 = vrot.slane %v1159_v27, %v8170_v25 }
  0xe4   : > { %v8127_v37 = vsub.f32 %v1156_v13, %v1193_v33  ;;  %1223 = vadd.xlane.f32.xlu0 %v1222_v38  ;;  %v1163_v39 = vpop.xlane.xlu0 %1162  ;;  %v1228_v41 = vsel %vm1160_vm1, %v1208_v35, 0.0 }
  0xe5   : > { %v1166_v40 = vpop.xlane.xlu1 %1165  ;;  %v1186_v42 = vmul.f32 0.03125, %v1163_v39  ;;  %v1207_v43 = vmul.f32 %v8125_v36, %v8125_v36 }
  0xe6   : > { %v1187_v44 = vmul.f32 0.03125, %v1166_v40  ;;  %v1209_v45 = vmul.f32 %v8127_v37, %v8127_v37 }
  0xe7   : > { %v8135_v46 = vsub.f32 %v1149_v14, %v1186_v42  ;;  %v1225_v47 = vsel %vm1160_vm1, %v1207_v43, 0.0 }
  0xe8   : > { %v8138_v48 = vsub.f32 %v1150_v15, %v1187_v44  ;;  %1226 = vadd.xlane.f32.xlu1 %v1225_v47  ;;  %1229 = vadd.xlane.f32.xlu0 %v1228_v41  ;;  %v1169_v49 = vpop.xlane.xlu0 %1168  ;;  %v1231_v50 = vsel %vm1160_vm1, %v1209_v45, 0.0 }
  0xe9   : > { %v1172_v51 = vpop.xlane.xlu1 %1171  ;;  %v1188_v52 = vmul.f32 0.03125, %v1169_v49  ;;  %v1202_v54 = vmul.f32 %v8135_v46, %v8135_v46 }
  0xea   : > { %v1189_v53 = vmul.f32 0.03125, %v1172_v51  ;;  %v1203_v55 = vmul.f32 %v8138_v48, %v8138_v48 }
  0xeb   : > { %v8145_v56 = vsub.f32 %v1151_v20, %v1188_v52  ;;  %v1210_v58 = vsel %vm1160_vm1, %v1202_v54, 0.0 }
  0xec   : > { %v8147_v57 = vsub.f32 %v1152_v21, %v1189_v53  ;;  %1232 = vadd.xlane.f32.xlu1 %v1231_v50  ;;  %1211 = vadd.xlane.f32.xlu0 %v1210_v58  ;;  %v1213_v59 = vsel %vm1160_vm1, %v1203_v55, 0.0 }
  0xed   : > { %v1204_v60 = vmul.f32 %v8145_v56, %v8145_v56 }
  0xee   : > { %v1205_v61 = vmul.f32 %v8147_v57, %v8147_v57 }
  0xef   : > { %v1216_v62 = vsel %vm1160_vm1, %v1204_v60, 0.0 }
  0xf0   : > { %1214 = vadd.xlane.f32.xlu1 %v1213_v59  ;;  %1217 = vadd.xlane.f32.xlu0 %v1216_v62  ;;  %v1219_v63 = vsel %vm1160_vm1, %v1205_v61, 0.0  ;;  %v7273_v62 = vld [vmem:[%s8001_s5 + $0x10] sm:$0xff]  }
  0xf4   : > { %1220 = vadd.xlane.f32.xlu1 %v1219_v63 }
 0x171   : > { %v1224_v4 = vpop.xlane.xlu0 %1223 }
 0x172   : > { %v1238_v5 = vmul.f32 0.03125, %v1224_v4  ;;  %v7277_v4 = vld [vmem:[%s8006_s7 + $0x8] sm:$0xff]  }
 0x174   : > { %v1246_v6 = vadd.f32 1e-05, %v1238_v5 }
 0x175   : > { %v1227_v7 = vpop.xlane.xlu1 %1226  ;;  %v1230_v8 = vpop.xlane.xlu0 %1229 }
 0x176   : > { %7304 = vrsqrt.f32 %v1246_v6  ;;  %v1239_v9 = vmul.f32 0.03125, %v1227_v7  ;;  %v1240_v10 = vmul.f32 0.03125, %v1230_v8 }
 0x178   : > { %v1247_v12 = vadd.f32 1e-05, %v1239_v9  ;;  %v1248_v13 = vadd.f32 1e-05, %v1240_v10 }
 0x179   : > { %v1233_v14 = vpop.xlane.xlu1 %1232  ;;  %v1212_v15 = vpop.xlane.xlu0 %1211 }
 0x17a   : > { %7306 = vrsqrt.f32 %v1247_v12  ;;  %v1241_v16 = vmul.f32 0.03125, %v1233_v14  ;;  %v1234_v17 = vmul.f32 0.03125, %v1212_v15 }
 0x17b   : > { %7308 = vrsqrt.f32 %v1248_v13 }
 0x17c   : > { %v1249_v19 = vadd.f32 1e-05, %v1241_v16  ;;  %v1242_v20 = vadd.f32 1e-05, %v1234_v17 }
 0x17d   : > { %v1215_v21 = vpop.xlane.xlu1 %1214  ;;  %v1218_v22 = vpop.xlane.xlu0 %1217 }
 0x17e   : > { %7310 = vrsqrt.f32 %v1249_v19  ;;  %v1235_v23 = vmul.f32 0.03125, %v1215_v21  ;;  %v1236_v24 = vmul.f32 0.03125, %v1218_v22 }
 0x17f   : > { %7312 = vrsqrt.f32 %v1242_v20 }
 0x180   : > { %v7305_v26 = vpop.eup %7304  ;;  %v1243_v30 = vadd.f32 1e-05, %v1235_v23  ;;  %v1244_v31 = vadd.f32 1e-05, %v1236_v24 }
 0x181   : > { %v1221_v32 = vpop.xlane.xlu1 %1220  ;;  %v1262_v35 = vmul.f32 %v7305_v26, %v8117_v28 }
 0x182   : > { %7314 = vrsqrt.f32 %v1243_v30  ;;  %v1237_v33 = vmul.f32 0.03125, %v1221_v32 }
 0x183   : > { %7316 = vrsqrt.f32 %v1244_v31  ;;  %v1274_v42 = vmul.f32 %v1269_v34, %v1262_v35 }
 0x184   : > { %v7307_v38 = vpop.eup %7306  ;;  %v1245_v39 = vadd.f32 1e-05, %v1237_v33 }
 0x185   : > { %v7309_v40 = vpop.eup %7308  ;;  %v1263_v41 = vmul.f32 %v7307_v38, %v8125_v36 }
 0x186   : > { %7318 = vrsqrt.f32 %v1245_v39  ;;  %v1264_v44 = vmul.f32 %v7309_v40, %v8119_v29  ;;  %v7271_v29 = vld [vmem:[%s7996_s23 + $0x18] sm:$0xff]   ;;  %s10350_s23 = sld [smem:[#allocation15_spill]] }
 0x187   : > { %v1275_v43 = vmul.f32 %v1269_v34, %v1263_v41 }
 0x188   : > { %v7311_v45 = vpop.eup %7310  ;;  %v1276_v51 = vmul.f32 %v1269_v34, %v1264_v44 }
 0x189   : > { %v7313_v47 = vpop.eup %7312  ;;  %v1265_v49 = vmul.f32 %v7311_v45, %v8127_v37  ;;  %v8178_v50 = vpack.c.bf16 %v1275_v43, %v1274_v42 }
 0x18a   : > { %v1258_v52 = vmul.f32 %v7313_v47, %v8135_v46 }
 0x18b   : > { %v1277_v28 = vmul.f32 %v1269_v34, %v1265_v49  ;;  %6878 = vmatprep.mubr.msk.bf16.mxu1 %vm1160_vm1, %v8178_v50 }
 0x18c   : > { %v7315_v36 = vpop.eup %7314  ;;  %v1270_v58 = vmul.f32 %v1269_v34, %v1258_v52 }
 0x18d   : > { %v7317_v53 = vpop.eup %7316  ;;  %v1259_v54 = vmul.f32 %v7315_v36, %v8138_v48  ;;  %v1314_v55 = vpack.c.bf16 %v1277_v28, %v1276_v51 }
 0x18e   : > { %v1260_v37 = vmul.f32 %v7317_v53, %v8145_v56 }
 0x18f   : > { %v1271_v59 = vmul.f32 %v1269_v34, %v1259_v54  ;;  %6879 = vmatmul.mubr.msk.bf16.vlgmr.msra.gmra.mrb[0].mxu1 %vm1160_vm1, %v1314_v55 }
 0x190   : > { %v7319_v60 = vpop.eup %7318  ;;  %6883 = vmatpush3.bf16.msra.mxu1 %v8160_v2  ;;  %v1272_v48 = vmul.f32 %v1269_v34, %v1260_v37  ;;  %v7278_v2 = vld [vmem:[%s8006_s7 + $0x10] sm:$0xff]  }
 0x191   : > { %v1261_v46 = vmul.f32 %v7319_v60, %v8147_v57  ;;  %v1311_v61 = vpack.c.bf16 %v1271_v59, %v1270_v58  ;;  %6884 = vmatprep.subr.bf16.mxu1 %v7271_v29  ;;  %v7276_v57 = vld [vmem:[%s8006_s7] sm:$0xff]  }
 0x193   : > { %v1273_v63 = vmul.f32 %v1269_v34, %v1261_v46  ;;  %6874 = vmatprep.mubr.msk.bf16.mxu0 %vm1160_vm1, %v1311_v61  ;;  %6886 = vmatprep.mubr.msk.bf16.mxu1 %vm1160_vm1, %v1311_v61 }
 0x194   : > { %6885 = vmatpush3.bf16.msra.mxu1 %v7271_v29 }
 0x195   : > { %v1312_v56 = vpack.c.bf16 %v1273_v63, %v1272_v48  ;;  %6906 = vmatprep.subr.bf16.mxu1 %v7273_v62 }
 0x197   : > { %6875 = vmatmul.mubr.msk.bf16.vlgmr.msra.gmra.mrb[0].mxu0 %vm1160_vm1, %v1312_v56  ;;  %6887 = vmatmul.mubr.msk.bf16.vlgmr.msra.gmra.mrb[4].mxu1 %vm1160_vm1, %v1312_v56 }
 0x198   : > { %6890 = vmatprep.mubr.msk.bf16.mxu1 %vm1160_vm1, %v8178_v50  ;;  %6895 = vmatpush3.bf16.msra.mxu0 %v8164_v3  ;;  %v7279_v3 = vld [vmem:[%s8006_s7 + $0x18] sm:$0xff]  }
 0x199   : > { %6898 = vmatprep.mubr.msk.bf16.mxu0 %vm1160_vm1, %v1311_v61  ;;  %6907 = vmatpush3.bf16.msra.mxu1 %v7273_v62 }
 0x19a   : > { %6896 = vmatprep.subr.bf16.mxu0 %v7274_v0  ;;  %6908 = vmatprep.subr.bf16.mxu1 %v7275_v1 }
 0x19c   : > { %6897 = vmatpush3.bf16.msra.mxu0 %v7274_v0 }
 0x19d   : > { %6909 = vmatpush3.bf16.msra.mxu1 %v7275_v1  ;;  %6918 = vmatprep.subr.bf16.mxu0 %v7276_v57 }
 0x19e   : > { %6930 = vmatprep.subr.bf16.mxu1 %v7278_v2 }
 0x19f   : > { %6891 = vmatmul.mubr.msk.bf16.gmra.mrb[8].mxu1 %vm1160_vm1, %v1314_v55  ;;  %6899 = vmatmul.mubr.msk.bf16.vlgmr.msra.gmra.mrb[4].mxu0 %vm1160_vm1, %v1312_v56 }
 0x1a0   : > { %6902 = vmatprep.mubr.msk.bf16.mxu0 %vm1160_vm1, %v8178_v50  ;;  %6910 = vmatprep.mubr.msk.bf16.mxu1 %vm1160_vm1, %v1311_v61 }
 0x1a1   : > { %6919 = vmatpush3.bf16.msra.mxu0 %v7276_v57 }
 0x1a2   : > { %6920 = vmatprep.subr.bf16.mxu0 %v7277_v4 }
 0x1a5   : > { %6921 = vmatpush3.bf16.msra.mxu0 %v7277_v4 }
 0x1a7   : > { %6903 = vmatmul.mubr.msk.bf16.gmra.mrb[8].mxu0 %vm1160_vm1, %v1314_v55  ;;  %6911 = vmatmul.mubr.msk.bf16.vlgmr.msra.gmra.mrb[12].mxu1 %vm1160_vm1, %v1312_v56 }
 0x1a8   : > { %6914 = vmatprep.mubr.msk.bf16.mxu1 %vm1160_vm1, %v8178_v50  ;;  %6922 = vmatprep.mubr.msk.bf16.mxu0 %vm1160_vm1, %v1311_v61 }
 0x1a9   : > { %6931 = vmatpush3.bf16.msra.mxu1 %v7278_v2 }
 0x1aa   : > { %6932 = vmatprep.subr.bf16.mxu1 %v7279_v3 }
 0x1ad   : > { %6933 = vmatpush3.bf16.msra.mxu1 %v7279_v3 }
 0x1af   : > { %6915 = vmatmul.mubr.msk.bf16.gmra.mrb[16].mxu1 %vm1160_vm1, %v1314_v55  ;;  %6923 = vmatmul.mubr.msk.bf16.vlgmr.msra.gmra.mrb[12].mxu0 %vm1160_vm1, %v1312_v56 }
 0x1b0   : > { %6926 = vmatprep.mubr.msk.bf16.mxu0 %vm1160_vm1, %v8178_v50  ;;  %6934 = vmatprep.mubr.msk.bf16.mxu1 %vm1160_vm1, %v1311_v61 }
 0x1b7   : > { %6927 = vmatmul.mubr.msk.bf16.gmra.mrb[16].mxu0 %vm1160_vm1, %v1314_v55  ;;  %6935 = vmatmul.mubr.msk.bf16.vlgmr.msra.gmra.mrb[20].mxu1 %vm1160_vm1, %v1312_v56 }
 0x1b8   : > { %6938 = vmatprep.mubr.msk.bf16.mxu1 %vm1160_vm1, %v8178_v50 }
 0x1bf   : > { %6939 = vmatmul.mubr.msk.bf16.gmra.mrb[24].mxu1 %vm1160_vm1, %v1314_v55 }
 0x262   : > { %v8224_v5 = vpop.f32.mrb[0].mxu1 }
 0x263   : > { %v8226_v6 = vpop.f32.mrb[1].mxu1 }
 0x264   : > { %v8228_v7 = vpop.f32.mrb[2].mxu1 }
 0x265   : > { %v8230_v8 = vpop.f32.mrb[3].mxu1 }
 0x26a   : > { %v8232_v9 = vpop.f32.mrb[0].mxu0  ;;  %v8234_v10 = vpop.f32.mrb[4].mxu1 }
 0x26b   : > { %v8236_v11 = vpop.f32.mrb[1].mxu0  ;;  %v8238_v12 = vpop.f32.mrb[5].mxu1  ;;  %v1791_v4 = vmul.f32 %v8232_v9, %v8232_v9 }
 0x26c   : > { %v8240_v13 = vpop.f32.mrb[2].mxu0  ;;  %v8242_v14 = vpop.f32.mrb[6].mxu1  ;;  %v1789_v53 = vmul.f32 %v8236_v11, %v8236_v11  ;;  %v1797_v62 = vmul.f32 %v8238_v12, %v8238_v12 }
 0x26d   : > { %v8244_v15 = vpop.f32.mrb[3].mxu0  ;;  %v8246_v16 = vpop.f32.mrb[7].mxu1 }
 0x26e   : > { %v1790_v58 = vmul.f32 %v8244_v15, %v8244_v15  ;;  %v1806_v0 = vsel %vm1805_vm2, %v1789_v53, 0.0  ;;  %v1798_v57 = vmul.f32 %v8246_v16, %v8246_v16  ;;  %v1830_v3 = vsel %vm1805_vm2, %v1797_v62, 0.0 }
 0x26f   : > { %v1812_v53 = vsel %vm1805_vm2, %v1791_v4, 0.0 }
 0x270   : > { %v1809_v2 = vsel %vm1805_vm2, %v1790_v58, 0.0  ;;  %v8347_v58 = vld [vmem:[%s10350_s23 + $0x1] sm:$0x1] }
 0x272   : > { %v8248_v17 = vpop.f32.mrb[8].mxu1  ;;  %v8250_v19 = vpop.f32.mrb[4].mxu0 }
 0x273   : > { %v1924_v20 = vmul.f32 %v8250_v19, %v8250_v19  ;;  %v8254_v21 = vpop.f32.mrb[9].mxu1  ;;  %v8256_v22 = vpop.f32.mrb[5].mxu0 }
 0x274   : > { %v8258_v23 = vpop.f32.mrb[10].mxu1  ;;  %v8260_v24 = vpop.f32.mrb[6].mxu0  ;;  %v1922_v26 = vmul.f32 %v8256_v22, %v8256_v22 }
 0x275   : > { %v1925_v27 = vmul.f32 %v8260_v24, %v8260_v24  ;;  %v8266_v30 = vpop.f32.mrb[11].mxu1  ;;  %v8268_v31 = vpop.f32.mrb[7].mxu0  ;;  %v1944_v32 = vsel %vm1805_vm2, %v1924_v20, 0.0 }
 0x276   : > { %1945 = vadd.xlane.f32.xlu0 %v1944_v32  ;;  %v1923_v33 = vmul.f32 %v8268_v31, %v8268_v31  ;;  %v1938_v35 = vsel %vm1805_vm2, %v1922_v26, 0.0 }
 0x277   : > { %v1947_v34 = vsel %vm1805_vm2, %v1925_v27, 0.0  ;;  %v1792_v27 = vmul.f32 %v8240_v13, %v8240_v13 }
 0x278   : > { %1948 = vadd.xlane.f32.xlu1 %v1947_v34  ;;  %v1941_v43 = vsel %vm1805_vm2, %v1923_v33, 0.0  ;;  %v1833_v34 = vsel %vm1805_vm2, %v1798_v57, 0.0 }
 0x27a   : > { %v8275_v38 = vpop.f32.mrb[12].mxu1  ;;  %1939 = vadd.xlane.f32.xlu0 %v1938_v35  ;;  %v8277_v39 = vpop.f32.mrb[8].mxu0 }
 0x27b   : > { %v1932_v40 = vmul.f32 %v8275_v38, %v8275_v38  ;;  %v8281_v41 = vpop.f32.mrb[9].mxu0  ;;  %v8283_v42 = vpop.f32.mrb[13].mxu1 }
 0x27c   : > { %v8286_v44 = vpop.f32.mrb[14].mxu1  ;;  %1942 = vadd.xlane.f32.xlu1 %v1941_v43  ;;  %v8288_v45 = vpop.f32.mrb[10].mxu0  ;;  %v1930_v47 = vmul.f32 %v8283_v42, %v8283_v42  ;;  %v8333_v43 = vld [vmem:[%s10350_s23] sm:$0x1] }
 0x27d   : > { %v1933_v49 = vmul.f32 %v8286_v44, %v8286_v44  ;;  %v8294_v50 = vpop.f32.mrb[11].mxu0  ;;  %v8296_v51 = vpop.f32.mrb[15].mxu1  ;;  %v1968_v28 = vsel %vm1805_vm2, %v1932_v40, 0.0 }
 0x27e   : > { %1969 = vadd.xlane.f32.xlu0 %v1968_v28  ;;  %v1931_v52 = vmul.f32 %v8296_v51, %v8296_v51  ;;  %v1962_v54 = vsel %vm1805_vm2, %v1930_v47, 0.0  ;;  %v1799_v47 = vmul.f32 %v8234_v10, %v8234_v10 }
 0x27f   : > { %v1971_v36 = vsel %vm1805_vm2, %v1933_v49, 0.0 }
 0x280   : > { %1972 = vadd.xlane.f32.xlu1 %v1971_v36  ;;  %v1965_v60 = vsel %vm1805_vm2, %v1931_v52, 0.0  ;;  %v1836_v62 = vsel %vm1805_vm2, %v1799_v47, 0.0 }
 0x282   : > { %v8305_v55 = vpop.f32.mrb[16].mxu1  ;;  %1963 = vadd.xlane.f32.xlu0 %v1962_v54  ;;  %v6924_v29 = vpop.f32.mrb[12].mxu0 }
 0x283   : > { %v8309_v59 = vpop.f32.mrb[17].mxu1  ;;  %v1681_v37 = vpop.f32.mrb[13].mxu0 }
 0x284   : > { %v8312_v46 = vpop.f32.mrb[18].mxu1  ;;  %1966 = vadd.xlane.f32.xlu1 %v1965_v60  ;;  %v6925_v61 = vpop.f32.mrb[14].mxu0  ;;  %v1815_v60 = vsel %vm1805_vm2, %v1792_v27, 0.0 }
 0x285   : > { %v8316_v48 = vpack.c.bf16 %v6925_v61, %v6924_v29  ;;  %v8318_v63 = vpop.f32.mrb[19].mxu1  ;;  %v1684_v56 = vpop.f32.mrb[15].mxu0  ;;  %v2054_v61 = vmul.f32 %v8333_v43, %v8333_v43 }
 0x286   : > { %v8321_v1 = vpack.c.bf16 %v1684_v56, %v1681_v37  ;;  %1807 = vadd.xlane.f32.xlu0 %v1806_v0  ;;  %v1800_v37 = vmul.f32 %v8242_v14, %v8242_v14  ;;  %v2055_v56 = vmul.f32 %v8347_v58, %v8347_v58 }
 0x287   : > { %v2057_v4 = vsel %vm2056_vm3, %v2054_v61, 0.0  ;;  %v8365_v61 = vsub.s32 1, %v8167_v18 }
 0x288   : > { %1810 = vadd.xlane.f32.xlu1 %v1809_v2  ;;  %v1839_v2 = vsel %vm1805_vm2, %v1800_v37, 0.0  ;;  %v2060_v27 = vsel %vm2056_vm3, %v2055_v56, 0.0  ;;  %v8372_v56 = vld [vmem:[%s10351_s6] sm:$0x3] }
 0x28a   : > { %v6936_v20 = vpop.f32.mrb[20].mxu1  ;;  %1831 = vadd.xlane.f32.xlu0 %v1830_v3  ;;  %v6928_v26 = vpop.f32.mrb[16].mxu0 }
 0x28b   : > { %v1697_v32 = vpop.f32.mrb[17].mxu0  ;;  %v1758_v33 = vpop.f32.mrb[21].mxu1 }
 0x28c   : > { %v6937_v35 = vpop.f32.mrb[22].mxu1  ;;  %1834 = vadd.xlane.f32.xlu1 %v1833_v34  ;;  %v6929_v40 = vpop.f32.mrb[18].mxu0 }
 0x28d   : > { %v8337_v49 = vpack.c.bf16 %v6937_v35, %v6936_v20  ;;  %v8339_v28 = vpack.c.bf16 %v6929_v40, %v6928_v26  ;;  %v1700_v52 = vpop.f32.mrb[19].mxu0  ;;  %v1761_v36 = vpop.f32.mrb[23].mxu1 }
 0x28e   : > { %v8342_v54 = vpack.c.bf16 %v1700_v52, %v1697_v32  ;;  %v8344_v29 = vpack.c.bf16 %v1761_v36, %v1758_v33  ;;  %1813 = vadd.xlane.f32.xlu0 %v1812_v53 }
 0x290   : > { %1816 = vadd.xlane.f32.xlu1 %v1815_v60 }
 0x292   : > { %v6940_v0 = vpop.f32.mrb[24].mxu1  ;;  %1837 = vadd.xlane.f32.xlu0 %v1836_v62 }
 0x293   : > { %v1774_v57 = vpop.f32.mrb[25].mxu1 }
 0x294   : > { %v6941_v3 = vpop.f32.mrb[26].mxu1  ;;  %1840 = vadd.xlane.f32.xlu1 %v1839_v2 }
 0x295   : > { %v8359_v20 = vpack.c.bf16 %v6941_v3, %v6940_v0  ;;  %v1777_v26 = vpop.f32.mrb[27].mxu1  ;;  %v8376_v3 = vrot.slane %v8372_v56, %v8365_v61 }
 0x296   : > { %v8362_v32 = vpack.c.bf16 %v1777_v26, %v1774_v57  ;;  %2058 = vadd.xlane.f32.xlu0 %v2057_v4 }
 0x298   : > { %2061 = vadd.xlane.f32.xlu1 %v2060_v27 }
 0x303   : > { %v1946_v33 = vpop.xlane.xlu0 %1945 }
 0x304   : > { %v1988_v34 = vmax.f32 %v1946_v33, 1e-24 }
 0x305   : > { %v1949_v35 = vpop.xlane.xlu1 %1948 }
 0x306   : > { %7320 = vrsqrt.f32 %v1988_v34  ;;  %v1989_v40 = vmax.f32 %v1949_v35, 1e-24 }
 0x307   : > { %v1940_v47 = vpop.xlane.xlu0 %1939 }
 0x308   : > { %7322 = vrsqrt.f32 %v1989_v40  ;;  %v1986_v52 = vmax.f32 %v1940_v47, 1e-24 }
 0x309   : > { %v1943_v36 = vpop.xlane.xlu1 %1942 }
 0x30a   : > { %7324 = vrsqrt.f32 %v1986_v52  ;;  %v1987_v53 = vmax.f32 %v1943_v36, 1e-24 }
 0x30b   : > { %v1970_v37 = vpop.xlane.xlu0 %1969 }
 0x30c   : > { %7326 = vrsqrt.f32 %v1987_v53  ;;  %v1996_v60 = vmax.f32 %v1970_v37, 1e-24 }
 0x30d   : > { %v1973_v62 = vpop.xlane.xlu1 %1972 }
 0x30e   : > { %7328 = vrsqrt.f32 %v1996_v60  ;;  %v1997_v0 = vmax.f32 %v1973_v62, 1e-24 }
 0x30f   : > { %v1964_v57 = vpop.xlane.xlu0 %1963 }
 0x310   : > { %v7321_v2 = vpop.eup %7320  ;;  %7330 = vrsqrt.f32 %v1997_v0  ;;  %v1994_v4 = vmax.f32 %v1964_v57, 1e-24 }
 0x311   : > { %v1967_v26 = vpop.xlane.xlu1 %1966  ;;  %v2020_v27 = vmul.f32 %v7321_v2, %v8250_v19 }
 0x312   : > { %v7323_v33 = vpop.eup %7322  ;;  %7332 = vrsqrt.f32 %v1994_v4  ;;  %v1995_v34 = vmax.f32 %v1967_v26, 1e-24 }
 0x313   : > { %v1808_v35 = vpop.xlane.xlu0 %1807  ;;  %v2021_v40 = vmul.f32 %v7323_v33, %v8260_v24  ;;  %v2040_v37 = vmul.f32 %v8376_v3, %v2020_v27 }
 0x314   : > { %v7325_v47 = vpop.eup %7324  ;;  %7334 = vrsqrt.f32 %v1995_v34  ;;  %v1854_v52 = vmax.f32 %v1808_v35, 1e-24 }
 0x315   : > { %v1811_v36 = vpop.xlane.xlu1 %1810  ;;  %v2018_v53 = vmul.f32 %v7325_v47, %v8256_v22  ;;  %v2041_v60 = vmul.f32 %v8376_v3, %v2021_v40 }
 0x316   : > { %v7327_v62 = vpop.eup %7326  ;;  %7336 = vrsqrt.f32 %v1854_v52  ;;  %v1855_v0 = vmax.f32 %v1811_v36, 1e-24  ;;  %v7822_v52 = vmov 1966171168  }
 0x317   : > { %v1832_v19 = vpop.xlane.xlu0 %1831  ;;  %v2019_v57 = vmul.f32 %v7327_v62, %v8268_v31  ;;  %v2093_v2 = vpack.c.bf16 %v2041_v60, %v2040_v37  ;;  %v2038_v33 = vmul.f32 %v8376_v3, %v2018_v53  ;;  %v2071_v36 = vunpack.c.l.s4 %v7822_v52 }
 0x318   : > { %v7329_v4 = vpop.eup %7328  ;;  %7338 = vrsqrt.f32 %v1855_v0  ;;  %v1862_v24 = vmax.f32 %v1832_v19, 1e-24 }
 0x319   : > { %v1835_v26 = vpop.xlane.xlu1 %1834  ;;  %v2039_v34 = vmul.f32 %v8376_v3, %v2019_v57  ;;  %v2028_v22 = vmul.f32 %v7329_v4, %v8275_v38 }
 0x31a   : > { %v7331_v27 = vpop.eup %7330  ;;  %7340 = vrsqrt.f32 %v1862_v24  ;;  %v1863_v35 = vmax.f32 %v1835_v26, 1e-24 }
 0x31b   : > { %v1814_v40 = vpop.xlane.xlu0 %1813  ;;  %v2092_v47 = vpack.c.bf16 %v2039_v34, %v2038_v33  ;;  %v2029_v31 = vmul.f32 %v7331_v27, %v8286_v44  ;;  %v2048_v38 = vmul.f32 %v8376_v3, %v2028_v22  ;;  %v2072_v44 = vunpack.c.0.s8 %v2071_v36 }
 0x31c   : > { %v7333_v37 = vpop.eup %7332  ;;  %7342 = vrsqrt.f32 %v1863_v35  ;;  %v1856_v60 = vmax.f32 %v1814_v40, 1e-24 }
 0x31d   : > { %7206 = vmatprep.subr.msk.bf16.mxu0 %vm1805_vm2, %v2092_v47  ;;  %v1817_v62 = vpop.xlane.xlu1 %1816  ;;  %v2103_v53 = vsel %vm1805_vm2, %v2092_v47, 0  ;;  %v2026_v0 = vmul.f32 %v7333_v37, %v8283_v42  ;;  %v2049_v19 = vmul.f32 %v8376_v3, %v2029_v31  ;;  %v8397_v42 = vrot.slane %v8372_v56, %v8170_v25 }
 0x31e   : > { %v7335_v57 = vpop.eup %7334  ;;  %7344 = vrsqrt.f32 %v1856_v60  ;;  %v1857_v4 = vmax.f32 %v1817_v62, 1e-24  ;;  %6943 = vmatpush3.bf16.xpose.msra.mxu0 %v2103_v53 }
 0x31f   : > { %v1838_v24 = vpop.xlane.xlu0 %1837  ;;  %7207 = vmatprep.subr.msk.bf16.mxu0 %vm1805_vm2, %v2093_v2  ;;  %v2027_v26 = vmul.f32 %v7335_v57, %v8296_v51  ;;  %v2095_v33 = vpack.c.bf16 %v2049_v19, %v2048_v38  ;;  %v2046_v35 = vmul.f32 %v8376_v3, %v2026_v0  ;;  %v8403_v51 = vsub.s32 %v2072_v44, %v8167_v18 }
 0x320   : > { %v7337_v34 = vpop.eup %7336  ;;  %7346 = vrsqrt.f32 %v1857_v4  ;;  %v1864_v27 = vmax.f32 %v1838_v24, 1e-24  ;;  %v2106_v38 = vsel %vm1805_vm2, %v2093_v2, 0 }
 0x321   : > { %v1841_v22 = vpop.xlane.xlu1 %1840  ;;  %v2047_v40 = vmul.f32 %v8376_v3, %v2027_v26  ;;  %v1886_v47 = vmul.f32 %v7337_v34, %v8236_v11 }
 0x322   : > { %v7339_v52 = vpop.eup %7338  ;;  %7348 = vrsqrt.f32 %v1864_v27  ;;  %v1865_v36 = vmax.f32 %v1841_v22, 1e-24 }
 0x323   : > { %v2059_v31 = vpop.xlane.xlu0 %2058  ;;  %v2094_v37 = vpack.c.bf16 %v2047_v40, %v2046_v35  ;;  %v1887_v60 = vmul.f32 %v7339_v52, %v8244_v15  ;;  %v1906_v19 = vmul.f32 %v8397_v42, %v1886_v47  ;;  %v2076_v15 = vrot.slane %v8372_v56, %v8403_v51 }
 0x324   : > { %v7341_v62 = vpop.eup %7340  ;;  %7350 = vrsqrt.f32 %v1865_v36  ;;  %v2063_v53 = vmax.f32 %v2059_v31, 1e-24 }
 0x325   : > { %7208 = vmatprep.subr.msk.bf16.mxu1 %vm1805_vm2, %v2094_v37  ;;  %v2062_v0 = vpop.xlane.xlu1 %2061  ;;  %v2164_v11 = vsel %vm1805_vm2, %v2094_v37, 0  ;;  %v1907_v57 = vmul.f32 %v8397_v42, %v1887_v60  ;;  %v1894_v4 = vmul.f32 %v7341_v62, %v8238_v12  ;;  %v2077_v40 = vcombine.high %v2076_v15, %v2076_v15 }
 0x326   : > { %v7343_v24 = vpop.eup %7342  ;;  %7352 = vrsqrt.f32 %v2063_v53  ;;  %v2064_v44 = vmax.f32 %v2062_v0, 1e-24  ;;  %6945 = vmatpush3.bf16.xpose.msra.mxu0 %v2106_v38  ;;  %6951 = vmatpush3.bf16.xpose.msra.mxu1 %v2164_v11 }
 0x327   : > { %7209 = vmatprep.subr.msk.bf16.mxu1 %vm1805_vm2, %v2095_v33  ;;  %6958 = vmatprep.subr.bf16.mxu0 %v8321_v1  ;;  %v2088_v2 = vpack.c.bf16 %v1907_v57, %v1906_v19  ;;  %v1895_v26 = vmul.f32 %v7343_v24, %v8246_v16  ;;  %v1914_v12 = vmul.f32 %v8397_v42, %v1894_v4 }
 0x328   : > { %v7345_v34 = vpop.eup %7344  ;;  %7354 = vrsqrt.f32 %v2064_v44 }
 0x329   : > { %v1888_v27 = vmul.f32 %v7345_v34, %v8232_v9  ;;  %6946 = vmatprep.mubr.msk.bf16.mxu0 %vm1805_vm2, %v2088_v2  ;;  %v1915_v22 = vmul.f32 %v8397_v42, %v1895_v26  ;;  %v2167_v9 = vsel %vm1805_vm2, %v2095_v33, 0 }
 0x32a   : > { %v7347_v35 = vpop.eup %7346 }
 0x32b   : > { %v1889_v56 = vmul.f32 %v7347_v35, %v8240_v13  ;;  %v2090_v47 = vpack.c.bf16 %v1915_v22, %v1914_v12  ;;  %v1908_v36 = vmul.f32 %v8397_v42, %v1888_v27  ;;  %v2084_v13 = vrot.slane %v2077_v40, %v8403_v51 }
 0x32c   : > { %v7349_v52 = vpop.eup %7348 }
 0x32d   : > { %v1909_v16 = vmul.f32 %v8397_v42, %v1889_v56  ;;  %v1896_v31 = vmul.f32 %v7349_v52, %v8234_v10  ;;  %6954 = vmatprep.mubr.msk.bf16.mxu1 %vm1805_vm2, %v2090_v47 }
 0x32e   : > { %v7351_v37 = vpop.eup %7350  ;;  %6953 = vmatpush3.bf16.xpose.msra.mxu1 %v2167_v9 }
 0x32f   : > { %v2089_v60 = vpack.c.bf16 %v1909_v16, %v1908_v36  ;;  %v1897_v62 = vmul.f32 %v7351_v37, %v8242_v14  ;;  %6966 = vmatprep.subr.bf16.mxu1 %v8344_v29  ;;  %v1916_v38 = vmul.f32 %v8397_v42, %v1896_v31 }
 0x330   : > { %v7353_v53 = vpop.eup %7352 }
 0x331   : > { %v1917_v0 = vmul.f32 %v8397_v42, %v1897_v62  ;;  %v2067_v10 = vmul.f32 %v7353_v53, %v8333_v43  ;;  %6947 = vmatmul.mubr.msk.bf16.vlgmr.msra.gmra.mrb[20].mxu0 %vm1805_vm2, %v2089_v60 }
 0x332   : > { %v7355_v11 = vpop.eup %7354  ;;  %6959 = vmatpush3.bf16.msra.mxu0 %v8321_v1 }
 0x333   : > { %v2091_v33 = vpack.c.bf16 %v1917_v0, %v1916_v38  ;;  %v2086_v4 = vmul.f32 %v2084_v13, %v2067_v10  ;;  %v2068_v14 = vmul.f32 %v7355_v11, %v8347_v58  ;;  %6960 = vmatprep.subr.bf16.mxu0 %v8316_v48 }
 0x335   : > { %v8438_v24 = vrot.slane %v2086_v4, %v8170_v25  ;;  %v2087_v44 = vmul.f32 %v2084_v13, %v2068_v14  ;;  %6955 = vmatmul.mubr.msk.bf16.vlgmr.msra.gmra.mrb[28].mxu1 %vm1805_vm2, %v2091_v33 }
 0x336   : > { %6961 = vmatpush3.bf16.msra.mxu0 %v8316_v48  ;;  %6967 = vmatpush3.bf16.msra.mxu1 %v8344_v29 }
 0x337   : > { %6968 = vmatprep.subr.bf16.mxu1 %v8337_v49  ;;  %v2240_v1 = vmul.f32 %v8438_v24, %v1908_v36  ;;  %v2241_v43 = vmul.f32 %v8438_v24, %v1909_v16  ;;  %v8447_v58 = vrot.slane %v2087_v44, %v8170_v25  ;;  %v2238_v26 = vmul.f32 %v8438_v24, %v1906_v19 }
 0x338   : > { %v2239_v34 = vmul.f32 %v8438_v24, %v1907_v57 }
 0x339   : > { %v2252_v15 = vsel %vm1805_vm2, %v2240_v1, 0.0  ;;  %v2255_v2 = vsel %vm1805_vm2, %v2241_v43, 0.0  ;;  %v2246_v48 = vsel %vm1805_vm2, %v2238_v26, 0.0  ;;  %v2245_v27 = vmul.f32 %v8447_v58, %v1917_v0 }
 0x33a   : > { %2253 = vadd.xlane.f32.xlu0 %v2252_v15  ;;  %2256 = vadd.xlane.f32.xlu1 %v2255_v2  ;;  %v2249_v29 = vsel %vm1805_vm2, %v2239_v34, 0.0  ;;  %v2244_v35 = vmul.f32 %v8447_v58, %v1916_v38  ;;  %v2243_v57 = vmul.f32 %v8447_v58, %v1915_v22  ;;  %v2242_v40 = vmul.f32 %v8447_v58, %v1914_v12 }
 0x33b   : > { %6969 = vmatpush3.bf16.msra.mxu1 %v8337_v49  ;;  %v2267_v56 = vsel %vm1805_vm2, %v2245_v27, 0.0  ;;  %v1926_v15 = vmul.f32 %v8281_v41, %v8281_v41  ;;  %v1927_v26 = vmul.f32 %v8294_v50, %v8294_v50  ;;  %v1935_v27 = vmul.f32 %v8318_v63, %v8318_v63 }
 0x33c   : > { %v2264_v19 = vsel %vm1805_vm2, %v2244_v35, 0.0  ;;  %v2261_v49 = vsel %vm1805_vm2, %v2243_v57, 0.0  ;;  %v2258_v47 = vsel %vm1805_vm2, %v2242_v40, 0.0  ;;  %v1929_v57 = vmul.f32 %v8288_v45, %v8288_v45 }
 0x33d   : > { %v1953_v35 = vsel %vm1805_vm2, %v1927_v26, 0.0  ;;  %v1977_v40 = vsel %vm1805_vm2, %v1935_v27, 0.0 }
 0x33e   : > { %2247 = vadd.xlane.f32.xlu0 %v2246_v48  ;;  %2250 = vadd.xlane.f32.xlu1 %v2249_v29  ;;  %v1934_v48 = vmul.f32 %v8309_v59, %v8309_v59  ;;  %v1950_v29 = vsel %vm1805_vm2, %v1926_v15, 0.0 }
 0x342   : > { %2268 = vadd.xlane.f32.xlu1 %v2267_v56  ;;  %2265 = vadd.xlane.f32.xlu0 %v2264_v19  ;;  %v1928_v56 = vmul.f32 %v8277_v39, %v8277_v39  ;;  %v1974_v19 = vsel %vm1805_vm2, %v1934_v48, 0.0 }
 0x346   : > { %2262 = vadd.xlane.f32.xlu1 %v2261_v49  ;;  %2259 = vadd.xlane.f32.xlu0 %v2258_v47  ;;  %v1936_v49 = vmul.f32 %v8305_v55, %v8305_v55  ;;  %v1956_v47 = vsel %vm1805_vm2, %v1928_v56, 0.0 }
 0x404   : > { %v6948_v52 = vpop.f32.mrb[20].mxu0 }
 0x405   : > { %v8464_v36 = vmul.f32 8.0, %v6948_v52  ;;  %v2142_v16 = vpop.f32.mrb[21].mxu0  ;;  %v1937_v52 = vmul.f32 %v8312_v46, %v8312_v46 }
 0x406   : > { %v6949_v31 = vpop.f32.mrb[22].mxu0  ;;  %v8466_v9 = vmul.f32 8.0, %v2142_v16  ;;  %v1959_v16 = vsel %vm1805_vm2, %v1929_v57, 0.0 }
 0x407   : > { %v8468_v37 = vmul.f32 8.0, %v6949_v31  ;;  %v2145_v22 = vpop.f32.mrb[23].mxu0  ;;  %v2284_v12 = vsel %vm1160_vm1, %v8464_v36, -inf  ;;  %v1980_v31 = vsel %vm1805_vm2, %v1936_v49, 0.0 }
 0x408   : > { %v6956_v60 = vpop.f32.mrb[28].mxu1  ;;  %2285 = vmax.xlane.f32.xlu0 %v2284_v12  ;;  %v8472_v62 = vmul.f32 8.0, %v2145_v22  ;;  %v2278_v11 = vsel %vm1160_vm1, %v8466_v9, -inf  ;;  %v1983_v22 = vsel %vm1805_vm2, %v1937_v52, 0.0  ;;  %v8521_v12 = vld [vmem:[%s10352_s14] sm:$0xff]  }
 0x409   : > { %v2203_v13 = vpop.f32.mrb[29].mxu1  ;;  %v2287_v53 = vsel %vm1160_vm1, %v8468_v37, -inf  ;;  %v8484_v14 = vmul.f32 8.0, %v6956_v60  ;;  %6974 = vmatprep.subr.bf16.mxu0 %v8521_v12  ;;  %v8525_v60 = vld [vmem:[%s10352_s14 + $0x8] sm:$0xff]  }
 0x40a   : > { %v6957_v38 = vpop.f32.mrb[30].mxu1  ;;  %2288 = vmax.xlane.f32.xlu1 %v2287_v53  ;;  %v8476_v0 = vmul.f32 8.0, %v2203_v13  ;;  %v2281_v4 = vsel %vm1160_vm1, %v8472_v62, -inf  ;;  %6980 = vmatprep.subr.bf16.mxu1 %v8525_v60  ;;  %v2254_v13 = vpop.xlane.xlu0 %2253 }
 0x40b   : > { %v2206_v10 = vpop.f32.mrb[31].mxu1  ;;  %v8488_v1 = vmul.f32 8.0, %v6957_v38  ;;  %v2296_v2 = vsel %vm1160_vm1, %v8484_v14, -inf  ;;  %v2257_v53 = vpop.xlane.xlu1 %2256  ;;  %v8528_v15 = vmul.f32 8.0, %v2254_v13 }
 0x40c   : > { %2279 = vmax.xlane.f32.xlu0 %v2278_v11  ;;  %v8480_v33 = vmul.f32 8.0, %v2206_v10  ;;  %v2290_v44 = vsel %vm1160_vm1, %v8476_v0, -inf  ;;  %v8530_v26 = vmul.f32 8.0, %v2257_v53 }
 0x40d   : > { %v2299_v34 = vsel %vm1160_vm1, %v8488_v1, -inf }
 0x40e   : > { %2282 = vmax.xlane.f32.xlu1 %v2281_v4  ;;  %v2293_v43 = vsel %vm1160_vm1, %v8480_v33, -inf  ;;  %v2248_v38 = vpop.xlane.xlu0 %2247 }
 0x40f   : > { %v2251_v10 = vpop.xlane.xlu1 %2250  ;;  %v8542_v56 = vmul.f32 8.0, %v2248_v38 }
 0x410   : > { %2291 = vmax.xlane.f32.xlu0 %v2290_v44  ;;  %v8544_v57 = vmul.f32 8.0, %v2251_v10 }
 0x412   : > { %2294 = vmax.xlane.f32.xlu1 %v2293_v43  ;;  %v2266_v11 = vpop.xlane.xlu0 %2265 }
 0x413   : > { %v2269_v4 = vpop.xlane.xlu1 %2268 }
 0x414   : > { %2297 = vmax.xlane.f32.xlu0 %v2296_v2 }
 0x416   : > { %2300 = vmax.xlane.f32.xlu1 %v2299_v34  ;;  %v2260_v44 = vpop.xlane.xlu0 %2259 }
 0x417   : > { %v2263_v43 = vpop.xlane.xlu1 %2262 }
 0x418   : > { %1951 = vadd.xlane.f32.xlu0 %v1950_v29 }
 0x41a   : > { %1954 = vadd.xlane.f32.xlu1 %v1953_v35 }
 0x41c   : > { %1975 = vadd.xlane.f32.xlu0 %v1974_v19 }
 0x41e   : > { %1978 = vadd.xlane.f32.xlu1 %v1977_v40 }
 0x420   : > { %1957 = vadd.xlane.f32.xlu0 %v1956_v47 }
 0x422   : > { %1960 = vadd.xlane.f32.xlu1 %v1959_v16  ;;  %v8553_v16 = vmul.f32 8.0, %v2260_v44 }
 0x424   : > { %1981 = vadd.xlane.f32.xlu0 %v1980_v31 }
 0x426   : > { %1984 = vadd.xlane.f32.xlu1 %v1983_v22 }
 0x495   : > { %v2286_v2 = vpop.xlane.xlu0 %2285 }
 0x496   : > { %v8533_v34 = vmax.f32 %v2286_v2, %v8528_v15  ;;  %v8569_v2 = vmul.f32 8.0, %v2263_v43 }
 0x497   : > { %v2289_v48 = vpop.xlane.xlu1 %2288 }
 0x498   : > { %v2312_v29 = vsub.f32 %v8464_v36, %v8533_v34  ;;  %v8540_v35 = vmax.f32 %v2289_v48, %v8530_v26 }
 0x499   : > { %v2280_v19 = vpop.xlane.xlu0 %2279 }
 0x49a   : > { %v2322_v40 = vmul.f32 1.442695, %v2312_v29  ;;  %v2313_v49 = vsub.f32 %v8468_v37, %v8540_v35  ;;  %v8551_v36 = vmax.f32 %v2280_v19, %v8542_v56  ;;  %v8571_v19 = vmul.f32 8.0, %v2266_v11 }
 0x49b   : > { %v2283_v52 = vpop.xlane.xlu1 %2282 }
 0x49c   : > { %7356 = vpow2.f32 %v2322_v40  ;;  %v2324_v31 = vmul.f32 1.442695, %v2313_v49  ;;  %v8556_v22 = vmax.f32 %v2283_v52, %v8544_v57  ;;  %v2310_v13 = vsub.f32 %v8466_v9, %v8551_v36 }
 0x49d   : > { %v2292_v53 = vpop.xlane.xlu0 %2291 }
 0x49e   : > { %7358 = vpow2.f32 %v2324_v31  ;;  %v2311_v38 = vsub.f32 %v8472_v62, %v8556_v22  ;;  %v8567_v44 = vmax.f32 %v2292_v53, %v8553_v16  ;;  %v2318_v48 = vmul.f32 1.442695, %v2310_v13 }
 0x49f   : > { %v2295_v29 = vpop.xlane.xlu1 %2294  ;;  %v8580_v31 = vmul.f32 8.0, %v2269_v4 }
 0x4a0   : > { %v2320_v9 = vmul.f32 1.442695, %v2311_v38  ;;  %v2314_v40 = vsub.f32 %v8476_v0, %v8567_v44  ;;  %7360 = vpow2.f32 %v2318_v48  ;;  %v8578_v62 = vmax.f32 %v2295_v29, %v8569_v2 }
 0x4a1   : > { %v2298_v52 = vpop.xlane.xlu0 %2297 }
 0x4a2   : > { %v2326_v43 = vmul.f32 1.442695, %v2314_v40  ;;  %v8583_v13 = vmax.f32 %v2298_v52, %v8571_v19  ;;  %7362 = vpow2.f32 %v2320_v9  ;;  %v2315_v11 = vsub.f32 %v8480_v33, %v8578_v62 }
 0x4a3   : > { %v2301_v53 = vpop.xlane.xlu1 %2300 }
 0x4a4   : > { %v2316_v38 = vsub.f32 %v8484_v14, %v8583_v13  ;;  %v8594_v4 = vmax.f32 %v2301_v53, %v8580_v31  ;;  %v2328_v29 = vmul.f32 1.442695, %v2315_v11  ;;  %7364 = vpow2.f32 %v2326_v43 }
 0x4a5   : > { %v1952_v40 = vpop.xlane.xlu0 %1951 }
 0x4a6   : > { %v7357_v52 = vpop.eup %7356  ;;  %v2330_v9 = vmul.f32 1.442695, %v2316_v38  ;;  %v2317_v33 = vsub.f32 %v8488_v1, %v8594_v4  ;;  %7366 = vpow2.f32 %v2328_v29  ;;  %v1990_v53 = vmax.f32 %v1952_v40, 1e-24 }
 0x4a7   : > { %v1955_v49 = vpop.xlane.xlu1 %1954  ;;  %v2364_v14 = vsel %vm1160_vm1, %v7357_v52, 0.0 }
 0x4a8   : > { %v7359_v10 = vpop.eup %7358  ;;  %v2332_v48 = vmul.f32 1.442695, %v2317_v33  ;;  %2365 = vadd.xlane.f32.xlu0 %v2364_v14  ;;  %7368 = vpow2.f32 %v2330_v9  ;;  %v1991_v43 = vmax.f32 %v1955_v49, 1e-24 }
 0x4a9   : > { %v1976_v11 = vpop.xlane.xlu0 %1975  ;;  %v2367_v47 = vsel %vm1160_vm1, %v7359_v10, 0.0 }
 0x4aa   : > { %2368 = vadd.xlane.f32.xlu1 %v2367_v47  ;;  %v7361_v38 = vpop.eup %7360  ;;  %7370 = vpow2.f32 %v2332_v48  ;;  %v1998_v1 = vmax.f32 %v1976_v11, 1e-24  ;;  %v2399_v47 = vpack.c.bf16 %v7359_v10, %v7357_v52 }
 0x4ab   : > { %v1979_v29 = vpop.xlane.xlu1 %1978  ;;  %v2358_v0 = vsel %vm1160_vm1, %v7361_v38, 0.0  ;;  %7372 = vrsqrt.f32 %v1990_v53 }
 0x4ac   : > { %v1999_v37 = vmax.f32 %v1979_v29, 1e-24  ;;  %v7363_v27 = vpop.eup %7362  ;;  %2359 = vadd.xlane.f32.xlu0 %v2358_v0  ;;  %7374 = vrsqrt.f32 %v1991_v43 }
 0x4ad   : > { %v1958_v18 = vpop.xlane.xlu0 %1957  ;;  %v2361_v40 = vsel %vm1160_vm1, %v7363_v27, 0.0  ;;  %v2398_v9 = vpack.c.bf16 %v7363_v27, %v7361_v38  ;;  %7376 = vrsqrt.f32 %v1998_v1 }
 0x4ae   : > { %v1992_v33 = vmax.f32 %v1958_v18, 1e-24  ;;  %2362 = vadd.xlane.f32.xlu1 %v2361_v40  ;;  %v7365_v14 = vpop.eup %7364  ;;  %7378 = vrsqrt.f32 %v1999_v37  ;;  %v1793_v40 = vmul.f32 %v8226_v6, %v8226_v6 }
 0x4af   : > { %v1961_v49 = vpop.xlane.xlu1 %1960  ;;  %6962 = vmatprep.mubr.msk.bf16.mxu0 %vm1160_vm1, %v2398_v9  ;;  %v2370_v9 = vsel %vm1160_vm1, %v7365_v14, 0.0 }
 0x4b0   : > { %v1993_v48 = vmax.f32 %v1961_v49, 1e-24  ;;  %v7367_v11 = vpop.eup %7366  ;;  %7380 = vrsqrt.f32 %v1992_v33  ;;  %6963 = vmatmul.mubr.msk.bf16.vlgmr.msra.gmra.mrb[24].mxu0 %vm1160_vm1, %v2399_v47 }
 0x4b1   : > { %v1982_v0 = vpop.xlane.xlu0 %1981  ;;  %v2400_v18 = vpack.c.bf16 %v7367_v11, %v7365_v14  ;;  %6975 = vmatpush3.bf16.msra.mxu0 %v8521_v12 }
 0x4b2   : > { %7382 = vrsqrt.f32 %v1993_v48  ;;  %v2000_v53 = vmax.f32 %v1982_v0, 1e-24  ;;  %v7369_v27 = vpop.eup %7368 }
 0x4b3   : > { %v1985_v43 = vpop.xlane.xlu1 %1984  ;;  %6970 = vmatprep.mubr.msk.bf16.mxu1 %vm1160_vm1, %v2400_v18  ;;  %v2376_v37 = vsel %vm1160_vm1, %v7369_v27, 0.0  ;;  %v2373_v18 = vsel %vm1160_vm1, %v7367_v11, 0.0 }
 0x4b4   : > { %7384 = vrsqrt.f32 %v2000_v53  ;;  %v2001_v10 = vmax.f32 %v1985_v43, 1e-24  ;;  %v7371_v52 = vpop.eup %7370  ;;  %2377 = vadd.xlane.f32.xlu0 %v2376_v37  ;;  %v1794_v53 = vmul.f32 %v8230_v8, %v8230_v8 }
 0x4b5   : > { %v2379_v38 = vsel %vm1160_vm1, %v7371_v52, 0.0  ;;  %v2401_v1 = vpack.c.bf16 %v7371_v52, %v7369_v27  ;;  %v7373_v29 = vpop.eup %7372  ;;  %v1818_v52 = vsel %vm1805_vm2, %v1793_v40, 0.0 }
 0x4b6   : > { %7386 = vrsqrt.f32 %v2001_v10  ;;  %2380 = vadd.xlane.f32.xlu1 %v2379_v38  ;;  %v7375_v33 = vpop.eup %7374  ;;  %v2022_v49 = vmul.f32 %v7373_v29, %v8281_v41 }
 0x4b7   : > { %6971 = vmatmul.mubr.msk.bf16.vlgmr.msra.gmra.mrb[32].mxu1 %vm1160_vm1, %v2401_v1  ;;  %v7377_v47 = vpop.eup %7376  ;;  %v2023_v48 = vmul.f32 %v7375_v33, %v8294_v50  ;;  %v1801_v50 = vmul.f32 %v8254_v21, %v8254_v21 }
 0x4b8   : > { %2371 = vadd.xlane.f32.xlu0 %v2370_v9  ;;  %6981 = vmatpush3.bf16.msra.mxu1 %v8525_v60  ;;  %v7379_v0 = vpop.eup %7378  ;;  %v2030_v27 = vmul.f32 %v7377_v47, %v8309_v59  ;;  %v2042_v14 = vmul.f32 %v8376_v3, %v2022_v49  ;;  %v1821_v9 = vsel %vm1805_vm2, %v1794_v53, 0.0 }
 0x4b9   : > { %v2043_v41 = vmul.f32 %v8376_v3, %v2023_v48  ;;  %v2031_v10 = vmul.f32 %v7379_v0, %v8318_v63  ;;  %v1802_v63 = vmul.f32 %v8266_v30, %v8266_v30  ;;  %v1842_v0 = vsel %vm1805_vm2, %v1801_v50, 0.0 }
 0x4ba   : > { %v7381_v43 = vpop.eup %7380  ;;  %2374 = vadd.xlane.f32.xlu1 %v2373_v18  ;;  %v2050_v59 = vmul.f32 %v8376_v3, %v2030_v27  ;;  %v1796_v27 = vmul.f32 %v8228_v7, %v8228_v7 }
 0x4bb   : > { %v2024_v38 = vmul.f32 %v7381_v43, %v8277_v39  ;;  %v8628_v1 = vpack.c.bf16 %v2043_v41, %v2042_v14  ;;  %v2051_v11 = vmul.f32 %v8376_v3, %v2031_v10  ;;  %v1845_v43 = vsel %vm1805_vm2, %v1802_v63, 0.0 }
 0x4bc   : > { %v7383_v37 = vpop.eup %7382  ;;  %1819 = vadd.xlane.f32.xlu0 %v1818_v52  ;;  %v1803_v41 = vmul.f32 %v8248_v17, %v8248_v17  ;;  %v1827_v50 = vsel %vm1805_vm2, %v1796_v27, 0.0 }
 0x4bd   : > { %v2025_v29 = vmul.f32 %v7383_v37, %v8288_v45  ;;  %v2044_v49 = vmul.f32 %v8376_v3, %v2024_v38  ;;  %7210 = vmatprep.subr.msk.bf16.mxu0 %vm1805_vm2, %v8628_v1  ;;  %v8639_v39 = vpack.c.bf16 %v2051_v11, %v2050_v59  ;;  %v1795_v45 = vmul.f32 %v8224_v5, %v8224_v5 }
 0x4be   : > { %v7385_v33 = vpop.eup %7384  ;;  %1822 = vadd.xlane.f32.xlu1 %v1821_v9  ;;  %v1848_v52 = vsel %vm1805_vm2, %v1803_v41, 0.0 }
 0x4bf   : > { %v2045_v40 = vmul.f32 %v8376_v3, %v2025_v29  ;;  %v2032_v47 = vmul.f32 %v7385_v33, %v8305_v55  ;;  %7212 = vmatprep.subr.msk.bf16.mxu1 %vm1805_vm2, %v8639_v39  ;;  %v1824_v10 = vsel %vm1805_vm2, %v1795_v45, 0.0 }
 0x4c0   : > { %v7387_v48 = vpop.eup %7386  ;;  %1843 = vadd.xlane.f32.xlu0 %v1842_v0 }
 0x4c1   : > { %v8648_v53 = vpack.c.bf16 %v2045_v40, %v2044_v49  ;;  %v2033_v18 = vmul.f32 %v7387_v48, %v8312_v46  ;;  %v2052_v55 = vmul.f32 %v8376_v3, %v2032_v47  ;;  %v1804_v46 = vmul.f32 %v8258_v23, %v8258_v23 }
 0x4c2   : > { %1846 = vadd.xlane.f32.xlu1 %v1845_v43 }
 0x4c3   : > { %v2053_v14 = vmul.f32 %v8376_v3, %v2033_v18  ;;  %v1851_v38 = vsel %vm1805_vm2, %v1804_v46, 0.0 }
 0x4c4   : > { %1825 = vadd.xlane.f32.xlu0 %v1824_v10 }
 0x4c5   : > { %v8659_v37 = vpack.c.bf16 %v2053_v14, %v2052_v55 }
 0x4c6   : > { %1828 = vadd.xlane.f32.xlu1 %v1827_v50 }
 0x4c8   : > { %1849 = vadd.xlane.f32.xlu0 %v1848_v52 }
 0x4ca   : > { %1852 = vadd.xlane.f32.xlu1 %v1851_v38 }
 0x535   : > { %v8666_v3 = vpop.xlane.xlu0 %2365 }
 0x537   : > { %v8668_v59 = vpop.xlane.xlu1 %2368 }
 0x539   : > { %v8670_v11 = vpop.xlane.xlu0 %2359 }
 0x53b   : > { %v8672_v29 = vpop.xlane.xlu1 %2362 }
 0x541   : > { %v8674_v33 = vpop.xlane.xlu0 %2377 }
 0x543   : > { %v8676_v63 = vpop.xlane.xlu1 %2380 }
 0x545   : > { %v8678_v9 = vpop.xlane.xlu0 %2371 }
 0x547   : > { %v8680_v49 = vpop.xlane.xlu1 %2374 }
 0x549   : > { %v1820_v40 = vpop.xlane.xlu0 %1819 }
 0x54a   : > { %v1858_v47 = vmax.f32 %v1820_v40, 1e-24 }
 0x54b   : > { %v1823_v48 = vpop.xlane.xlu1 %1822 }
 0x54c   : > { %7388 = vrsqrt.f32 %v1858_v47  ;;  %v1859_v45 = vmax.f32 %v1823_v48, 1e-24 }
 0x54d   : > { %v1844_v0 = vpop.xlane.xlu0 %1843 }
 0x54e   : > { %7390 = vrsqrt.f32 %v1859_v45  ;;  %v1866_v18 = vmax.f32 %v1844_v0, 1e-24 }
 0x54f   : > { %v1847_v27 = vpop.xlane.xlu1 %1846 }
 0x550   : > { %7392 = vrsqrt.f32 %v1866_v18  ;;  %v1867_v43 = vmax.f32 %v1847_v27, 1e-24 }
 0x551   : > { %v1826_v55 = vpop.xlane.xlu0 %1825 }
 0x552   : > { %7394 = vrsqrt.f32 %v1867_v43  ;;  %v1860_v14 = vmax.f32 %v1826_v55, 1e-24 }
 0x553   : > { %v1829_v41 = vpop.xlane.xlu1 %1828 }
 0x554   : > { %7396 = vrsqrt.f32 %v1860_v14  ;;  %v1861_v10 = vmax.f32 %v1829_v41, 1e-24 }
 0x555   : > { %v1850_v46 = vpop.xlane.xlu0 %1849 }
 0x556   : > { %v7389_v50 = vpop.eup %7388  ;;  %7398 = vrsqrt.f32 %v1861_v10  ;;  %v1868_v52 = vmax.f32 %v1850_v46, 1e-24 }
 0x557   : > { %v1853_v38 = vpop.xlane.xlu1 %1852  ;;  %v1890_v40 = vmul.f32 %v7389_v50, %v8226_v6 }
 0x558   : > { %v7391_v47 = vpop.eup %7390  ;;  %7400 = vrsqrt.f32 %v1868_v52  ;;  %v1869_v48 = vmax.f32 %v1853_v38, 1e-24 }
 0x559   : > { %v8684_v45 = vmul.f32 %v8397_v42, %v1890_v40  ;;  %v1891_v0 = vmul.f32 %v7391_v47, %v8230_v8 }
 0x55a   : > { %v7393_v18 = vpop.eup %7392  ;;  %7402 = vrsqrt.f32 %v1869_v48 }
 0x55b   : > { %v2820_v27 = vmul.f32 %v8438_v24, %v8684_v45  ;;  %v8690_v43 = vmul.f32 %v8397_v42, %v1891_v0  ;;  %v1898_v55 = vmul.f32 %v7393_v18, %v8254_v21 }
 0x55c   : > { %v7395_v14 = vpop.eup %7394 }
 0x55d   : > { %v2828_v6 = vsel %vm1805_vm2, %v2820_v27, 0.0  ;;  %v2821_v41 = vmul.f32 %v8438_v24, %v8690_v43  ;;  %v2682_v10 = vpack.c.bf16 %v8690_v43, %v8684_v45  ;;  %v8699_v8 = vmul.f32 %v8397_v42, %v1898_v55 }
 0x55e   : > { %v7397_v46 = vpop.eup %7396  ;;  %2829 = vadd.xlane.f32.xlu0 %v2828_v6  ;;  %v1899_v50 = vmul.f32 %v7395_v14, %v8266_v30  ;;  %v2761_v45 = vsel %vm1805_vm2, %v8659_v37, 0 }
 0x55f   : > { %v2831_v52 = vsel %vm1805_vm2, %v2821_v41, 0.0  ;;  %v2824_v21 = vmul.f32 %v8447_v58, %v8699_v8  ;;  %v1892_v38 = vmul.f32 %v7397_v46, %v8224_v5 }
 0x560   : > { %v7399_v40 = vpop.eup %7398  ;;  %2832 = vadd.xlane.f32.xlu1 %v2831_v52  ;;  %v8707_v47 = vmul.f32 %v8397_v42, %v1899_v50 }
 0x561   : > { %v2840_v48 = vsel %vm1805_vm2, %v2824_v21, 0.0  ;;  %v8711_v0 = vmul.f32 %v8397_v42, %v1892_v38  ;;  %v1893_v18 = vmul.f32 %v7399_v40, %v8228_v7 }
 0x562   : > { %v7401_v30 = vpop.eup %7400  ;;  %2841 = vadd.xlane.f32.xlu0 %v2840_v48  ;;  %v2825_v27 = vmul.f32 %v8447_v58, %v8707_v47  ;;  %v2684_v5 = vpack.c.bf16 %v8707_v47, %v8699_v8  ;;  %v10353_v48 = vsub.f32 %v8528_v15, %v8533_v34 }
 0x563   : > { %v2822_v55 = vmul.f32 %v8438_v24, %v8711_v0  ;;  %v8721_v14 = vmul.f32 %v8397_v42, %v1893_v18  ;;  %v1900_v6 = vmul.f32 %v7401_v30, %v8248_v17  ;;  %v10354_v30 = vsub.f32 %v8542_v56, %v8551_v36 }
 0x564   : > { %v7403_v41 = vpop.eup %7402  ;;  %v2843_v46 = vsel %vm1805_vm2, %v2825_v27, 0.0  ;;  %v2346_v18 = vmul.f32 1.442695, %v10353_v48 }
 0x565   : > { %2844 = vadd.xlane.f32.xlu1 %v2843_v46  ;;  %v2834_v7 = vsel %vm1805_vm2, %v2822_v55, 0.0  ;;  %v2823_v50 = vmul.f32 %v8438_v24, %v8721_v14  ;;  %v2683_v52 = vpack.c.bf16 %v8721_v14, %v8711_v0  ;;  %v8731_v21 = vmul.f32 %v8397_v42, %v1900_v6 }
 0x566   : > { %2835 = vadd.xlane.f32.xlu0 %v2834_v7  ;;  %v1901_v38 = vmul.f32 %v7403_v41, %v8258_v23  ;;  %v2342_v27 = vmul.f32 1.442695, %v10354_v30  ;;  %v10355_v23 = vsub.f32 %v8530_v26, %v8540_v35  ;;  %7404 = vpow2.f32 %v2346_v18 }
 0x567   : > { %v2837_v17 = vsel %vm1805_vm2, %v2823_v50, 0.0  ;;  %v2826_v40 = vmul.f32 %v8447_v58, %v8731_v21  ;;  %v10357_v26 = vsub.f32 %v8571_v19, %v8583_v13  ;;  %v10359_v46 = vsub.f32 %v8580_v31, %v8594_v4 }
 0x568   : > { %v8741_v24 = vmul.f32 %v8397_v42, %v1901_v38  ;;  %v2348_v6 = vmul.f32 1.442695, %v10355_v23  ;;  %v10356_v42 = vsub.f32 %v8544_v57, %v8556_v22  ;;  %7406 = vpow2.f32 %v2342_v27 }
 0x569   : > { %2838 = vadd.xlane.f32.xlu1 %v2837_v17  ;;  %v2846_v55 = vsel %vm1805_vm2, %v2826_v40, 0.0  ;;  %v2354_v35 = vmul.f32 1.442695, %v10357_v26  ;;  %v2356_v57 = vmul.f32 1.442695, %v10359_v46  ;;  %v10360_v22 = vsub.f32 %v8569_v2, %v8578_v62 }
 0x56a   : > { %2847 = vadd.xlane.f32.xlu0 %v2846_v55  ;;  %v2827_v41 = vmul.f32 %v8447_v58, %v8741_v24  ;;  %v2685_v15 = vpack.c.bf16 %v8741_v24, %v8731_v21  ;;  %v2344_v34 = vmul.f32 1.442695, %v10356_v42  ;;  %7408 = vpow2.f32 %v2348_v6 }
 0x56b   : > { %v10358_v58 = vsub.f32 %v8553_v16, %v8567_v44  ;;  %v2352_v7 = vmul.f32 1.442695, %v10360_v22 }
 0x56c   : > { %v2849_v56 = vsel %vm1805_vm2, %v2827_v41, 0.0  ;;  %7410 = vpow2.f32 %v2344_v34 }
 0x56d   : > { %2850 = vadd.xlane.f32.xlu1 %v2849_v56  ;;  %v2350_v36 = vmul.f32 1.442695, %v10358_v58  ;;  %7412 = vpow2.f32 %v2354_v35 }
 0x56f   : > { %7414 = vpow2.f32 %v2350_v36  ;;  %v8786_v36 = vld [vmem:[%s8027_s22 + $0x1] ss:$0 sm:$0xff] }
 0x570   : > { %7416 = vpow2.f32 %v2356_v57  ;;  %v7405_v50 = vpop.eup %7404 }
 0x571   : > { %7418 = vpow2.f32 %v2352_v7  ;;  %v2384_v19 = vadd.f32 %v7405_v50, %v8666_v3  ;;  %v8777_v3 = vld [vmem:[%s8027_s22] ss:$0 sm:$0xff]  ;;  %s10377_s22 = sld [smem:[#allocation36_spill]] (!%p6683_p6) }
 0x572   : > { %v7407_v38 = vpop.eup %7406 }
 0x573   : > { %v2382_v16 = vadd.f32 %v7407_v38, %v8670_v11  ;;  %7420 = vrcp.f32 %v2384_v19  ;;  %v2418_v27 = vmul.f32 %v7407_v38, %v8777_v3 }
 0x574   : > { %v7409_v13 = vpop.eup %7408 }
 0x575   : > { %v2385_v31 = vadd.f32 %v7409_v13, %v8668_v59  ;;  %7422 = vrcp.f32 %v2382_v16 }
 0x576   : > { %v7411_v44 = vpop.eup %7410 }
 0x577   : > { %v2383_v4 = vadd.f32 %v7411_v44, %v8672_v29  ;;  %v7413_v2 = vpop.eup %7412  ;;  %7424 = vrcp.f32 %v2385_v31  ;;  %v2420_v29 = vmul.f32 %v7405_v50, %v8777_v3 }
 0x578   : > { %v2388_v17 = vadd.f32 %v7413_v2, %v8674_v33  ;;  %v2424_v7 = vmul.f32 %v7413_v2, %v8786_v36 }
 0x579   : > { %v7415_v62 = vpop.eup %7414  ;;  %7426 = vrcp.f32 %v2383_v4 }
 0x57a   : > { %v7417_v40 = vpop.eup %7416  ;;  %v2386_v48 = vadd.f32 %v7415_v62, %v8678_v9  ;;  %7428 = vrcp.f32 %v2388_v17  ;;  %v2421_v9 = vmul.f32 %v7409_v13, %v8777_v3  ;;  %v2422_v19 = vmul.f32 %v7415_v62, %v8786_v36 }
 0x57b   : > { %v7419_v18 = vpop.eup %7418  ;;  %v2389_v11 = vadd.f32 %v7417_v40, %v8676_v63  ;;  %v2419_v63 = vmul.f32 %v7411_v44, %v8777_v3  ;;  %v2425_v31 = vmul.f32 %v7417_v40, %v8786_v36  ;;  %v2697_v62 = vsel %vm1805_vm2, %v8628_v1, 0 }
 0x57c   : > { %v2387_v59 = vadd.f32 %v7419_v18, %v8680_v49  ;;  %7430 = vrcp.f32 %v2386_v48  ;;  %v2758_v1 = vsel %vm1805_vm2, %v8639_v39, 0 }
 0x57d   : > { %7432 = vrcp.f32 %v2389_v11  ;;  %v7421_v23 = vpop.eup %7420  ;;  %v2423_v11 = vmul.f32 %v7419_v18, %v8786_v36 }
 0x57e   : > { %7434 = vrcp.f32 %v2387_v59 }
 0x57f   : > { %v7423_v49 = vpop.eup %7422 }
 0x581   : > { %v7425_v26 = vpop.eup %7424 }
 0x583   : > { %v6964_v30 = vpop.f32.mrb[24].mxu0  ;;  %v7427_v46 = vpop.eup %7426 }
 0x584   : > { %v2475_v33 = vadd.f32 %v6964_v30, %v2420_v29  ;;  %v2466_v55 = vpop.f32.mrb[25].mxu0  ;;  %v7429_v4 = vpop.eup %7428 }
 0x585   : > { %v2467_v6 = vadd.f32 %v2466_v55, %v2418_v27  ;;  %v6965_v41 = vpop.f32.mrb[26].mxu0 }
 0x586   : > { %v2538_v42 = vmul.f32 %v7421_v23, %v2475_v33  ;;  %v2478_v34 = vadd.f32 %v6965_v41, %v2421_v9  ;;  %v2469_v56 = vpop.f32.mrb[27].mxu0  ;;  %v7431_v59 = vpop.eup %7430  ;;  %v2700_v41 = vsel %vm1805_vm2, %v8648_v53, 0 }
 0x587   : > { %v2536_v35 = vmul.f32 %v7423_v49, %v2467_v6  ;;  %v2470_v58 = vadd.f32 %v2469_v56, %v2419_v63  ;;  %v7433_v2 = vpop.eup %7432 }
 0x588   : > { %v2539_v57 = vmul.f32 %v7425_v26, %v2478_v34  ;;  %v7435_v40 = vpop.eup %7434 }
 0x589   : > { %v2537_v22 = vmul.f32 %v7427_v46, %v2470_v58 }
 0x58a   : > { %v2545_v50 = vpack.c.bf16 %v2539_v57, %v2538_v42  ;;  %v6972_v38 = vpop.f32.mrb[32].mxu1 }
 0x58b   : > { %v2544_v13 = vpack.c.bf16 %v2537_v22, %v2536_v35  ;;  %v2530_v16 = vadd.f32 %v6972_v38, %v2424_v7  ;;  %v2521_v44 = vpop.f32.mrb[33].mxu1 }
 0x58c   : > { %v2522_v17 = vadd.f32 %v2521_v44, %v2422_v19  ;;  %v6973_v48 = vpop.f32.mrb[34].mxu1 }
 0x58d   : > { %v2542_v29 = vmul.f32 %v7429_v4, %v2530_v16  ;;  %v2533_v30 = vadd.f32 %v6973_v48, %v2425_v31  ;;  %v2524_v27 = vpop.f32.mrb[35].mxu1  ;;  %6976 = vmatprep.mubr.msk.bf16.mxu0 %vm1805_vm2, %v2544_v13 }
 0x58e   : > { %v2540_v33 = vmul.f32 %v7431_v59, %v2522_v17  ;;  %v2525_v55 = vadd.f32 %v2524_v27, %v2423_v11  ;;  %6977 = vmatmul.mubr.msk.bf16.vlgmr.msra.gmra.mrb[28].mxu0 %vm1805_vm2, %v2545_v50 }
 0x58f   : > { %v2543_v9 = vmul.f32 %v7433_v2, %v2533_v30  ;;  %6987 = vmatpush3.bf16.xpose.msra.mxu0 %v2697_v62  ;;  %6990 = vmatprep.mubr.msk.bf16.mxu0 %vm1805_vm2, %v2682_v10 }
 0x590   : > { %v2541_v18 = vmul.f32 %v7435_v40, %v2525_v55  ;;  %7211 = vmatprep.subr.msk.bf16.mxu0 %vm1805_vm2, %v8648_v53 }
 0x591   : > { %v2547_v23 = vpack.c.bf16 %v2543_v9, %v2542_v29 }
 0x592   : > { %v2546_v6 = vpack.c.bf16 %v2541_v18, %v2540_v33 }
 0x594   : > { %6982 = vmatprep.mubr.msk.bf16.mxu1 %vm1805_vm2, %v2546_v6 }
 0x595   : > { %6983 = vmatmul.mubr.msk.bf16.vlgmr.msra.gmra.mrb[36].mxu1 %vm1805_vm2, %v2547_v23 }
 0x596   : > { %6995 = vmatpush3.bf16.xpose.msra.mxu1 %v2758_v1  ;;  %6998 = vmatprep.mubr.msk.bf16.mxu1 %vm1805_vm2, %v2684_v5 }
 0x597   : > { %6989 = vmatpush3.bf16.xpose.msra.mxu0 %v2700_v41  ;;  %7213 = vmatprep.subr.msk.bf16.mxu1 %vm1805_vm2, %v8659_v37 }
 0x598   : > { %7002 = vmatprep.subr.bf16.mxu0 %v8342_v54 }
 0x59e   : > { %6991 = vmatmul.mubr.msk.bf16.vlgmr.msra.gmra.mrb[32].mxu0 %vm1805_vm2, %v2683_v52  ;;  %6997 = vmatpush3.bf16.xpose.msra.mxu1 %v2761_v45 }
 0x59f   : > { %7003 = vmatpush3.bf16.msra.mxu0 %v8342_v54  ;;  %7010 = vmatprep.subr.bf16.mxu1 %v8362_v32 }
 0x5a0   : > { %7004 = vmatprep.subr.bf16.mxu0 %v8339_v28 }
 0x5a3   : > { %7005 = vmatpush3.bf16.msra.mxu0 %v8339_v28 }
 0x5a4   : > { %7018 = vmatprep.subr.bf16.mxu0 %v8521_v12 }
 0x5a5   : > { %6999 = vmatmul.mubr.msk.bf16.vlgmr.msra.gmra.mrb[40].mxu1 %vm1805_vm2, %v2685_v15 }
 0x5a6   : > { %7011 = vmatpush3.bf16.msra.mxu1 %v8362_v32 }
 0x5a7   : > { %7012 = vmatprep.subr.bf16.mxu1 %v8359_v20 }
 0x5aa   : > { %7013 = vmatpush3.bf16.msra.mxu1 %v8359_v20 }
 0x5ab   : > { %7024 = vmatprep.subr.bf16.mxu1 %v8525_v60 }
 0x5eb   : > { %v2830_v29 = vpop.xlane.xlu0 %2829 }
 0x5ed   : > { %v2833_v30 = vpop.xlane.xlu1 %2832 }
 0x5ef   : > { %v2842_v27 = vpop.xlane.xlu0 %2841 }
 0x5f2   : > { %v2845_v2 = vpop.xlane.xlu1 %2844 }
 0x5f3   : > { %v2836_v33 = vpop.xlane.xlu0 %2835 }
 0x5f4   : > { %v8870_v9 = vmul.f32 8.0, %v2836_v33 }
 0x5f6   : > { %v2839_v55 = vpop.xlane.xlu1 %2838 }
 0x5f7   : > { %v2848_v62 = vpop.xlane.xlu0 %2847  ;;  %v8872_v23 = vmul.f32 8.0, %v2839_v55 }
 0x5fa   : > { %v2851_v40 = vpop.xlane.xlu1 %2850 }
 0x661   : > { %v6978_v54 = vpop.f32.mrb[28].mxu0 }
 0x662   : > { %v2594_v39 = vpop.f32.mrb[29].mxu0  ;;  %v2676_v12 = vsel %vm1160_vm1, %v6978_v54, 0.0 }
 0x663   : > { %v6979_v53 = vpop.f32.mrb[30].mxu0  ;;  %v2670_v8 = vsel %vm1160_vm1, %v2594_v39, 0.0  ;;  %v8883_v39 = vmul.f32 8.0, %v2830_v29 }
 0x664   : > { %v2597_v37 = vpop.f32.mrb[31].mxu0  ;;  %v2679_v20 = vsel %vm1160_vm1, %v6979_v53, 0.0 }
 0x665   : > { %v2673_v52 = vsel %vm1160_vm1, %v2597_v37, 0.0  ;;  %v8885_v37 = vmul.f32 8.0, %v2833_v30 }
 0x668   : > { %v6984_v28 = vpop.f32.mrb[36].mxu1 }
 0x669   : > { %v2677_v43 = vsel %vm1160_vm1, %v6984_v28, 0.0  ;;  %v2655_v10 = vpop.f32.mrb[37].mxu1 }
 0x66a   : > { %v8837_v47 = vadd.f32 %v2677_v43, %v2676_v12  ;;  %v2671_v32 = vsel %vm1160_vm1, %v2655_v10, 0.0  ;;  %v6985_v0 = vpop.f32.mrb[38].mxu1 }
 0x66b   : > { %v8841_v60 = vadd.f32 %v2671_v32, %v2670_v8  ;;  %v2680_v5 = vsel %vm1160_vm1, %v6985_v0, 0.0  ;;  %v2658_v14 = vpop.f32.mrb[39].mxu1  ;;  %v8893_v32 = vmul.f32 8.0, %v2842_v27 }
 0x66c   : > { %v8845_v21 = vadd.f32 %v2680_v5, %v2679_v20  ;;  %v2674_v24 = vsel %vm1160_vm1, %v2658_v14, 0.0 }
 0x66d   : > { %v8848_v15 = vadd.f32 %v2674_v24, %v2673_v52 }
 0x671   : > { %v6992_v63 = vpop.f32.mrb[32].mxu0 }
 0x672   : > { %v2814_v49 = vmul.f32 8.0, %v6992_v63  ;;  %v2736_v42 = vpop.f32.mrb[33].mxu0 }
 0x673   : > { %v6993_v34 = vpop.f32.mrb[34].mxu0  ;;  %v8850_v56 = vmul.f32 8.0, %v2736_v42  ;;  %v8908_v42 = vmul.f32 8.0, %v2845_v2 }
 0x674   : > { %v2815_v26 = vmul.f32 8.0, %v6993_v34  ;;  %v2739_v35 = vpop.f32.mrb[35].mxu0  ;;  %v2866_v58 = vsel %vm1160_vm1, %v2814_v49, -inf }
 0x675   : > { %2867 = vmax.xlane.f32.xlu0 %v2866_v58  ;;  %v2813_v46 = vmul.f32 8.0, %v2739_v35  ;;  %v2860_v7 = vsel %vm1160_vm1, %v8850_v56, -inf  ;;  %v8910_v35 = vmul.f32 8.0, %v2848_v62 }
 0x676   : > { %v2869_v57 = vsel %vm1160_vm1, %v2815_v26, -inf }
 0x677   : > { %2870 = vmax.xlane.f32.xlu1 %v2869_v57  ;;  %v2863_v13 = vsel %vm1160_vm1, %v2813_v46, -inf }
 0x678   : > { %v7000_v22 = vpop.f32.mrb[40].mxu1 }
 0x679   : > { %2861 = vmax.xlane.f32.xlu0 %v2860_v7  ;;  %v2797_v50 = vpop.f32.mrb[41].mxu1  ;;  %v8857_v44 = vmul.f32 8.0, %v7000_v22  ;;  %v8918_v7 = vmul.f32 8.0, %v2851_v40 }
 0x67a   : > { %v2816_v38 = vmul.f32 8.0, %v2797_v50  ;;  %v7001_v19 = vpop.f32.mrb[42].mxu1 }
 0x67b   : > { %2864 = vmax.xlane.f32.xlu1 %v2863_v13  ;;  %v2800_v16 = vpop.f32.mrb[43].mxu1  ;;  %v8862_v17 = vmul.f32 8.0, %v7001_v19  ;;  %v2878_v11 = vsel %vm1160_vm1, %v8857_v44, -inf }
 0x67c   : > { %v8859_v31 = vmul.f32 8.0, %v2800_v16  ;;  %v2872_v4 = vsel %vm1160_vm1, %v2816_v38, -inf }
 0x67d   : > { %2873 = vmax.xlane.f32.xlu0 %v2872_v4  ;;  %v2881_v59 = vsel %vm1160_vm1, %v8862_v17, -inf }
 0x67e   : > { %v2875_v48 = vsel %vm1160_vm1, %v8859_v31, -inf }
 0x67f   : > { %2876 = vmax.xlane.f32.xlu1 %v2875_v48 }
 0x681   : > { %2879 = vmax.xlane.f32.xlu0 %v2878_v11 }
 0x683   : > { %2882 = vmax.xlane.f32.xlu1 %v2881_v59 }
 0x702   : > { %v2868_v18 = vpop.xlane.xlu0 %2867 }
 0x703   : > { %v8875_v6 = vmax.f32 %v2868_v18, %v8870_v9 }
 0x704   : > { %v2871_v1 = vpop.xlane.xlu1 %2870 }
 0x705   : > { %v2894_v41 = vsub.f32 %v2814_v49, %v8875_v6  ;;  %v2918_v45 = vsub.f32 %v8870_v9, %v8875_v6  ;;  %v8881_v54 = vmax.f32 %v2871_v1, %v8872_v23 }
 0x706   : > { %v2862_v53 = vpop.xlane.xlu0 %2861 }
 0x707   : > { %v2904_v28 = vmul.f32 1.442695, %v2894_v41  ;;  %v2895_v12 = vsub.f32 %v2815_v26, %v8881_v54  ;;  %v2919_v43 = vsub.f32 %v8872_v23, %v8881_v54  ;;  %v8891_v10 = vmax.f32 %v2862_v53, %v8883_v39 }
 0x708   : > { %v2865_v8 = vpop.xlane.xlu1 %2864 }
 0x709   : > { %7436 = vpow2.f32 %v2904_v28  ;;  %v2906_v0 = vmul.f32 1.442695, %v2895_v12  ;;  %v8896_v20 = vmax.f32 %v2865_v8, %v8885_v37  ;;  %v2892_v5 = vsub.f32 %v8850_v56, %v8891_v10 }
 0x70a   : > { %v2916_v14 = vsub.f32 %v8883_v39, %v8891_v10  ;;  %v2874_v52 = vpop.xlane.xlu0 %2873 }
 0x70b   : > { %7438 = vpow2.f32 %v2906_v0  ;;  %v2893_v24 = vsub.f32 %v2813_v46, %v8896_v20  ;;  %v2917_v63 = vsub.f32 %v8885_v37, %v8896_v20  ;;  %v8906_v49 = vmax.f32 %v2874_v52, %v8893_v32 }
 0x70c   : > { %v2900_v34 = vmul.f32 1.442695, %v2892_v5  ;;  %v2877_v26 = vpop.xlane.xlu1 %2876  ;;  %v7704_v5 = vld [vmem:[%s10352_s14] sm:$0xff]  }
 0x70d   : > { %v2902_v56 = vmul.f32 1.442695, %v2893_v24  ;;  %v2896_v58 = vsub.f32 %v2816_v38, %v8906_v49  ;;  %v2920_v57 = vsub.f32 %v8893_v32, %v8906_v49  ;;  %v8916_v46 = vmax.f32 %v2877_v26, %v8908_v42  ;;  %v7705_v24 = vld [vmem:[#allocation2] sm:$0xff] }
 0x70e   : > { %7440 = vpow2.f32 %v2900_v34  ;;  %v2880_v22 = vpop.xlane.xlu0 %2879  ;;  %v8948_v34 = vadd.f32 %v7705_v24, %v8841_v60 }
 0x70f   : > { %v2908_v50 = vmul.f32 1.442695, %v2896_v58  ;;  %v8921_v19 = vmax.f32 %v2880_v22, %v8910_v35  ;;  %7442 = vpow2.f32 %v2902_v56  ;;  %v2897_v13 = vsub.f32 %v8859_v31, %v8916_v46  ;;  %v7706_v58 = vld [vmem:[#allocation2 + $0x8] sm:$0xff] }
 0x710   : > { %v2921_v38 = vsub.f32 %v8908_v42, %v8916_v46  ;;  %v2883_v16 = vpop.xlane.xlu1 %2882  ;;  %v8953_v22 = vadd.f32 %v7706_v58, %v8848_v15  ;;  %v3248_v60 = vsel %vm1160_vm1, %v8948_v34, 0.0 }
 0x711   : > { %v2898_v4 = vsub.f32 %v8857_v44, %v8921_v19  ;;  %v2922_v48 = vsub.f32 %v8910_v35, %v8921_v19  ;;  %v8932_v11 = vmax.f32 %v2883_v16, %v8918_v7  ;;  %7444 = vpow2.f32 %v2908_v50  ;;  %v7707_v16 = vld [vmem:[#allocation2 + $0x10] sm:$0xff] }
 0x712   : > { %v2910_v59 = vmul.f32 1.442695, %v2897_v13  ;;  %v2934_v39 = vmul.f32 1.442695, %v2921_v38 }
 0x713   : > { %v7437_v29 = vpop.eup %7436  ;;  %v2912_v30 = vmul.f32 1.442695, %v2898_v4  ;;  %v2899_v31 = vsub.f32 %v8862_v17, %v8932_v11  ;;  %v2923_v27 = vsub.f32 %v8918_v7, %v8932_v11  ;;  %v8957_v4 = vadd.f32 %v7707_v16, %v8837_v47 }
 0x714   : > { %7446 = vpow2.f32 %v2910_v59  ;;  %v2946_v2 = vsel %vm1160_vm1, %v7437_v29, 0.0  ;;  %v7708_v59 = vld [vmem:[%s10352_s14 + $0x8] sm:$0xff]   ;;  %v2936_v9 = vmul.f32 1.442695, %v2922_v48 }
 0x715   : > { %v7439_v44 = vpop.eup %7438  ;;  %v2914_v33 = vmul.f32 1.442695, %v2899_v31  ;;  %2947 = vadd.xlane.f32.xlu0 %v2946_v2  ;;  %7448 = vpow2.f32 %v2912_v30  ;;  %v3251_v30 = vsel %vm1160_vm1, %v8953_v22, 0.0  ;;  %v3254_v47 = vsel %vm1160_vm1, %v8957_v4, 0.0 }
 0x716   : > { %v2949_v55 = vsel %vm1160_vm1, %v7439_v44, 0.0  ;;  %v2981_v53 = vpack.c.bf16 %v7439_v44, %v7437_v29  ;;  %v7709_v29 = vld [vmem:[#allocation2 + $0x18] sm:$0xff]  ;;  %v2928_v2 = vmul.f32 1.442695, %v2918_v45  ;;  %v2932_v45 = vmul.f32 1.442695, %v2920_v57 }
 0x717   : > { %2950 = vadd.xlane.f32.xlu1 %v2949_v55  ;;  %7450 = vpow2.f32 %v2914_v33  ;;  %v8964_v15 = vadd.f32 %v7709_v29, %v8845_v21  ;;  %v2924_v21 = vmul.f32 1.442695, %v2916_v14  ;;  %v2930_v33 = vmul.f32 1.442695, %v2919_v43 }
 0x718   : > { %v7441_v62 = vpop.eup %7440  ;;  %v2926_v55 = vmul.f32 1.442695, %v2917_v63  ;;  %7452 = vpow2.f32 %v2928_v2  ;;  %v2938_v23 = vmul.f32 1.442695, %v2923_v27 }
 0x719   : > { %v2940_v40 = vsel %vm1160_vm1, %v7441_v62, 0.0  ;;  %v7443_v18 = vpop.eup %7442  ;;  %v3257_v31 = vsel %vm1160_vm1, %v8964_v15, 0.0  ;;  %7454 = vpow2.f32 %v2924_v21 }
 0x71a   : > { %2941 = vadd.xlane.f32.xlu0 %v2940_v40  ;;  %v2943_v17 = vsel %vm1160_vm1, %v7443_v18, 0.0  ;;  %v2980_v1 = vpack.c.bf16 %v7443_v18, %v7441_v62  ;;  %7456 = vpow2.f32 %v2930_v33 }
 0x71b   : > { %v7445_v41 = vpop.eup %7444  ;;  %2944 = vadd.xlane.f32.xlu1 %v2943_v17  ;;  %7458 = vpow2.f32 %v2926_v55 }
 0x71c   : > { %7006 = vmatprep.mubr.msk.bf16.mxu0 %vm1160_vm1, %v2980_v1  ;;  %v2952_v28 = vsel %vm1160_vm1, %v7445_v41, 0.0  ;;  %7460 = vpow2.f32 %v2936_v9 }
 0x71d   : > { %7007 = vmatmul.mubr.msk.bf16.vlgmr.msra.gmra.mrb[36].mxu0 %vm1160_vm1, %v2981_v53  ;;  %7462 = vpow2.f32 %v2932_v45 }
 0x71e   : > { %v7447_v12 = vpop.eup %7446  ;;  %2953 = vadd.xlane.f32.xlu0 %v2952_v28  ;;  %7019 = vmatpush3.bf16.msra.mxu0 %v7704_v5  ;;  %7464 = vpow2.f32 %v2938_v23 }
 0x71f   : > { %v2955_v8 = vsel %vm1160_vm1, %v7447_v12, 0.0  ;;  %v2982_v0 = vpack.c.bf16 %v7447_v12, %v7445_v41  ;;  %v7449_v52 = vpop.eup %7448  ;;  %7466 = vpow2.f32 %v2934_v39 }
 0x720   : > { %2956 = vadd.xlane.f32.xlu1 %v2955_v8  ;;  %v2958_v26 = vsel %vm1160_vm1, %v7449_v52, 0.0 }
 0x721   : > { %7014 = vmatprep.mubr.msk.bf16.mxu1 %vm1160_vm1, %v2982_v0  ;;  %v7451_v56 = vpop.eup %7450 }
 0x722   : > { %2959 = vadd.xlane.f32.xlu0 %v2958_v26  ;;  %v2961_v50 = vsel %vm1160_vm1, %v7451_v56, 0.0  ;;  %v2983_v13 = vpack.c.bf16 %v7451_v56, %v7449_v52  ;;  %v7453_v43 = vpop.eup %7452 }
 0x723   : > { %v7455_v10 = vpop.eup %7454  ;;  %v2990_v17 = vmul.f32 %v7453_v43, %v8777_v3 }
 0x724   : > { %2962 = vadd.xlane.f32.xlu1 %v2961_v50  ;;  %7015 = vmatmul.mubr.msk.bf16.vlgmr.msra.gmra.mrb[44].mxu1 %vm1160_vm1, %v2983_v13  ;;  %v7457_v32 = vpop.eup %7456  ;;  %v2988_v41 = vmul.f32 %v7455_v10, %v8777_v3 }
 0x725   : > { %7025 = vmatpush3.bf16.msra.mxu1 %v7708_v59  ;;  %v7459_v49 = vpop.eup %7458  ;;  %v2991_v12 = vmul.f32 %v7457_v32, %v8777_v3 }
 0x726   : > { %3249 = vadd.xlane.f32.xlu0 %v3248_v60  ;;  %v7461_v19 = vpop.eup %7460  ;;  %v2989_v52 = vmul.f32 %v7459_v49, %v8777_v3 }
 0x727   : > { %v7463_v46 = vpop.eup %7462 }
 0x728   : > { %3252 = vadd.xlane.f32.xlu1 %v3251_v30  ;;  %v7465_v48 = vpop.eup %7464  ;;  %v2994_v30 = vmul.f32 %v7461_v19, %v8786_v36  ;;  %v2992_v2 = vmul.f32 %v7463_v46, %v8786_v36 }
 0x729   : > { %v7467_v27 = vpop.eup %7466  ;;  %v2995_v3 = vmul.f32 %v7465_v48, %v8786_v36 }
 0x72a   : > { %3255 = vadd.xlane.f32.xlu0 %v3254_v47 }
 0x72c   : > { %3258 = vadd.xlane.f32.xlu1 %v3257_v31 }
 0x7a2   : > { %v2948_v44 = vpop.xlane.xlu0 %2947 }
 0x7a3   : > { %v2966_v20 = vadd.f32 %v7453_v43, %v2948_v44 }
 0x7a4   : > { %v2951_v62 = vpop.xlane.xlu1 %2950 }
 0x7a5   : > { %v2967_v35 = vadd.f32 %v7457_v32, %v2951_v62  ;;  %7468 = vrcp.f32 %v2966_v20 }
 0x7a7   : > { %v2942_v6 = vpop.xlane.xlu0 %2941 }
 0x7a8   : > { %v2945_v54 = vpop.xlane.xlu1 %2944  ;;  %v2964_v63 = vadd.f32 %v7455_v10, %v2942_v6  ;;  %v2993_v6 = vmul.f32 %v7467_v27, %v8786_v36 }
 0x7a9   : > { %v2965_v57 = vadd.f32 %v7459_v49, %v2945_v54 }
 0x7aa   : > { %7470 = vrcp.f32 %v2964_v63 }
 0x7ab   : > { %v2954_v37 = vpop.xlane.xlu0 %2953  ;;  %7472 = vrcp.f32 %v2967_v35 }
 0x7ac   : > { %7474 = vrcp.f32 %v2965_v57  ;;  %v2968_v11 = vadd.f32 %v7463_v46, %v2954_v37 }
 0x7ad   : > { %v2957_v14 = vpop.xlane.xlu1 %2956 }
 0x7ae   : > { %v2969_v18 = vadd.f32 %v7467_v27, %v2957_v14 }
 0x7af   : > { %v2960_v7 = vpop.xlane.xlu0 %2959  ;;  %v7469_v8 = vpop.eup %7468 }
 0x7b0   : > { %v2970_v38 = vadd.f32 %v7461_v19, %v2960_v7 }
 0x7b1   : > { %v2963_v42 = vpop.xlane.xlu1 %2962 }
 0x7b2   : > { %v2971_v40 = vadd.f32 %v7465_v48, %v2963_v42  ;;  %7476 = vrcp.f32 %v2970_v38 }
 0x7b3   : > { %7478 = vrcp.f32 %v2968_v11  ;;  %v3250_v19 = vpop.xlane.xlu0 %3249 }
 0x7b4   : > { %7480 = vrcp.f32 %v2971_v40  ;;  %v7471_v24 = vpop.eup %7470  ;;  %v3272_v27 = vmul.f32 0.03125, %v3250_v19 }
 0x7b5   : > { %7482 = vrcp.f32 %v2969_v18  ;;  %v7473_v50 = vpop.eup %7472  ;;  %v3253_v42 = vpop.xlane.xlu1 %3252 }
 0x7b6   : > { %v7475_v60 = vpop.eup %7474 }
 0x7bc   : > { %v7477_v55 = vpop.eup %7476 }
 0x7bd   : > { %v7479_v45 = vpop.eup %7478 }
 0x7be   : > { %v7481_v37 = vpop.eup %7480 }
 0x7bf   : > { %v7483_v20 = vpop.eup %7482 }
 0x7f0   : > { %v7008_v1 = vpop.f32.mrb[36].mxu0 }
 0x7f1   : > { %v3045_v53 = vadd.f32 %v7008_v1, %v2990_v17  ;;  %v3036_v28 = vpop.f32.mrb[37].mxu0 }
 0x7f2   : > { %v3037_v0 = vadd.f32 %v3036_v28, %v2988_v41  ;;  %v7009_v5 = vpop.f32.mrb[38].mxu0 }
 0x7f3   : > { %v3108_v26 = vmul.f32 %v7469_v8, %v3045_v53  ;;  %v3048_v56 = vadd.f32 %v7009_v5, %v2991_v12  ;;  %v3039_v58 = vpop.f32.mrb[39].mxu0  ;;  %v3256_v8 = vpop.xlane.xlu0 %3255 }
 0x7f4   : > { %v3106_v13 = vmul.f32 %v7471_v24, %v3037_v0  ;;  %v3040_v16 = vadd.f32 %v3039_v58, %v2989_v52  ;;  %v3273_v24 = vmul.f32 0.03125, %v3253_v42 }
 0x7f5   : > { %v3109_v59 = vmul.f32 %v7473_v50, %v3048_v56  ;;  %v9019_v50 = vsub.f32 %v8948_v34, %v3272_v27 }
 0x7f6   : > { %v3107_v29 = vmul.f32 %v7475_v60, %v3040_v16  ;;  %v3274_v16 = vmul.f32 0.03125, %v3256_v8  ;;  %v7711_v60 = vld [vmem:[#allocation2 + $0x30] sm:$0xff] }
 0x7f7   : > { %v3115_v47 = vpack.c.bf16 %v3109_v59, %v3108_v26  ;;  %v7016_v31 = vpop.f32.mrb[44].mxu1  ;;  %v7710_v26 = vld [vmem:[#allocation2 + $0x20] sm:$0xff] }
 0x7f8   : > { %v3114_v21 = vpack.c.bf16 %v3107_v29, %v3106_v13  ;;  %v3100_v44 = vadd.f32 %v7016_v31, %v2994_v30  ;;  %v3091_v33 = vpop.f32.mrb[45].mxu1  ;;  %v3259_v13 = vpop.xlane.xlu1 %3258  ;;  %v7712_v29 = vld [vmem:[#allocation2 + $0x28] sm:$0xff]  ;;  %v9028_v31 = vsub.f32 %v8953_v22, %v3273_v24 }
 0x7f9   : > { %v3092_v62 = vadd.f32 %v3091_v33, %v2992_v2  ;;  %v7017_v9 = vpop.f32.mrb[46].mxu1  ;;  %v3275_v2 = vmul.f32 0.03125, %v3259_v13 }
 0x7fa   : > { %v3112_v23 = vmul.f32 %v7477_v55, %v3100_v44  ;;  %v3103_v54 = vadd.f32 %v7017_v9, %v2995_v3  ;;  %v3094_v39 = vpop.f32.mrb[47].mxu1  ;;  %7020 = vmatprep.mubr.msk.bf16.mxu0 %vm1805_vm2, %v3114_v21  ;;  %v7713_v21 = vld [vmem:[#allocation2 + $0x38] sm:$0xff]  ;;  %v9035_v3 = vsub.f32 %v8957_v4, %v3274_v16 }
 0x7fb   : > { %v3110_v43 = vmul.f32 %v7479_v45, %v3092_v62  ;;  %v3095_v10 = vadd.f32 %v3094_v39, %v2993_v6  ;;  %7021 = vmatmul.mubr.msk.bf16.vlgmr.msra.gmra.mrb[40].mxu0 %vm1805_vm2, %v3115_v47  ;;  %v3288_v62 = vmul.f32 %v9019_v50, %v9019_v50  ;;  %v9042_v9 = vsub.f32 %v8964_v15, %v3275_v2 }
 0x7fc   : > { %v3113_v14 = vmul.f32 %v7481_v37, %v3103_v54  ;;  %v3289_v45 = vmul.f32 %v9028_v31, %v9028_v31  ;;  %v3290_v54 = vmul.f32 %v9035_v3, %v9035_v3 }
 0x7fd   : > { %v3111_v32 = vmul.f32 %v7483_v20, %v3095_v10  ;;  %v3291_v37 = vmul.f32 %v9042_v9, %v9042_v9  ;;  %v7282_v20 = vld [vmem:[%s8036_s24] sm:$0xff]  }
 0x7fe   : > { %v3117_v63 = vpack.c.bf16 %v3113_v14, %v3112_v23  ;;  %v3296_v23 = vsel %vm1160_vm1, %v3288_v62, 0.0  ;;  %v3299_v39 = vsel %vm1160_vm1, %v3289_v45, 0.0  ;;  %v7283_v14 = vld [vmem:[%s8036_s24 + $0x10] sm:$0xff]   ;;  %7030 = vmatprep.subr.bf16.mxu0 %v7282_v20 }
 0x7ff   : > { %v3116_v49 = vpack.c.bf16 %v3111_v32, %v3110_v43  ;;  %v3302_v43 = vsel %vm1160_vm1, %v3290_v54, 0.0  ;;  %v3305_v10 = vsel %vm1160_vm1, %v3291_v37, 0.0  ;;  %7042 = vmatprep.subr.bf16.mxu1 %v7283_v14  ;;  %v7284_v32 = vld [vmem:[%s8036_s24 + $0x8] sm:$0xff]   ;;  %7031 = vmatpush3.bf16.msra.mxu0 %v7282_v20 }
 0x800   : > { %7032 = vmatprep.subr.bf16.mxu0 %v7284_v32 }
 0x801   : > { %7026 = vmatprep.mubr.msk.bf16.mxu1 %vm1805_vm2, %v3116_v49 }
 0x802   : > { %7027 = vmatmul.mubr.msk.bf16.vlgmr.msra.gmra.mrb[48].mxu1 %vm1805_vm2, %v3117_v63  ;;  %v7285_v63 = vld [vmem:[%s8036_s24 + $0x18] sm:$0xff]   ;;  %s10361_s24 = sld [smem:[#allocation20_spill]] }
 0x803   : > { %7043 = vmatpush3.bf16.msra.mxu1 %v7283_v14  ;;  %7033 = vmatpush3.bf16.msra.mxu0 %v7284_v32  ;;  %v7823_v14 = vmov 0.0   ;;  %v7288_v32 = vld [vmem:[%s8041_s4 + $0x8] sm:$0xff]  }
 0x804   : > { %7044 = vmatprep.subr.bf16.mxu1 %v7285_v63  ;;  %7054 = vmatprep.subr.bf16.mxu0 %v7823_v14 }
 0x807   : > { %7045 = vmatpush3.bf16.msra.mxu1 %v7285_v63  ;;  %v7289_v63 = vld [vmem:[%s8041_s4 + $0x18] sm:$0xff]  }
 0x808   : > { %7062 = vmatprep.subr.bf16.mxu1 %v7823_v14 }
 0x8ce   : > { %v7022_v36 = vpop.f32.mrb[40].mxu0 }
 0x8cf   : > { %v3158_v35 = vpop.f32.mrb[41].mxu0  ;;  %v3234_v38 = vsel %vm1160_vm1, %v7022_v36, 0.0 }
 0x8d0   : > { %v7023_v57 = vpop.f32.mrb[42].mxu0  ;;  %v3228_v40 = vsel %vm1160_vm1, %v3158_v35, 0.0 }
 0x8d1   : > { %v3161_v7 = vpop.f32.mrb[43].mxu0  ;;  %v3237_v41 = vsel %vm1160_vm1, %v7023_v57, 0.0 }
 0x8d2   : > { %v3231_v0 = vsel %vm1160_vm1, %v3161_v7, 0.0 }
 0x8d5   : > { %v7028_v46 = vpop.f32.mrb[48].mxu1 }
 0x8d6   : > { %v3235_v48 = vsel %vm1160_vm1, %v7028_v46, 0.0  ;;  %v3213_v11 = vpop.f32.mrb[49].mxu1 }
 0x8d7   : > { %v3236_v18 = vadd.f32 %v3235_v48, %v3234_v38  ;;  %v3229_v17 = vsel %vm1160_vm1, %v3213_v11, 0.0  ;;  %v7029_v1 = vpop.f32.mrb[50].mxu1 }
 0x8d8   : > { %v3230_v53 = vadd.f32 %v3229_v17, %v3228_v40  ;;  %v3238_v28 = vsel %vm1160_vm1, %v7029_v1, 0.0  ;;  %v3216_v12 = vpop.f32.mrb[51].mxu1 }
 0x8d9   : > { %v3239_v5 = vadd.f32 %v3238_v28, %v3237_v41  ;;  %v3232_v52 = vsel %vm1160_vm1, %v3216_v12, 0.0  ;;  %v9021_v59 = vadd.f32 %v7711_v60, %v3236_v18 }
 0x8da   : > { %v9016_v56 = vadd.f32 %v7710_v26, %v3230_v53  ;;  %v3233_v58 = vadd.f32 %v3232_v52, %v3231_v0 }
 0x8db   : > { %v9030_v44 = vadd.f32 %v7713_v21, %v3239_v5  ;;  %v3266_v55 = vsel %vm1160_vm1, %v9021_v59, 0.0 }
 0x8dc   : > { %v9023_v30 = vadd.f32 %v7712_v29, %v3233_v58  ;;  %v3260_v47 = vsel %vm1160_vm1, %v9016_v56, 0.0 }
 0x8dd   : > { %3261 = vadd.xlane.f32.xlu0 %v3260_v47  ;;  %v3269_v6 = vsel %vm1160_vm1, %v9030_v44, 0.0 }
 0x8de   : > { %v3263_v33 = vsel %vm1160_vm1, %v9023_v30, 0.0 }
 0x8df   : > { %3264 = vadd.xlane.f32.xlu1 %v3263_v33  ;;  %v7714_v33 = vld [vmem:[%s7990_s1] sm:$0x7] }
 0x8e1   : > { %3267 = vadd.xlane.f32.xlu0 %v3266_v55  ;;  %v3355_v55 = vrot.slane %v7714_v33, %v8365_v61 }
 0x8e3   : > { %3270 = vadd.xlane.f32.xlu1 %v3269_v6 }
 0x8e5   : > { %3297 = vadd.xlane.f32.xlu0 %v3296_v23 }
 0x8e7   : > { %3300 = vadd.xlane.f32.xlu1 %v3299_v39 }
 0x8e9   : > { %3303 = vadd.xlane.f32.xlu0 %v3302_v43 }
 0x8eb   : > { %3306 = vadd.xlane.f32.xlu1 %v3305_v10 }
 0x96a   : > { %v3262_v49 = vpop.xlane.xlu0 %3261 }
 0x96b   : > { %v3276_v36 = vmul.f32 0.03125, %v3262_v49 }
 0x96c   : > { %v3265_v35 = vpop.xlane.xlu1 %3264 }
 0x96d   : > { %v9061_v57 = vsub.f32 %v9016_v56, %v3276_v36  ;;  %v3277_v7 = vmul.f32 0.03125, %v3265_v35 }
 0x96e   : > { %v3268_v19 = vpop.xlane.xlu0 %3267 }
 0x96f   : > { %v9064_v42 = vsub.f32 %v9023_v30, %v3277_v7  ;;  %v3278_v46 = vmul.f32 0.03125, %v3268_v19  ;;  %v3292_v38 = vmul.f32 %v9061_v57, %v9061_v57 }
 0x970   : > { %v3271_v48 = vpop.xlane.xlu1 %3270 }
 0x971   : > { %v9069_v11 = vsub.f32 %v9021_v59, %v3278_v46  ;;  %v3279_v27 = vmul.f32 0.03125, %v3271_v48  ;;  %v3308_v40 = vsel %vm1160_vm1, %v3292_v38, 0.0  ;;  %v3293_v18 = vmul.f32 %v9064_v42, %v9064_v42 }
 0x972   : > { %3309 = vadd.xlane.f32.xlu0 %v3308_v40  ;;  %v3298_v17 = vpop.xlane.xlu0 %3297 }
 0x973   : > { %v9075_v1 = vsub.f32 %v9030_v44, %v3279_v27  ;;  %v3320_v41 = vmul.f32 0.03125, %v3298_v17  ;;  %v3311_v53 = vsel %vm1160_vm1, %v3293_v18, 0.0  ;;  %v3294_v28 = vmul.f32 %v9069_v11, %v9069_v11 }
 0x974   : > { %3312 = vadd.xlane.f32.xlu1 %v3311_v53  ;;  %v3301_v12 = vpop.xlane.xlu1 %3300 }
 0x975   : > { %v3328_v8 = vadd.f32 1e-05, %v3320_v41  ;;  %v3321_v0 = vmul.f32 0.03125, %v3301_v12  ;;  %v3314_v5 = vsel %vm1160_vm1, %v3294_v28, 0.0  ;;  %v3295_v52 = vmul.f32 %v9075_v1, %v9075_v1 }
 0x976   : > { %3315 = vadd.xlane.f32.xlu0 %v3314_v5  ;;  %v3304_v24 = vpop.xlane.xlu0 %3303 }
 0x977   : > { %7484 = vrsqrt.f32 %v3328_v8  ;;  %v3329_v26 = vadd.f32 1e-05, %v3321_v0  ;;  %v3322_v58 = vmul.f32 0.03125, %v3304_v24  ;;  %v3317_v13 = vsel %vm1160_vm1, %v3295_v52, 0.0 }
 0x978   : > { %3318 = vadd.xlane.f32.xlu1 %v3317_v13  ;;  %v3307_v16 = vpop.xlane.xlu1 %3306 }
 0x979   : > { %7486 = vrsqrt.f32 %v3329_v26  ;;  %v3330_v60 = vadd.f32 1e-05, %v3322_v58  ;;  %v3323_v29 = vmul.f32 0.03125, %v3307_v16 }
 0x97b   : > { %7488 = vrsqrt.f32 %v3330_v60  ;;  %v3331_v47 = vadd.f32 1e-05, %v3323_v29 }
 0x97d   : > { %7490 = vrsqrt.f32 %v3331_v47 }
 0x981   : > { %v7485_v2 = vpop.eup %7484 }
 0x982   : > { %v3344_v21 = vmul.f32 %v7485_v2, %v9019_v50 }
 0x983   : > { %v7487_v62 = vpop.eup %7486 }
 0x984   : > { %v3345_v6 = vmul.f32 %v7487_v62, %v9028_v31  ;;  %v3356_v54 = vmul.f32 %v3355_v55, %v3344_v21  ;;  %v7286_v31 = vld [vmem:[%s8041_s4] sm:$0xff]  }
 0x985   : > { %v7489_v45 = vpop.eup %7488 }
 0x986   : > { %v3346_v23 = vmul.f32 %v7489_v45, %v9035_v3  ;;  %v3357_v39 = vmul.f32 %v3355_v55, %v3345_v6 }
 0x987   : > { %v7491_v37 = vpop.eup %7490 }
 0x988   : > { %v3347_v43 = vmul.f32 %v7491_v37, %v9042_v9  ;;  %v3397_v10 = vpack.c.bf16 %v3357_v39, %v3356_v54  ;;  %v3358_v50 = vmul.f32 %v3355_v55, %v3346_v23  ;;  %v7287_v9 = vld [vmem:[%s8041_s4 + $0x10] sm:$0xff]  }
 0x98a   : > { %7034 = vmatprep.mubr.msk.bf16.mxu0 %vm1160_vm1, %v3397_v10  ;;  %7046 = vmatprep.mubr.msk.bf16.mxu1 %vm1160_vm1, %v3397_v10  ;;  %v3359_v20 = vmul.f32 %v3355_v55, %v3347_v43 }
 0x98c   : > { %v3398_v3 = vpack.c.bf16 %v3359_v20, %v3358_v50  ;;  %v7290_v50 = vld [vmem:[%s8046_s20] sm:$0xff]   ;;  %v7291_v20 = vld [vmem:[%s8046_s20 + $0x8] sm:$0xff]  }
 0x98e   : > { %7035 = vmatmul.mubr.msk.bf16.vlgmr.msra.gmra.mrb[44].mxu0 %vm1160_vm1, %v3398_v3  ;;  %7047 = vmatmul.mubr.msk.bf16.vlgmr.msra.gmra.mrb[52].mxu1 %vm1160_vm1, %v3398_v3  ;;  %v7293_v3 = vld [vmem:[%s8046_s20 + $0x18] sm:$0xff]  }
 0x98f   : > { %7055 = vmatpush3.bf16.msra.mxu0 %v7286_v31  ;;  %7063 = vmatpush3.bf16.msra.mxu1 %v7287_v9  ;;  %v7292_v31 = vld [vmem:[%s8046_s20 + $0x10] sm:$0xff]   ;;  %s10362_s20 = sld [smem:[#allocation17_spill]] }
 0x990   : > { %7056 = vmatprep.subr.bf16.mxu0 %v7823_v14  ;;  %7064 = vmatprep.subr.bf16.mxu1 %v7823_v14 }
 0x993   : > { %7057 = vmatpush3.bf16.msra.mxu0 %v7288_v32  ;;  %7065 = vmatpush3.bf16.msra.mxu1 %v7289_v63 }
 0x994   : > { %7070 = vmatprep.subr.bf16.mxu0 %v7823_v14  ;;  %7078 = vmatprep.subr.bf16.mxu1 %v7823_v14 }
 0x9ff   : > { %v3310_v49 = vpop.xlane.xlu0 %3309 }
 0xa00   : > { %v3324_v36 = vmul.f32 0.03125, %v3310_v49 }
 0xa01   : > { %v3313_v35 = vpop.xlane.xlu1 %3312 }
 0xa02   : > { %v3332_v7 = vadd.f32 1e-05, %v3324_v36  ;;  %v3325_v19 = vmul.f32 0.03125, %v3313_v35 }
 0xa03   : > { %v3316_v46 = vpop.xlane.xlu0 %3315 }
 0xa04   : > { %7492 = vrsqrt.f32 %v3332_v7  ;;  %v3333_v38 = vadd.f32 1e-05, %v3325_v19  ;;  %v3326_v48 = vmul.f32 0.03125, %v3316_v46 }
 0xa05   : > { %v3319_v27 = vpop.xlane.xlu1 %3318 }
 0xa06   : > { %7494 = vrsqrt.f32 %v3333_v38  ;;  %v3334_v40 = vadd.f32 1e-05, %v3326_v48  ;;  %v3327_v18 = vmul.f32 0.03125, %v3319_v27 }
 0xa08   : > { %7496 = vrsqrt.f32 %v3334_v40  ;;  %v3335_v17 = vadd.f32 1e-05, %v3327_v18 }
 0xa0a   : > { %7498 = vrsqrt.f32 %v3335_v17 }
 0xa0e   : > { %v7493_v41 = vpop.eup %7492 }
 0xa0f   : > { %v3348_v53 = vmul.f32 %v7493_v41, %v9061_v57  ;;  %v1157_v57 = vld [vmem:[%s10361_s24] sm:$0xff] }
 0xa10   : > { %v7495_v28 = vpop.eup %7494 }
 0xa11   : > { %v3349_v12 = vmul.f32 %v7495_v28, %v9064_v42  ;;  %v3360_v0 = vmul.f32 %v3355_v55, %v3348_v53  ;;  %v1158_v42 = vld [vmem:[%s10361_s24 + $0x8] sm:$0xff] }
 0xa12   : > { %v7497_v8 = vpop.eup %7496 }
 0xa13   : > { %v3361_v5 = vmul.f32 %v3355_v55, %v3349_v12  ;;  %v3350_v52 = vmul.f32 %v7497_v8, %v9069_v11  ;;  %v3401_v11 = vpack.c.bf16 %v1158_v42, %v1157_v57  ;;  %v9195_v57 = vld [vmem:[%s10362_s20 + $0x1] sm:$0x1]  ;;  %v9198_v42 = vld [vmem:[%s10362_s20] sm:$0x1] }
 0xa14   : > { %v7499_v24 = vpop.eup %7498 }
 0xa15   : > { %v3399_v26 = vpack.c.bf16 %v3361_v5, %v3360_v0  ;;  %v3351_v58 = vmul.f32 %v7499_v24, %v9075_v1  ;;  %v3362_v13 = vmul.f32 %v3355_v55, %v3350_v52 }
 0xa17   : > { %7038 = vmatprep.mubr.msk.bf16.mxu0 %vm1160_vm1, %v3399_v26  ;;  %7050 = vmatprep.mubr.msk.bf16.mxu1 %vm1160_vm1, %v3399_v26  ;;  %v3363_v16 = vmul.f32 %v3355_v55, %v3351_v58 }
 0xa19   : > { %v3400_v60 = vpack.c.bf16 %v3363_v16, %v3362_v13 }
 0xa1b   : > { %7039 = vmatmul.mubr.msk.bf16.gmra.mrb[48].mxu0 %vm1160_vm1, %v3400_v60  ;;  %7051 = vmatmul.mubr.msk.bf16.gmra.mrb[56].mxu1 %vm1160_vm1, %v3400_v60 }
 0xa1c   : > { %7058 = vmatprep.mubr.msk.bf16.mxu0 %vm7824_vm4, %v7823_v14  ;;  %7066 = vmatprep.mubr.msk.bf16.mxu1 %vm7824_vm4, %v7823_v14 }
 0xa23   : > { %7059 = vmatmul.mubr.msk.bf16.vlgmr.msra.gmra.mrb[52].mxu0 %vm1160_vm1, %v3401_v11  ;;  %7067 = vmatmul.mubr.msk.bf16.vlgmr.msra.gmra.mrb[60].mxu1 %vm1160_vm1, %v3401_v11 }
 0xa24   : > { %7074 = vmatprep.mubr.msk.bf16.mxu0 %vm7824_vm4, %v7823_v14  ;;  %7082 = vmatprep.mubr.msk.bf16.mxu1 %vm7824_vm4, %v7823_v14 }
 0xa25   : > { %7071 = vmatpush3.bf16.msra.mxu0 %v7290_v50  ;;  %7079 = vmatpush3.bf16.msra.mxu1 %v7292_v31 }
 0xa26   : > { %7072 = vmatprep.subr.bf16.mxu0 %v7823_v14  ;;  %7080 = vmatprep.subr.bf16.mxu1 %v7823_v14 }
 0xa29   : > { %7073 = vmatpush3.bf16.msra.mxu0 %v7291_v20  ;;  %7081 = vmatpush3.bf16.msra.mxu1 %v7293_v3 }
 0xa2c   : > { %7075 = vmatmul.mubr.msk.bf16.vlgmr.msra.gmra.mrb[56].mxu0 %vm1160_vm1, %v3401_v11  ;;  %7083 = vmatmul.mubr.msk.bf16.vlgmr.msra.gmra.mrb[64].mxu1 %vm1160_vm1, %v3401_v11 }
 0xa61   : > { %v9124_v1 = vpop.f32.mrb[44].mxu0  ;;  %v9126_v29 = vpop.f32.mrb[52].mxu1 }
 0xa62   : > { %v9128_v47 = vpop.f32.mrb[45].mxu0  ;;  %v9130_v2 = vpop.f32.mrb[53].mxu1  ;;  %v3785_v0 = vmul.f32 %v9124_v1, %v9124_v1  ;;  %v3793_v11 = vmul.f32 %v9126_v29, %v9126_v29 }
 0xa63   : > { %v3783_v21 = vmul.f32 %v9128_v47, %v9128_v47  ;;  %v9134_v33 = vpop.f32.mrb[46].mxu0  ;;  %v9136_v55 = vpop.f32.mrb[54].mxu1  ;;  %v3791_v45 = vmul.f32 %v9130_v2, %v9130_v2 }
 0xa64   : > { %v9138_v62 = vpop.f32.mrb[47].mxu0  ;;  %v9140_v6 = vpop.f32.mrb[55].mxu1  ;;  %v3786_v5 = vmul.f32 %v9134_v33, %v9134_v33  ;;  %v3829_v20 = vsel %vm1805_vm2, %v3793_v11, 0.0 }
 0xa65   : > { %v3784_v23 = vmul.f32 %v9138_v62, %v9138_v62  ;;  %v3799_v54 = vsel %vm1805_vm2, %v3783_v21, 0.0  ;;  %v3792_v39 = vmul.f32 %v9140_v6, %v9140_v6  ;;  %v3823_v43 = vsel %vm1805_vm2, %v3791_v45, 0.0 }
 0xa66   : > { %3800 = vadd.xlane.f32.xlu0 %v3799_v54  ;;  %v3794_v21 = vmul.f32 %v9136_v55, %v9136_v55  ;;  %v3808_v45 = vsel %vm1805_vm2, %v3786_v5, 0.0  ;;  %v3396_v54 = vld [vmem:[%s10363_s29] sm:$0x3] }
 0xa67   : > { %v3802_v37 = vsel %vm1805_vm2, %v3784_v23, 0.0  ;;  %v3826_v10 = vsel %vm1805_vm2, %v3792_v39, 0.0  ;;  %v3805_v23 = vsel %vm1805_vm2, %v3785_v0, 0.0  ;;  %v3952_v39 = vmul.f32 %v9195_v57, %v9195_v57 }
 0xa68   : > { %3803 = vadd.xlane.f32.xlu1 %v3802_v37  ;;  %v3951_v37 = vmul.f32 %v9198_v42, %v9198_v42  ;;  %v3832_v50 = vsel %vm1805_vm2, %v3794_v21, 0.0 }
 0xa6a   : > { %3824 = vadd.xlane.f32.xlu0 %v3823_v43 }
 0xa6c   : > { %3827 = vadd.xlane.f32.xlu1 %v3826_v10  ;;  %v9216_v10 = vrot.slane %v3396_v54, %v8170_v25 }
 0xaee   : > { %v9160_v9 = vpop.f32.mrb[48].mxu0  ;;  %v9162_v32 = vpop.f32.mrb[56].mxu1 }
 0xaef   : > { %v9164_v63 = vpop.f32.mrb[49].mxu0  ;;  %v9166_v49 = vpop.f32.mrb[57].mxu1 }
 0xaf0   : > { %v9168_v36 = vpop.f32.mrb[50].mxu0  ;;  %v9170_v35 = vpop.f32.mrb[58].mxu1 }
 0xaf1   : > { %v9172_v7 = vpop.f32.mrb[51].mxu0  ;;  %v9174_v14 = vpop.f32.mrb[59].mxu1 }
 0xaf3   : > { %v3801_v19 = vpop.xlane.xlu0 %3800 }
 0xaf4   : > { %v3847_v46 = vmax.f32 %v3801_v19, 1e-24  ;;  %v3956_v19 = vsel %vm2056_vm3, %v3952_v39, 0.0 }
 0xaf5   : > { %v3804_v38 = vpop.xlane.xlu1 %3803 }
 0xaf6   : > { %7500 = vrsqrt.f32 %v3847_v46  ;;  %v3848_v48 = vmax.f32 %v3804_v38, 1e-24  ;;  %v9176_v27 = vpop.f32.mrb[52].mxu0  ;;  %v9178_v40 = vpop.f32.mrb[60].mxu1  ;;  %v3953_v46 = vsel %vm2056_vm3, %v3951_v37, 0.0  ;;  %v9245_v37 = vrot.slane %v3396_v54, %v8365_v61 }
 0xaf7   : > { %v3915_v18 = vmul.f32 %v9176_v27, %v9176_v27  ;;  %v3917_v17 = vmul.f32 %v9178_v40, %v9178_v40  ;;  %v3825_v41 = vpop.xlane.xlu0 %3824  ;;  %v7060_v53 = vpop.f32.mrb[53].mxu0 }
 0xaf8   : > { %7502 = vrsqrt.f32 %v3848_v48  ;;  %v3855_v28 = vmax.f32 %v3825_v41, 1e-24  ;;  %v9184_v12 = vpop.f32.mrb[54].mxu0  ;;  %v7068_v8 = vpop.f32.mrb[61].mxu1 }
 0xaf9   : > { %v7061_v52 = vpop.f32.mrb[55].mxu0  ;;  %v3828_v24 = vpop.xlane.xlu1 %3827  ;;  %v3925_v26 = vsel %vm1805_vm2, %v3917_v17, 0.0  ;;  %v3919_v58 = vsel %vm1805_vm2, %v3915_v18, 0.0 }
 0xafa   : > { %7504 = vrsqrt.f32 %v3855_v28  ;;  %v3856_v13 = vmax.f32 %v3828_v24, 1e-24  ;;  %3926 = vadd.xlane.f32.xlu1 %v3925_v26  ;;  %v9192_v16 = vpop.f32.mrb[62].mxu1  ;;  %3920 = vadd.xlane.f32.xlu0 %v3919_v58 }
 0xafb   : > { %v7069_v60 = vpop.f32.mrb[63].mxu1 }
 0xafc   : > { %7506 = vrsqrt.f32 %v3856_v13 }
 0xafe   : > { %3809 = vadd.xlane.f32.xlu1 %v3808_v45  ;;  %3806 = vadd.xlane.f32.xlu0 %v3805_v23 }
 0xb00   : > { %v7501_v43 = vpop.eup %7500 }
 0xb01   : > { %v3879_v31 = vmul.f32 %v7501_v43, %v9128_v47 }
 0xb02   : > { %v7503_v3 = vpop.eup %7502  ;;  %3833 = vadd.xlane.f32.xlu1 %v3832_v50  ;;  %3830 = vadd.xlane.f32.xlu0 %v3829_v20 }
 0xb03   : > { %v3880_v38 = vmul.f32 %v7503_v3, %v9138_v62  ;;  %v9225_v18 = vmul.f32 %v9216_v10, %v3879_v31 }
 0xb04   : > { %v7505_v48 = vpop.eup %7504 }
 0xb05   : > { %v9228_v17 = vmul.f32 %v9216_v10, %v3880_v38  ;;  %v3887_v41 = vmul.f32 %v7505_v48, %v9130_v2 }
 0xb06   : > { %v7507_v53 = vpop.eup %7506  ;;  %3957 = vadd.xlane.f32.xlu1 %v3956_v19  ;;  %3954 = vadd.xlane.f32.xlu0 %v3953_v46  ;;  %v3972_v46 = vrot.slane %v3396_v54, %v8403_v51 }
 0xb07   : > { %v3984_v47 = vpack.c.bf16 %v9228_v17, %v9225_v18  ;;  %v3888_v28 = vmul.f32 %v7507_v53, %v9140_v6  ;;  %v9236_v62 = vmul.f32 %v9216_v10, %v3887_v41 }
 0xb09   : > { %7088 = vmatprep.mubr.msk.bf16.mxu0 %vm1805_vm2, %v3984_v47  ;;  %v9239_v8 = vmul.f32 %v9216_v10, %v3888_v28 }
 0xb0b   : > { %v3986_v0 = vpack.c.bf16 %v9239_v8, %v9236_v62 }
 0xb0d   : > { %7094 = vmatprep.mubr.msk.bf16.mxu1 %vm1805_vm2, %v3986_v0 }
 0xb87   : > { %v3921_v2 = vpop.xlane.xlu0 %3920  ;;  %v3927_v5 = vpop.xlane.xlu1 %3926 }
 0xb88   : > { %v3931_v52 = vmax.f32 %v3921_v2, 1e-24  ;;  %v3933_v24 = vmax.f32 %v3927_v5, 1e-24  ;;  %v3973_v2 = vcombine.high %v3972_v46, %v3972_v46 }
 0xb8a   : > { %7508 = vrsqrt.f32 %v3931_v52 }
 0xb8b   : > { %7510 = vrsqrt.f32 %v3933_v24  ;;  %v3807_v6 = vpop.xlane.xlu0 %3806  ;;  %v3810_v26 = vpop.xlane.xlu1 %3809 }
 0xb8c   : > { %v3849_v58 = vmax.f32 %v3807_v6, 1e-24  ;;  %v3850_v13 = vmax.f32 %v3810_v26, 1e-24  ;;  %v3980_v26 = vrot.slane %v3973_v2, %v8403_v51 }
 0xb8e   : > { %7512 = vrsqrt.f32 %v3849_v58 }
 0xb8f   : > { %7514 = vrsqrt.f32 %v3850_v13  ;;  %v3831_v60 = vpop.xlane.xlu0 %3830  ;;  %v3834_v11 = vpop.xlane.xlu1 %3833 }
 0xb90   : > { %v3857_v21 = vmax.f32 %v3831_v60, 1e-24  ;;  %v3858_v45 = vmax.f32 %v3834_v11, 1e-24 }
 0xb92   : > { %7516 = vrsqrt.f32 %v3857_v21 }
 0xb93   : > { %7518 = vrsqrt.f32 %v3858_v45  ;;  %v3955_v23 = vpop.xlane.xlu0 %3954  ;;  %v3958_v39 = vpop.xlane.xlu1 %3957 }
 0xb94   : > { %v7509_v43 = vpop.eup %7508  ;;  %v3959_v50 = vmax.f32 %v3955_v23, 1e-24  ;;  %v3960_v20 = vmax.f32 %v3958_v39, 1e-24 }
 0xb95   : > { %v7511_v31 = vpop.eup %7510  ;;  %v3939_v3 = vmul.f32 %v7509_v43, %v9176_v27 }
 0xb96   : > { %7520 = vrsqrt.f32 %v3959_v50  ;;  %v3941_v19 = vmul.f32 %v7511_v31, %v9178_v40 }
 0xb97   : > { %7522 = vrsqrt.f32 %v3960_v20  ;;  %v3947_v38 = vmul.f32 %v9245_v37, %v3939_v3 }
 0xb98   : > { %v7513_v48 = vpop.eup %7512  ;;  %v3949_v41 = vmul.f32 %v9245_v37, %v3941_v19 }
 0xb99   : > { %v7515_v53 = vpop.eup %7514  ;;  %v3881_v61 = vmul.f32 %v7513_v48, %v9124_v1  ;;  %v3988_v47 = vpack.c.bf16 %v3947_v38, %v3947_v38 }
 0xb9a   : > { %v3882_v28 = vmul.f32 %v7515_v53, %v9134_v33  ;;  %v3989_v0 = vpack.c.bf16 %v3949_v41, %v3949_v41  ;;  %v3723_v41 = vpop.f32.mrb[56].mxu0  ;;  %v3776_v53 = vpop.f32.mrb[64].mxu1 }
 0xb9b   : > { %7214 = vmatprep.subr.msk.bf16.mxu0 %vm1805_vm2, %v3988_v47  ;;  %v3997_v27 = vsel %vm1805_vm2, %v3988_v47, 0  ;;  %v3901_v40 = vmul.f32 %v9216_v10, %v3881_v61  ;;  %v4291_v61 = vpack.c.bf16 %v3723_v41, %v3723_v41  ;;  %v7076_v47 = vpop.f32.mrb[57].mxu0  ;;  %v3795_v41 = vmul.f32 %v9166_v49, %v9166_v49 }
 0xb9c   : > { %v7517_v54 = vpop.eup %7516  ;;  %7215 = vmatprep.subr.msk.bf16.mxu1 %vm1805_vm2, %v3989_v0  ;;  %7087 = vmatpush3.bf16.xpose.msra.mxu0 %v3997_v27  ;;  %v4055_v5 = vsel %vm1805_vm2, %v3989_v0, 0  ;;  %v3902_v52 = vmul.f32 %v9216_v10, %v3882_v28  ;;  %v4292_v28 = vpack.c.bf16 %v3776_v53, %v3776_v53  ;;  %v7084_v0 = vpop.f32.mrb[65].mxu1 }
 0xb9d   : > { %v7519_v1 = vpop.eup %7518  ;;  %v3889_v24 = vmul.f32 %v7517_v54, %v9126_v29  ;;  %7093 = vmatpush3.bf16.xpose.msra.mxu1 %v4055_v5  ;;  %v9295_v2 = vpop.f32.mrb[58].mxu0  ;;  %7216 = vmatprep.subr.msk.bf16.mxu0 %vm4319_vm5, %v4291_v61 }
 0xb9e   : > { %v3890_v33 = vmul.f32 %v7519_v1, %v9136_v55  ;;  %v3985_v6 = vpack.c.bf16 %v3902_v52, %v3901_v40  ;;  %v9297_v27 = vpop.f32.mrb[66].mxu1  ;;  %v7077_v54 = vpop.f32.mrb[59].mxu0  ;;  %v4379_v5 = vsel %vm4319_vm5, %v4292_v28, 0  ;;  %7217 = vmatprep.subr.msk.bf16.mxu1 %vm4319_vm5, %v4292_v28  ;;  %v3835_v28 = vsel %vm1805_vm2, %v3795_v41, 0.0 }
 0xb9f   : > { %v3909_v58 = vmul.f32 %v9216_v10, %v3889_v24  ;;  %v9357_v54 = vld [vmem:[%s10364_s3 + $0x8] sm:$0xff]  }
 0xba0   : > { %v7521_v13 = vpop.eup %7520  ;;  %v3910_v60 = vmul.f32 %v9216_v10, %v3890_v33 }
 0xba1   : > { %v7523_v11 = vpop.eup %7522  ;;  %v3963_v21 = vmul.f32 %v7521_v13, %v9198_v42 }
 0xba2   : > { %v3964_v45 = vmul.f32 %v7523_v11, %v9195_v57  ;;  %v3987_v23 = vpack.c.bf16 %v3910_v60, %v3909_v58 }
 0xba3   : > { %v3982_v39 = vmul.f32 %v3980_v26, %v3963_v21  ;;  %7089 = vmatmul.mubr.msk.bf16.vlgmr.msra.gmra.mrb[60].mxu0 %vm1805_vm2, %v3985_v6 }
 0xba4   : > { %v3983_v29 = vmul.f32 %v3980_v26, %v3964_v45  ;;  %7095 = vmatmul.mubr.msk.bf16.vlgmr.msra.gmra.mrb[68].mxu1 %vm1805_vm2, %v3987_v23 }
 0xba5   : > { %v9270_v55 = vrot.slane %v3982_v39, %v8170_v25  ;;  %7105 = vmatpush3.bf16.msra.mxu1 %v4379_v5 }
 0xba6   : > { %v9273_v51 = vrot.slane %v3983_v29, %v8170_v25  ;;  %7116 = vmatprep.subr.bf16.mxu1 %v9357_v54 }
 0xba7   : > { %v4126_v43 = vmul.f32 %v9270_v55, %v9225_v18  ;;  %v4127_v42 = vmul.f32 %v9270_v55, %v9228_v17  ;;  %v4129_v18 = vmul.f32 %v9270_v55, %v3902_v52  ;;  %v4128_v17 = vmul.f32 %v9270_v55, %v3901_v40  ;;  %v7085_v52 = vpop.f32.mrb[67].mxu1 }
 0xba8   : > { %v4131_v20 = vmul.f32 %v9273_v51, %v9239_v8  ;;  %v4130_v31 = vmul.f32 %v9273_v51, %v9236_v62  ;;  %v4133_v8 = vmul.f32 %v9273_v51, %v3910_v60  ;;  %v4132_v62 = vmul.f32 %v9273_v51, %v3909_v58 }
 0xba9   : > { %v4134_v57 = vsel %vm1805_vm2, %v4126_v43, 0.0  ;;  %v4137_v50 = vsel %vm1805_vm2, %v4127_v42, 0.0  ;;  %v4143_v19 = vsel %vm1805_vm2, %v4129_v18, 0.0  ;;  %v4140_v46 = vsel %vm1805_vm2, %v4128_v17, 0.0 }
 0xbaa   : > { %4135 = vadd.xlane.f32.xlu0 %v4134_v57  ;;  %4138 = vadd.xlane.f32.xlu1 %v4137_v50  ;;  %v4149_v25 = vsel %vm1805_vm2, %v4131_v20, 0.0  ;;  %v4146_v3 = vsel %vm1805_vm2, %v4130_v31, 0.0  ;;  %v4155_v38 = vsel %vm1805_vm2, %v4133_v8, 0.0  ;;  %v4152_v48 = vsel %vm1805_vm2, %v4132_v62, 0.0 }
 0xbab   : > { %v4321_v40 = vsel %vm4319_vm5, %v4291_v61, 0  ;;  %v3916_v18 = vmul.f32 %v9184_v12, %v9184_v12  ;;  %v3787_v8 = vmul.f32 %v9164_v63, %v9164_v63  ;;  %v3796_v61 = vmul.f32 %v9174_v14, %v9174_v14 }
 0xbac   : > { %7099 = vmatpush3.bf16.msra.mxu0 %v4321_v40  ;;  %v9354_v40 = vld [vmem:[%s10364_s3] sm:$0xff]  }
 0xbad   : > { %v3922_v62 = vsel %vm1805_vm2, %v3916_v18, 0.0  ;;  %v3811_v53 = vsel %vm1805_vm2, %v3787_v8, 0.0  ;;  %v3838_v0 = vsel %vm1805_vm2, %v3796_v61, 0.0  ;;  %7110 = vmatprep.subr.bf16.mxu0 %v9354_v40 }
 0xbae   : > { %4150 = vadd.xlane.f32.xlu1 %v4149_v25  ;;  %4147 = vadd.xlane.f32.xlu0 %v4146_v3 }
 0xbb2   : > { %4144 = vadd.xlane.f32.xlu1 %v4143_v19  ;;  %4141 = vadd.xlane.f32.xlu0 %v4140_v46  ;;  %v3918_v19 = vmul.f32 %v9192_v16, %v9192_v16 }
 0xbb6   : > { %4156 = vadd.xlane.f32.xlu1 %v4155_v38  ;;  %4153 = vadd.xlane.f32.xlu0 %v4152_v48  ;;  %v3788_v38 = vmul.f32 %v9172_v7, %v9172_v7  ;;  %v3928_v48 = vsel %vm1805_vm2, %v3918_v19, 0.0 }
 0xbb8   : > { %v3814_v47 = vsel %vm1805_vm2, %v3788_v38, 0.0 }
 0xc37   : > { %v4136_v5 = vpop.xlane.xlu0 %4135  ;;  %v4139_v52 = vpop.xlane.xlu1 %4138 }
 0xc38   : > { %v9375_v18 = vmul.f32 8.0, %v4136_v5  ;;  %v9377_v19 = vmul.f32 8.0, %v4139_v52 }
 0xc76   : > { %v7090_v1 = vpop.f32.mrb[60].mxu0 }
 0xc77   : > { %v9303_v24 = vmul.f32 8.0, %v7090_v1  ;;  %v7096_v33 = vpop.f32.mrb[68].mxu1  ;;  %v4033_v6 = vpop.f32.mrb[61].mxu0 }
 0xc78   : > { %v4091_v26 = vpop.f32.mrb[69].mxu1  ;;  %v7091_v58 = vpop.f32.mrb[62].mxu0  ;;  %v9305_v13 = vmul.f32 8.0, %v4033_v6  ;;  %v9323_v20 = vmul.f32 8.0, %v7096_v33 }
 0xc79   : > { %v9307_v60 = vmul.f32 8.0, %v7091_v58  ;;  %v7097_v11 = vpop.f32.mrb[70].mxu1  ;;  %v4036_v21 = vpop.f32.mrb[63].mxu0  ;;  %v4173_v45 = vsel %vm4166_vm6, %v9303_v24, -inf  ;;  %v9315_v43 = vmul.f32 8.0, %v4091_v26 }
 0xc7a   : > { %v4094_v23 = vpop.f32.mrb[71].mxu1  ;;  %4174 = vmax.xlane.f32.xlu0 %v4173_v45  ;;  %v9311_v39 = vmul.f32 8.0, %v4036_v21  ;;  %v4167_v42 = vsel %vm4166_vm6, %v9305_v13, -inf  ;;  %v9327_v25 = vmul.f32 8.0, %v7097_v11  ;;  %v4185_v17 = vsel %vm4166_vm6, %v9323_v20, -inf  ;;  %v4148_v1 = vpop.xlane.xlu0 %4147 }
 0xc7b   : > { %v4176_v29 = vsel %vm4166_vm6, %v9307_v60, -inf  ;;  %v9319_v57 = vmul.f32 8.0, %v4094_v23  ;;  %v4179_v31 = vsel %vm4166_vm6, %v9315_v43, -inf  ;;  %v4151_v33 = vpop.xlane.xlu1 %4150 }
 0xc7c   : > { %4177 = vmax.xlane.f32.xlu1 %v4176_v29  ;;  %v4170_v50 = vsel %vm4166_vm6, %v9311_v39, -inf  ;;  %v4188_v46 = vsel %vm4166_vm6, %v9327_v25, -inf  ;;  %v9402_v52 = vmul.f32 8.0, %v4151_v33 }
 0xc7d   : > { %v4182_v3 = vsel %vm4166_vm6, %v9319_v57, -inf }
 0xc7e   : > { %4168 = vmax.xlane.f32.xlu0 %v4167_v42  ;;  %v4142_v6 = vpop.xlane.xlu0 %4141 }
 0xc7f   : > { %v4145_v26 = vpop.xlane.xlu1 %4144  ;;  %v9361_v21 = vmul.f32 8.0, %v4142_v6 }
 0xc80   : > { %4171 = vmax.xlane.f32.xlu1 %v4170_v50  ;;  %v9363_v23 = vmul.f32 8.0, %v4145_v26 }
 0xc82   : > { %4180 = vmax.xlane.f32.xlu0 %v4179_v31  ;;  %v4154_v58 = vpop.xlane.xlu0 %4153 }
 0xc83   : > { %v4157_v11 = vpop.xlane.xlu1 %4156  ;;  %v9404_v26 = vmul.f32 8.0, %v4154_v58 }
 0xc84   : > { %4183 = vmax.xlane.f32.xlu1 %v4182_v3 }
 0xc86   : > { %4186 = vmax.xlane.f32.xlu0 %v4185_v17 }
 0xc88   : > { %4189 = vmax.xlane.f32.xlu1 %v4188_v46 }
 0xc8a   : > { %3923 = vadd.xlane.f32.xlu0 %v3922_v62 }
 0xc8c   : > { %3929 = vadd.xlane.f32.xlu1 %v3928_v48  ;;  %v9386_v48 = vmul.f32 8.0, %v4148_v1 }
 0xc8e   : > { %3812 = vadd.xlane.f32.xlu0 %v3811_v53 }
 0xc90   : > { %3815 = vadd.xlane.f32.xlu1 %v3814_v47 }
 0xc92   : > { %3836 = vadd.xlane.f32.xlu0 %v3835_v28 }
 0xc94   : > { %3839 = vadd.xlane.f32.xlu1 %v3838_v0 }
 0xd07   : > { %v4175_v45 = vpop.xlane.xlu0 %4174 }
 0xd08   : > { %v9366_v29 = vmax.f32 %v4175_v45, %v9361_v21 }
 0xd09   : > { %v4178_v42 = vpop.xlane.xlu1 %4177 }
 0xd0a   : > { %v4201_v50 = vsub.f32 %v9303_v24, %v9366_v29  ;;  %v9373_v3 = vmax.f32 %v4178_v42, %v9363_v23 }
 0xd0b   : > { %v4169_v17 = vpop.xlane.xlu0 %4168 }
 0xd0c   : > { %v4211_v46 = vmul.f32 1.442695, %v4201_v50  ;;  %v4202_v8 = vsub.f32 %v9307_v60, %v9373_v3  ;;  %v9384_v24 = vmax.f32 %v4169_v17, %v9375_v18  ;;  %v9413_v17 = vmul.f32 8.0, %v4157_v11 }
 0xd0d   : > { %v4172_v38 = vpop.xlane.xlu1 %4171 }
 0xd0e   : > { %7524 = vpow2.f32 %v4211_v46  ;;  %v4213_v41 = vmul.f32 1.442695, %v4202_v8  ;;  %v9389_v53 = vmax.f32 %v4172_v38, %v9377_v19  ;;  %v4199_v61 = vsub.f32 %v9305_v13, %v9384_v24 }
 0xd0f   : > { %v4181_v47 = vpop.xlane.xlu0 %4180 }
 0xd10   : > { %7526 = vpow2.f32 %v4213_v41  ;;  %v4200_v28 = vsub.f32 %v9311_v39, %v9389_v53  ;;  %v9400_v5 = vmax.f32 %v4181_v47, %v9386_v48  ;;  %v4207_v1 = vmul.f32 1.442695, %v4199_v61 }
 0xd11   : > { %v4184_v6 = vpop.xlane.xlu1 %4183 }
 0xd12   : > { %v4209_v13 = vmul.f32 1.442695, %v4200_v28  ;;  %v4203_v45 = vsub.f32 %v9315_v43, %v9400_v5  ;;  %v9411_v39 = vmax.f32 %v4184_v6, %v9402_v52  ;;  %7528 = vpow2.f32 %v4207_v1 }
 0xd13   : > { %v4187_v50 = vpop.xlane.xlu0 %4186 }
 0xd14   : > { %v4215_v33 = vmul.f32 1.442695, %v4203_v45  ;;  %v9416_v46 = vmax.f32 %v4187_v50, %v9404_v26  ;;  %7530 = vpow2.f32 %v4209_v13  ;;  %v4204_v58 = vsub.f32 %v9319_v57, %v9411_v39 }
 0xd15   : > { %v4190_v8 = vpop.xlane.xlu1 %4189 }
 0xd16   : > { %v4205_v38 = vsub.f32 %v9323_v20, %v9416_v46  ;;  %v4229_v11 = vsub.f32 %v9404_v26, %v9416_v46  ;;  %v9427_v41 = vmax.f32 %v4190_v8, %v9413_v17  ;;  %v4217_v61 = vmul.f32 1.442695, %v4204_v58 }
 0xd17   : > { %v3924_v47 = vpop.xlane.xlu0 %3923  ;;  %7532 = vpow2.f32 %v4215_v33 }
 0xd18   : > { %v7525_v28 = vpop.eup %7524  ;;  %v4219_v1 = vmul.f32 1.442695, %v4205_v38  ;;  %v4206_v57 = vsub.f32 %v9327_v25, %v9427_v41  ;;  %7534 = vpow2.f32 %v4217_v61  ;;  %v4230_v6 = vsub.f32 %v9413_v17, %v9427_v41 }
 0xd19   : > { %v3930_v13 = vpop.xlane.xlu1 %3929  ;;  %v4253_v20 = vsel %vm4166_vm6, %v7525_v28, 0.0  ;;  %v3932_v8 = vmax.f32 %v3924_v47, 1e-24 }
 0xd1a   : > { %v7527_v45 = vpop.eup %7526  ;;  %v4221_v50 = vmul.f32 1.442695, %v4206_v57  ;;  %4254 = vadd.xlane.f32.xlu0 %v4253_v20  ;;  %7536 = vpow2.f32 %v4219_v1  ;;  %v3934_v33 = vmax.f32 %v3930_v13, 1e-24 }
 0xd1b   : > { %v3813_v58 = vpop.xlane.xlu0 %3812  ;;  %v4256_v43 = vsel %vm4166_vm6, %v7527_v45, 0.0  ;;  %v4288_v1 = vpack.c.bf16 %v7527_v45, %v7525_v28 }
 0xd1c   : > { %4257 = vadd.xlane.f32.xlu1 %v4256_v43  ;;  %7538 = vpow2.f32 %v4221_v50  ;;  %v3851_v38 = vmax.f32 %v3813_v58, 1e-24  ;;  %v7529_v61 = vpop.eup %7528 }
 0xd1d   : > { %v3816_v25 = vpop.xlane.xlu1 %3815  ;;  %7540 = vrsqrt.f32 %v3932_v8 }
 0xd1e   : > { %v3852_v42 = vmax.f32 %v3816_v25, 1e-24  ;;  %v7531_v0 = vpop.eup %7530  ;;  %7542 = vrsqrt.f32 %v3934_v33 }
 0xd1f   : > { %v3837_v62 = vpop.xlane.xlu0 %3836  ;;  %v4287_v31 = vpack.c.bf16 %v7531_v0, %v7529_v61  ;;  %7544 = vrsqrt.f32 %v3851_v38 }
 0xd20   : > { %v3859_v60 = vmax.f32 %v3837_v62, 1e-24  ;;  %7546 = vrsqrt.f32 %v3852_v42 }
 0xd21   : > { %v3840_v57 = vpop.xlane.xlu1 %3839  ;;  %v7533_v47 = vpop.eup %7532  ;;  %7100 = vmatprep.mubr.msk.bf16.mxu0 %vm4166_vm6, %v4287_v31 }
 0xd22   : > { %v3860_v13 = vmax.f32 %v3840_v57, 1e-24  ;;  %v7535_v43 = vpop.eup %7534  ;;  %7548 = vrsqrt.f32 %v3859_v60  ;;  %7101 = vmatmul.mubr.msk.bf16.vlgmr.msra.gmra.mrb[64].mxu0 %vm4166_vm6, %v4288_v1  ;;  %v4247_v60 = vsel %vm4166_vm6, %v7529_v61, 0.0  ;;  %v4250_v1 = vsel %vm4166_vm6, %v7531_v0, 0.0 }
 0xd23   : > { %v4289_v20 = vpack.c.bf16 %v7535_v43, %v7533_v47  ;;  %7111 = vmatpush3.bf16.msra.mxu0 %v9354_v40  ;;  %v3790_v0 = vmul.f32 %v9168_v36, %v9168_v36 }
 0xd24   : > { %7550 = vrsqrt.f32 %v3860_v13  ;;  %v7537_v50 = vpop.eup %7536 }
 0xd25   : > { %7106 = vmatprep.mubr.msk.bf16.mxu1 %vm4166_vm6, %v4289_v20  ;;  %v4265_v62 = vsel %vm4166_vm6, %v7537_v50, 0.0 }
 0xd26   : > { %v7539_v8 = vpop.eup %7538  ;;  %4266 = vadd.xlane.f32.xlu0 %v4265_v62  ;;  %v3789_v62 = vmul.f32 %v9160_v9, %v9160_v9 }
 0xd27   : > { %v4268_v42 = vsel %vm4166_vm6, %v7539_v8, 0.0  ;;  %v4290_v28 = vpack.c.bf16 %v7539_v8, %v7537_v50  ;;  %v7541_v31 = vpop.eup %7540 }
 0xd28   : > { %4269 = vadd.xlane.f32.xlu1 %v4268_v42  ;;  %v7543_v45 = vpop.eup %7542  ;;  %v3940_v58 = vmul.f32 %v7541_v31, %v9184_v12 }
 0xd29   : > { %7107 = vmatmul.mubr.msk.bf16.vlgmr.msra.gmra.mrb[72].mxu1 %vm4166_vm6, %v4290_v28  ;;  %v7545_v33 = vpop.eup %7544  ;;  %v3942_v38 = vmul.f32 %v7543_v45, %v9192_v16  ;;  %v4259_v16 = vsel %vm4166_vm6, %v7533_v47, 0.0  ;;  %v4262_v47 = vsel %vm4166_vm6, %v7535_v43, 0.0  ;;  %v3797_v45 = vmul.f32 %v9162_v32, %v9162_v32 }
 0xd2a   : > { %4248 = vadd.xlane.f32.xlu0 %v4247_v60  ;;  %7117 = vmatpush3.bf16.msra.mxu1 %v9357_v54  ;;  %v7547_v25 = vpop.eup %7546  ;;  %v3948_v57 = vmul.f32 %v9245_v37, %v3940_v58  ;;  %v3883_v13 = vmul.f32 %v7545_v33, %v9164_v63  ;;  %v3817_v60 = vsel %vm1805_vm2, %v3789_v62, 0.0  ;;  %v3798_v58 = vmul.f32 %v9170_v35, %v9170_v35 }
 0xd2b   : > { %v3950_v50 = vmul.f32 %v9245_v37, %v3942_v38  ;;  %v3884_v61 = vmul.f32 %v7547_v25, %v9172_v7  ;;  %v3820_v33 = vsel %vm1805_vm2, %v3790_v0, 0.0  ;;  %v3841_v38 = vsel %vm1805_vm2, %v3797_v45, 0.0 }
 0xd2c   : > { %v7549_v20 = vpop.eup %7548  ;;  %4251 = vadd.xlane.f32.xlu1 %v4250_v1  ;;  %v9453_v8 = vpack.c.bf16 %v3948_v57, %v3948_v57  ;;  %v9460_v63 = vmul.f32 %v9216_v10, %v3883_v13  ;;  %v3844_v57 = vsel %vm1805_vm2, %v3798_v58, 0.0 }
 0xd2d   : > { %v3891_v42 = vmul.f32 %v7549_v20, %v9166_v49  ;;  %v9457_v28 = vpack.c.bf16 %v3950_v50, %v3950_v50  ;;  %v9463_v37 = vmul.f32 %v9216_v10, %v3884_v61 }
 0xd2e   : > { %v7551_v12 = vpop.eup %7550  ;;  %4260 = vadd.xlane.f32.xlu0 %v4259_v16  ;;  %7218 = vmatprep.subr.msk.bf16.mxu0 %vm1805_vm2, %v9453_v8  ;;  %v4706_v25 = vmul.f32 %v9270_v55, %v9460_v63  ;;  %v4243_v16 = vmul.f32 1.442695, %v4229_v11 }
 0xd2f   : > { %v3892_v7 = vmul.f32 %v7551_v12, %v9174_v14  ;;  %7219 = vmatprep.subr.msk.bf16.mxu1 %vm1805_vm2, %v9457_v28  ;;  %v9474_v49 = vmul.f32 %v9216_v10, %v3891_v42  ;;  %v4576_v14 = vpack.c.bf16 %v9463_v37, %v9460_v63  ;;  %v4707_v1 = vmul.f32 %v9270_v55, %v9463_v37 }
 0xd30   : > { %4263 = vadd.xlane.f32.xlu1 %v4262_v47  ;;  %v4714_v13 = vsel %vm1805_vm2, %v4706_v25, 0.0  ;;  %v4245_v42 = vmul.f32 1.442695, %v4230_v6  ;;  %7552 = vpow2.f32 %v4243_v16 }
 0xd31   : > { %v9477_v31 = vmul.f32 %v9216_v10, %v3892_v7  ;;  %v4710_v20 = vmul.f32 %v9273_v51, %v9474_v49  ;;  %v4717_v50 = vsel %vm1805_vm2, %v4707_v1, 0.0 }
 0xd32   : > { %3818 = vadd.xlane.f32.xlu0 %v3817_v60  ;;  %7554 = vpow2.f32 %v4245_v42 }
 0xd33   : > { %v4578_v43 = vpack.c.bf16 %v9477_v31, %v9474_v49  ;;  %v4711_v61 = vmul.f32 %v9273_v51, %v9477_v31  ;;  %v4726_v12 = vsel %vm1805_vm2, %v4710_v20, 0.0 }
 0xd34   : > { %3821 = vadd.xlane.f32.xlu1 %v3820_v33 }
 0xd35   : > { %v4729_v62 = vsel %vm1805_vm2, %v4711_v61, 0.0 }
 0xd36   : > { %3842 = vadd.xlane.f32.xlu0 %v3841_v38 }
 0xd38   : > { %3845 = vadd.xlane.f32.xlu1 %v3844_v57 }
 0xd3a   : > { %4715 = vadd.xlane.f32.xlu0 %v4714_v13  ;;  %v9513_v47 = vpop.eup %7552 }
 0xd3c   : > { %4718 = vadd.xlane.f32.xlu1 %v4717_v50  ;;  %v9518_v58 = vpop.eup %7554 }
 0xd3e   : > { %4727 = vadd.xlane.f32.xlu0 %v4726_v12 }
 0xd40   : > { %4730 = vadd.xlane.f32.xlu1 %v4729_v62 }
 0xda7   : > { %v9509_v7 = vpop.xlane.xlu0 %4254 }
 0xda9   : > { %v9511_v0 = vpop.xlane.xlu1 %4257 }
 0xdb3   : > { %v4267_v45 = vpop.xlane.xlu0 %4266 }
 0xdb4   : > { %v9516_v60 = vadd.f32 %v9513_v47, %v4267_v45 }
 0xdb5   : > { %v4270_v26 = vpop.xlane.xlu1 %4269 }
 0xdb6   : > { %v9521_v46 = vadd.f32 %v9518_v58, %v4270_v26 }
 0xdb7   : > { %v4249_v17 = vpop.xlane.xlu0 %4248 }
 0xdb9   : > { %v4252_v11 = vpop.xlane.xlu1 %4251 }
 0xdbb   : > { %v9523_v41 = vpop.xlane.xlu0 %4260 }
 0xdbd   : > { %v9525_v6 = vpop.xlane.xlu1 %4263 }
 0xdbf   : > { %v3819_v33 = vpop.xlane.xlu0 %3818 }
 0xdc0   : > { %v3853_v38 = vmax.f32 %v3819_v33, 1e-24 }
 0xdc1   : > { %v3822_v25 = vpop.xlane.xlu1 %3821 }
 0xdc2   : > { %7556 = vrsqrt.f32 %v3853_v38  ;;  %v3854_v57 = vmax.f32 %v3822_v25, 1e-24 }
 0xdc3   : > { %v3843_v1 = vpop.xlane.xlu0 %3842 }
 0xdc4   : > { %7558 = vrsqrt.f32 %v3854_v57  ;;  %v3861_v13 = vmax.f32 %v3843_v1, 1e-24 }
 0xdc5   : > { %v3846_v20 = vpop.xlane.xlu1 %3845 }
 0xdc6   : > { %7560 = vrsqrt.f32 %v3861_v13  ;;  %v3862_v50 = vmax.f32 %v3846_v20, 1e-24 }
 0xdc8   : > { %7562 = vrsqrt.f32 %v3862_v50 }
 0xdcc   : > { %v7557_v61 = vpop.eup %7556 }
 0xdcd   : > { %v3885_v12 = vmul.f32 %v7557_v61, %v9160_v9 }
 0xdce   : > { %v7559_v62 = vpop.eup %7558 }
 0xdcf   : > { %v9529_v16 = vmul.f32 %v9216_v10, %v3885_v12  ;;  %v3886_v42 = vmul.f32 %v7559_v62, %v9168_v36 }
 0xdd0   : > { %v7561_v45 = vpop.eup %7560 }
 0xdd1   : > { %v4708_v26 = vmul.f32 %v9270_v55, %v9529_v16  ;;  %v9535_v33 = vmul.f32 %v9216_v10, %v3886_v42  ;;  %v3893_v38 = vmul.f32 %v7561_v45, %v9162_v32  ;;  %v10366_v45 = vsub.f32 %v9375_v18, %v9384_v24 }
 0xdd2   : > { %v7563_v25 = vpop.eup %7562  ;;  %v10370_v18 = vsub.f32 %v9402_v52, %v9411_v39  ;;  %v9581_v52 = vld [vmem:[%s8063_s2] ss:$0 sm:$0xff] }
 0xdd3   : > { %v4720_v57 = vsel %vm1805_vm2, %v4708_v26, 0.0  ;;  %v4709_v9 = vmul.f32 %v9270_v55, %v9535_v33  ;;  %v4577_v1 = vpack.c.bf16 %v9535_v33, %v9529_v16  ;;  %v9544_v36 = vmul.f32 %v9216_v10, %v3893_v38 }
 0xdd4   : > { %4721 = vadd.xlane.f32.xlu0 %v4720_v57  ;;  %v3894_v13 = vmul.f32 %v7563_v25, %v9170_v35  ;;  %v10365_v35 = vsub.f32 %v9361_v21, %v9366_v29  ;;  %v10367_v26 = vsub.f32 %v9363_v23, %v9373_v3  ;;  %v10369_v21 = vsub.f32 %v9386_v48, %v9400_v5 }
 0xdd5   : > { %v4723_v20 = vsel %vm1805_vm2, %v4709_v9, 0.0  ;;  %v4712_v32 = vmul.f32 %v9273_v51, %v9544_v36  ;;  %v4241_v24 = vmul.f32 1.442695, %v10370_v18 }
 0xdd6   : > { %4724 = vadd.xlane.f32.xlu1 %v4723_v20  ;;  %v9551_v50 = vmul.f32 %v9216_v10, %v3894_v13  ;;  %v4235_v62 = vmul.f32 1.442695, %v10365_v35  ;;  %v4231_v10 = vmul.f32 1.442695, %v10366_v45  ;;  %v4237_v38 = vmul.f32 1.442695, %v10367_v26 }
 0xdd7   : > { %v4732_v55 = vsel %vm1805_vm2, %v4712_v32, 0.0  ;;  %v4239_v29 = vmul.f32 1.442695, %v10369_v21 }
 0xdd8   : > { %4733 = vadd.xlane.f32.xlu0 %v4732_v55  ;;  %v4713_v61 = vmul.f32 %v9273_v51, %v9551_v50  ;;  %v4579_v12 = vpack.c.bf16 %v9551_v50, %v9544_v36  ;;  %v10368_v51 = vsub.f32 %v9377_v19, %v9389_v53  ;;  %7564 = vpow2.f32 %v4235_v62 }
 0xdd9   : > { %7566 = vpow2.f32 %v4231_v10 }
 0xdda   : > { %v4735_v42 = vsel %vm1805_vm2, %v4713_v61, 0.0  ;;  %v4233_v25 = vmul.f32 1.442695, %v10368_v51  ;;  %7568 = vpow2.f32 %v4237_v38 }
 0xddb   : > { %4736 = vadd.xlane.f32.xlu1 %v4735_v42 }
 0xddc   : > { %7570 = vpow2.f32 %v4233_v25  ;;  %v9591_v25 = vld [vmem:[%s8063_s2 + $0x1] ss:$0 sm:$0xff] }
 0xddd   : > { %7572 = vpow2.f32 %v4239_v29  ;;  %v4311_v18 = vmul.f32 %v9513_v47, %v9591_v25 }
 0xdde   : > { %7574 = vpow2.f32 %v4241_v24 }
 0xde2   : > { %v7565_v23 = vpop.eup %7564 }
 0xde3   : > { %v7567_v3 = vpop.eup %7566  ;;  %v4273_v19 = vadd.f32 %v7565_v23, %v9509_v7  ;;  %v4307_v7 = vmul.f32 %v7565_v23, %v9581_v52 }
 0xde4   : > { %v7569_v53 = vpop.eup %7568  ;;  %v4271_v57 = vadd.f32 %v7567_v3, %v4249_v17 }
 0xde5   : > { %v4274_v13 = vadd.f32 %v7569_v53, %v9511_v0  ;;  %7576 = vrcp.f32 %v4273_v19  ;;  %v4305_v0 = vmul.f32 %v7567_v3, %v9581_v52 }
 0xde6   : > { %v7571_v9 = vpop.eup %7570  ;;  %7578 = vrcp.f32 %v4271_v57 }
 0xde7   : > { %v4272_v20 = vadd.f32 %v7571_v9, %v4252_v11  ;;  %7580 = vrcp.f32 %v4274_v13  ;;  %v7573_v48 = vpop.eup %7572 }
 0xde8   : > { %v4275_v5 = vadd.f32 %v7573_v48, %v9523_v41  ;;  %v7575_v39 = vpop.eup %7574  ;;  %v4308_v41 = vmul.f32 %v7569_v53, %v9581_v52  ;;  %v4309_v3 = vmul.f32 %v7573_v48, %v9591_v25  ;;  %v4870_v48 = vpack.c.bf16 %v9295_v2, %v9295_v2 }
 0xde9   : > { %7582 = vrcp.f32 %v4272_v20  ;;  %v4276_v32 = vadd.f32 %v7575_v39, %v9525_v6  ;;  %v4306_v6 = vmul.f32 %v7571_v9, %v9581_v52  ;;  %v4312_v9 = vmul.f32 %v9518_v58, %v9591_v25 }
 0xdea   : > { %7584 = vrcp.f32 %v9516_v60  ;;  %v4589_v58 = vsel %vm1805_vm2, %v9453_v8, 0  ;;  %v4647_v8 = vsel %vm1805_vm2, %v9457_v28, 0 }
 0xdeb   : > { %7586 = vrcp.f32 %v4275_v5 }
 0xdec   : > { %7588 = vrcp.f32 %v9521_v46 }
 0xded   : > { %7590 = vrcp.f32 %v4276_v32  ;;  %v4310_v32 = vmul.f32 %v7575_v39, %v9591_v25 }
 0xdef   : > { %v7577_v61 = vpop.eup %7576 }
 0xdf0   : > { %v7579_v60 = vpop.eup %7578 }
 0xdf1   : > { %v7581_v26 = vpop.eup %7580 }
 0xdf3   : > { %v7583_v46 = vpop.eup %7582 }
 0xdf4   : > { %v7585_v13 = vpop.eup %7584 }
 0xdf5   : > { %v7102_v17 = vpop.f32.mrb[64].mxu0 }
 0xdf6   : > { %v4366_v11 = vadd.f32 %v7102_v17, %v4307_v7  ;;  %v4357_v55 = vpop.f32.mrb[65].mxu0  ;;  %v7587_v7 = vpop.eup %7586 }
 0xdf7   : > { %v4358_v35 = vadd.f32 %v4357_v55, %v4305_v0  ;;  %v7103_v62 = vpop.f32.mrb[66].mxu0  ;;  %v7589_v47 = vpop.eup %7588 }
 0xdf8   : > { %v4432_v42 = vmul.f32 %v7577_v61, %v4366_v11  ;;  %v4369_v45 = vadd.f32 %v7103_v62, %v4308_v41  ;;  %v4360_v10 = vpop.f32.mrb[67].mxu0  ;;  %v7591_v61 = vpop.eup %7590 }
 0xdf9   : > { %v4430_v38 = vmul.f32 %v7579_v60, %v4358_v35  ;;  %v4361_v51 = vadd.f32 %v4360_v10, %v4306_v6  ;;  %v4887_v6 = vsel %vm4319_vm5, %v4870_v48, 0  ;;  %v4871_v60 = vpack.c.bf16 %v9297_v27, %v9297_v27 }
 0xdfa   : > { %v4433_v21 = vmul.f32 %v7581_v26, %v4369_v45 }
 0xdfb   : > { %v4431_v29 = vmul.f32 %v7583_v46, %v4361_v51  ;;  %v4945_v28 = vsel %vm4319_vm5, %v4871_v60, 0 }
 0xdfc   : > { %v4439_v24 = vpack.c.bf16 %v4433_v21, %v4432_v42  ;;  %v7108_v23 = vpop.f32.mrb[72].mxu1 }
 0xdfd   : > { %v4438_v19 = vpack.c.bf16 %v4431_v29, %v4430_v38  ;;  %v4424_v53 = vadd.f32 %v7108_v23, %v4311_v18  ;;  %v4415_v57 = vpop.f32.mrb[73].mxu1 }
 0xdfe   : > { %v4416_v20 = vadd.f32 %v4415_v57, %v4309_v3  ;;  %v7109_v5 = vpop.f32.mrb[74].mxu1 }
 0xdff   : > { %v4436_v17 = vmul.f32 %v7585_v13, %v4424_v53  ;;  %v4427_v0 = vadd.f32 %v7109_v5, %v4312_v9  ;;  %v4418_v11 = vpop.f32.mrb[75].mxu1  ;;  %7112 = vmatprep.mubr.msk.bf16.mxu0 %vm1805_vm2, %v4438_v19 }
 0xe00   : > { %v4434_v55 = vmul.f32 %v7587_v7, %v4416_v20  ;;  %v4419_v41 = vadd.f32 %v4418_v11, %v4310_v32  ;;  %7113 = vmatmul.mubr.msk.bf16.vlgmr.msra.gmra.mrb[68].mxu0 %vm1805_vm2, %v4439_v24 }
 0xe01   : > { %v4437_v35 = vmul.f32 %v7589_v47, %v4427_v0  ;;  %7123 = vmatpush3.bf16.xpose.msra.mxu0 %v4589_v58  ;;  %7124 = vmatprep.mubr.msk.bf16.mxu0 %vm1805_vm2, %v4576_v14 }
 0xe02   : > { %v4435_v39 = vmul.f32 %v7591_v61, %v4419_v41  ;;  %7220 = vmatprep.subr.msk.bf16.mxu0 %vm4319_vm5, %v4870_v48 }
 0xe03   : > { %v4441_v62 = vpack.c.bf16 %v4437_v35, %v4436_v17  ;;  %v4716_v35 = vpop.xlane.xlu0 %4715 }
 0xe04   : > { %v4440_v2 = vpack.c.bf16 %v4435_v39, %v4434_v55  ;;  %v4719_v39 = vpop.xlane.xlu1 %4718 }
 0xe06   : > { %7118 = vmatprep.mubr.msk.bf16.mxu1 %vm1805_vm2, %v4440_v2 }
 0xe07   : > { %7119 = vmatmul.mubr.msk.bf16.vlgmr.msra.gmra.mrb[76].mxu1 %vm1805_vm2, %v4441_v62  ;;  %v4728_v62 = vpop.xlane.xlu0 %4727 }
 0xe08   : > { %7129 = vmatpush3.bf16.xpose.msra.mxu1 %v4647_v8  ;;  %7125 = vmatmul.mubr.msk.bf16.vlgmr.msra.gmra.mrb[72].mxu0 %vm1805_vm2, %v4577_v1  ;;  %v4731_v2 = vpop.xlane.xlu1 %4730 }
 0xe09   : > { %7130 = vmatprep.mubr.msk.bf16.mxu1 %vm1805_vm2, %v4578_v43  ;;  %7135 = vmatpush3.bf16.msra.mxu0 %v4887_v6 }
 0xe0a   : > { %7221 = vmatprep.subr.msk.bf16.mxu1 %vm4319_vm5, %v4871_v60  ;;  %7146 = vmatprep.subr.bf16.mxu0 %v9354_v40 }
 0xe0f   : > { %7131 = vmatmul.mubr.msk.bf16.vlgmr.msra.gmra.mrb[80].mxu1 %vm1805_vm2, %v4579_v12 }
 0xe10   : > { %7141 = vmatpush3.bf16.msra.mxu1 %v4945_v28 }
 0xe11   : > { %7152 = vmatprep.subr.bf16.mxu1 %v9357_v54 }
 0xe61   : > { %v4722_v8 = vpop.xlane.xlu0 %4721 }
 0xe63   : > { %v4725_v6 = vpop.xlane.xlu1 %4724 }
 0xe65   : > { %v4734_v60 = vpop.xlane.xlu0 %4733 }
 0xe68   : > { %v4737_v28 = vpop.xlane.xlu1 %4736 }
 0xed3   : > { %v7114_v27 = vpop.f32.mrb[68].mxu0 }
 0xed4   : > { %v4488_v63 = vpop.f32.mrb[69].mxu0  ;;  %v4570_v14 = vsel %vm1160_vm1, %v7114_v27, 0.0  ;;  %v9669_v27 = vmul.f32 8.0, %v4722_v8 }
 0xed5   : > { %v7115_v37 = vpop.f32.mrb[70].mxu0  ;;  %v4564_v1 = vsel %vm1160_vm1, %v4488_v63, 0.0  ;;  %v9671_v63 = vmul.f32 8.0, %v4725_v6 }
 0xed6   : > { %v4491_v49 = vpop.f32.mrb[71].mxu0  ;;  %v4573_v10 = vsel %vm1160_vm1, %v7115_v37, 0.0 }
 0xed7   : > { %v4567_v21 = vsel %vm1160_vm1, %v4491_v49, 0.0 }
 0xeda   : > { %v7120_v31 = vpop.f32.mrb[76].mxu1 }
 0xedb   : > { %v4571_v43 = vsel %vm1160_vm1, %v7120_v31, 0.0  ;;  %v4549_v16 = vpop.f32.mrb[77].mxu1  ;;  %v7126_v33 = vpop.f32.mrb[72].mxu0 }
 0xedc   : > { %v9636_v42 = vadd.f32 %v4571_v43, %v4570_v14  ;;  %v4565_v36 = vsel %vm1160_vm1, %v4549_v16, 0.0  ;;  %v4700_v50 = vmul.f32 8.0, %v7126_v33  ;;  %v7121_v12 = vpop.f32.mrb[78].mxu1  ;;  %v4625_v45 = vpop.f32.mrb[73].mxu0  ;;  %v9679_v43 = vmul.f32 8.0, %v4716_v35 }
 0xedd   : > { %v9640_v26 = vadd.f32 %v4565_v36, %v4564_v1  ;;  %v4574_v38 = vsel %vm1160_vm1, %v7121_v12, 0.0  ;;  %v4552_v51 = vpop.f32.mrb[79].mxu1  ;;  %v7127_v46 = vpop.f32.mrb[74].mxu0  ;;  %v4698_v3 = vmul.f32 8.0, %v4625_v45  ;;  %v9684_v1 = vmul.f32 8.0, %v4719_v39 }
 0xede   : > { %v9644_v29 = vadd.f32 %v4574_v38, %v4573_v10  ;;  %v4568_v18 = vsel %vm1160_vm1, %v4552_v51, 0.0  ;;  %v4701_v24 = vmul.f32 8.0, %v7127_v46  ;;  %v4628_v23 = vpop.f32.mrb[75].mxu0  ;;  %v4752_v53 = vsel %vm4166_vm6, %v4700_v50, -inf }
 0xedf   : > { %v9647_v19 = vadd.f32 %v4568_v18, %v4567_v21  ;;  %v4699_v57 = vmul.f32 8.0, %v4628_v23  ;;  %4753 = vmax.xlane.f32.xlu0 %v4752_v53  ;;  %v4746_v20 = vsel %vm4166_vm6, %v4698_v3, -inf  ;;  %v9700_v23 = vmul.f32 8.0, %v4731_v2 }
 0xee0   : > { %v4755_v9 = vsel %vm4166_vm6, %v4701_v24, -inf }
 0xee1   : > { %4756 = vmax.xlane.f32.xlu1 %v4755_v9  ;;  %v4749_v17 = vsel %vm4166_vm6, %v4699_v57, -inf }
 0xee2   : > { %v7132_v13 = vpop.f32.mrb[80].mxu1 }
 0xee3   : > { %v4683_v5 = vpop.f32.mrb[81].mxu1  ;;  %4747 = vmax.xlane.f32.xlu0 %v4746_v20  ;;  %v9659_v48 = vmul.f32 8.0, %v7132_v13 }
 0xee4   : > { %v9652_v32 = vmul.f32 8.0, %v4683_v5  ;;  %v7133_v7 = vpop.f32.mrb[82].mxu1 }
 0xee5   : > { %4750 = vmax.xlane.f32.xlu1 %v4749_v17  ;;  %v4686_v0 = vpop.f32.mrb[83].mxu1  ;;  %v9661_v55 = vmul.f32 8.0, %v7133_v7  ;;  %v4764_v58 = vsel %vm4166_vm6, %v9659_v48, -inf }
 0xee6   : > { %v9655_v11 = vmul.f32 8.0, %v4686_v0  ;;  %v4758_v47 = vsel %vm4166_vm6, %v9652_v32, -inf  ;;  %v9711_v0 = vmul.f32 8.0, %v4734_v60 }
 0xee7   : > { %4759 = vmax.xlane.f32.xlu0 %v4758_v47  ;;  %v4767_v61 = vsel %vm4166_vm6, %v9661_v55, -inf }
 0xee8   : > { %v4761_v41 = vsel %vm4166_vm6, %v9655_v11, -inf }
 0xee9   : > { %4762 = vmax.xlane.f32.xlu1 %v4761_v41  ;;  %v9717_v41 = vmul.f32 8.0, %v4737_v28 }
 0xeeb   : > { %4765 = vmax.xlane.f32.xlu0 %v4764_v58 }
 0xeed   : > { %4768 = vmax.xlane.f32.xlu1 %v4767_v61 }
 0xf6c   : > { %v4754_v37 = vpop.xlane.xlu0 %4753 }
 0xf6d   : > { %v9674_v49 = vmax.f32 %v4754_v37, %v9669_v27 }
 0xf6e   : > { %v4757_v31 = vpop.xlane.xlu1 %4756 }
 0xf6f   : > { %v9677_v14 = vmax.f32 %v4757_v31, %v9671_v63  ;;  %v4780_v16 = vsub.f32 %v4700_v50, %v9674_v49  ;;  %v4804_v33 = vsub.f32 %v9669_v27, %v9674_v49  ;;  %v9695_v50 = vmul.f32 8.0, %v4728_v62 }
 0xf70   : > { %v4748_v45 = vpop.xlane.xlu0 %4747 }
 0xf71   : > { %v4781_v36 = vsub.f32 %v4701_v24, %v9677_v14  ;;  %v4805_v12 = vsub.f32 %v9671_v63, %v9677_v14  ;;  %v4790_v10 = vmul.f32 1.442695, %v4780_v16  ;;  %v9690_v38 = vmax.f32 %v4748_v45, %v9679_v43 }
 0xf72   : > { %v4751_v51 = vpop.xlane.xlu1 %4750 }
 0xf73   : > { %v4792_v46 = vmul.f32 1.442695, %v4781_v36  ;;  %v9693_v21 = vmax.f32 %v4751_v51, %v9684_v1  ;;  %7592 = vpow2.f32 %v4790_v10  ;;  %v4778_v18 = vsub.f32 %v4698_v3, %v9690_v38 }
 0xf74   : > { %v4802_v24 = vsub.f32 %v9679_v43, %v9690_v38  ;;  %v4760_v13 = vpop.xlane.xlu0 %4759 }
 0xf75   : > { %v4779_v53 = vsub.f32 %v4699_v57, %v9693_v21  ;;  %v4803_v9 = vsub.f32 %v9684_v1, %v9693_v21  ;;  %7594 = vpow2.f32 %v4792_v46  ;;  %v4786_v20 = vmul.f32 1.442695, %v4778_v18 }
 0xf76   : > { %v9706_v5 = vmax.f32 %v4760_v13, %v9695_v50  ;;  %v4763_v7 = vpop.xlane.xlu1 %4762 }
 0xf77   : > { %v4788_v17 = vmul.f32 1.442695, %v4779_v53  ;;  %v9709_v3 = vmax.f32 %v4763_v7, %v9700_v23  ;;  %7596 = vpow2.f32 %v4786_v20 }
 0xf78   : > { %v4782_v57 = vsub.f32 %v9652_v32, %v9706_v5  ;;  %v4806_v47 = vsub.f32 %v9695_v50, %v9706_v5  ;;  %v4766_v35 = vpop.xlane.xlu0 %4765 }
 0xf79   : > { %v4783_v58 = vsub.f32 %v9655_v11, %v9709_v3  ;;  %v4807_v61 = vsub.f32 %v9700_v23, %v9709_v3  ;;  %7598 = vpow2.f32 %v4788_v17  ;;  %v9724_v62 = vmax.f32 %v4766_v35, %v9711_v0 }
 0xf7a   : > { %v4794_v39 = vmul.f32 1.442695, %v4782_v57  ;;  %v4769_v2 = vpop.xlane.xlu1 %4768  ;;  %v9748_v35 = vadd.f32 %v9640_v26, %v8948_v34  ;;  %v4818_v43 = vmul.f32 1.442695, %v4806_v47 }
 0xf7b   : > { %v4796_v8 = vmul.f32 1.442695, %v4783_v58  ;;  %v9727_v32 = vmax.f32 %v4769_v2, %v9717_v41  ;;  %v4784_v6 = vsub.f32 %v9659_v48, %v9724_v62  ;;  %v4808_v11 = vsub.f32 %v9711_v0, %v9724_v62 }
 0xf7c   : > { %7600 = vpow2.f32 %v4794_v39  ;;  %v5138_v34 = vsel %vm1160_vm1, %v9748_v35, 0.0 }
 0xf7d   : > { %v4785_v60 = vsub.f32 %v9661_v55, %v9727_v32  ;;  %v4809_v28 = vsub.f32 %v9717_v41, %v9727_v32  ;;  %v7593_v37 = vpop.eup %7592  ;;  %7602 = vpow2.f32 %v4796_v8  ;;  %v4798_v31 = vmul.f32 1.442695, %v4784_v6 }
 0xf7e   : > { %v4832_v36 = vsel %vm4166_vm6, %v7593_v37, 0.0  ;;  %v9754_v8 = vadd.f32 %v9647_v19, %v8953_v22  ;;  %v9767_v22 = vadd.f32 %v9644_v29, %v8964_v15  ;;  %v4810_v15 = vmul.f32 1.442695, %v4802_v24 }
 0xf7f   : > { %v4800_v16 = vmul.f32 1.442695, %v4785_v60  ;;  %v7595_v45 = vpop.eup %7594  ;;  %7604 = vpow2.f32 %v4798_v31  ;;  %4833 = vadd.xlane.f32.xlu0 %v4832_v36  ;;  %v4816_v19 = vmul.f32 1.442695, %v4805_v12  ;;  %v4822_v27 = vmul.f32 1.442695, %v4808_v11 }
 0xf80   : > { %v4835_v48 = vsel %vm4166_vm6, %v7595_v45, 0.0  ;;  %v4867_v13 = vpack.c.bf16 %v7595_v45, %v7593_v37  ;;  %v5141_v26 = vsel %vm1160_vm1, %v9754_v8, 0.0  ;;  %v4812_v37 = vmul.f32 1.442695, %v4803_v9 }
 0xf81   : > { %v7597_v10 = vpop.eup %7596  ;;  %7606 = vpow2.f32 %v4800_v16  ;;  %4836 = vadd.xlane.f32.xlu1 %v4835_v48  ;;  %v4824_v63 = vmul.f32 1.442695, %v4809_v28 }
 0xf82   : > { %v4826_v51 = vsel %vm4166_vm6, %v7597_v10, 0.0 }
 0xf83   : > { %v7599_v55 = vpop.eup %7598  ;;  %4827 = vadd.xlane.f32.xlu0 %v4826_v51 }
 0xf84   : > { %v4829_v46 = vsel %vm4166_vm6, %v7599_v55, 0.0  ;;  %v4866_v18 = vpack.c.bf16 %v7599_v55, %v7597_v10 }
 0xf85   : > { %4830 = vadd.xlane.f32.xlu1 %v4829_v46 }
 0xf86   : > { %v7601_v53 = vpop.eup %7600  ;;  %7136 = vmatprep.mubr.msk.bf16.mxu0 %vm4166_vm6, %v4866_v18 }
 0xf87   : > { %v4838_v20 = vsel %vm4166_vm6, %v7601_v53, 0.0  ;;  %v7603_v7 = vpop.eup %7602  ;;  %7137 = vmatmul.mubr.msk.bf16.vlgmr.msra.gmra.mrb[76].mxu0 %vm4166_vm6, %v4867_v13 }
 0xf88   : > { %4839 = vadd.xlane.f32.xlu0 %v4838_v20  ;;  %v4841_v17 = vsel %vm4166_vm6, %v7603_v7, 0.0  ;;  %v4868_v57 = vpack.c.bf16 %v7603_v7, %v7601_v53  ;;  %7147 = vmatpush3.bf16.msra.mxu0 %v9354_v40  ;;  %v9759_v40 = vadd.f32 %v9636_v42, %v8957_v4  ;;  %v5147_v42 = vsel %vm1160_vm1, %v9767_v22, 0.0 }
 0xf89   : > { %v7605_v58 = vpop.eup %7604  ;;  %4842 = vadd.xlane.f32.xlu1 %v4841_v17 }
 0xf8a   : > { %7142 = vmatprep.mubr.msk.bf16.mxu1 %vm4166_vm6, %v4868_v57  ;;  %v4844_v39 = vsel %vm4166_vm6, %v7605_v58, 0.0  ;;  %v5144_v4 = vsel %vm1160_vm1, %v9759_v40, 0.0 }
 0xf8b   : > { %v7607_v2 = vpop.eup %7606 }
 0xf8c   : > { %4845 = vadd.xlane.f32.xlu0 %v4844_v39  ;;  %v4847_v6 = vsel %vm4166_vm6, %v7607_v2, 0.0  ;;  %v4869_v60 = vpack.c.bf16 %v7607_v2, %v7605_v58 }
 0xf8d   : > { %4848 = vadd.xlane.f32.xlu1 %v4847_v6 }
 0xf8e   : > { %7143 = vmatmul.mubr.msk.bf16.vlgmr.msra.gmra.mrb[84].mxu1 %vm4166_vm6, %v4869_v60 }
 0xf8f   : > { %7153 = vmatpush3.bf16.msra.mxu1 %v9357_v54  ;;  %v4814_v54 = vmul.f32 1.442695, %v4804_v33  ;;  %v4820_v33 = vmul.f32 1.442695, %v4807_v61 }
 0xf90   : > { %5139 = vadd.xlane.f32.xlu0 %v5138_v34 }
 0xf91   : > { %5142 = vadd.xlane.f32.xlu1 %v5141_v26  ;;  %7608 = vpow2.f32 %v4814_v54 }
 0xf92   : > { %7610 = vpow2.f32 %v4810_v15 }
 0xf93   : > { %7612 = vpow2.f32 %v4816_v19 }
 0xf94   : > { %5145 = vadd.xlane.f32.xlu0 %v5144_v4  ;;  %7614 = vpow2.f32 %v4812_v37 }
 0xf95   : > { %5148 = vadd.xlane.f32.xlu1 %v5147_v42  ;;  %7616 = vpow2.f32 %v4822_v27 }
 0xf96   : > { %7618 = vpow2.f32 %v4818_v43 }
 0xf97   : > { %7620 = vpow2.f32 %v4824_v63 }
 0xf98   : > { %7622 = vpow2.f32 %v4820_v33 }
 0xf9b   : > { %v7609_v12 = vpop.eup %7608 }
 0xf9c   : > { %v7611_v38 = vpop.eup %7610  ;;  %v4874_v45 = vmul.f32 %v7609_v12, %v9581_v52 }
 0xf9d   : > { %v7613_v50 = vpop.eup %7612  ;;  %v4872_v10 = vmul.f32 %v7611_v38, %v9581_v52 }
 0xf9e   : > { %v7615_v5 = vpop.eup %7614  ;;  %v4875_v46 = vmul.f32 %v7613_v50, %v9581_v52 }
 0xf9f   : > { %v7617_v62 = vpop.eup %7616  ;;  %v4873_v20 = vmul.f32 %v7615_v5, %v9581_v52 }
 0xfa0   : > { %v7619_v3 = vpop.eup %7618  ;;  %v4878_v4 = vmul.f32 %v7617_v62, %v9591_v25 }
 0xfa1   : > { %v7621_v32 = vpop.eup %7620  ;;  %v4876_v15 = vmul.f32 %v7619_v3, %v9591_v25 }
 0xfa2   : > { %v7623_v28 = vpop.eup %7622  ;;  %v4879_v52 = vmul.f32 %v7621_v32, %v9591_v25 }
 0xfa3   : > { %v4877_v43 = vmul.f32 %v7623_v28, %v9591_v25 }
0x100c   : > { %v4834_v29 = vpop.xlane.xlu0 %4833 }
0x100d   : > { %v4852_v21 = vadd.f32 %v7609_v12, %v4834_v29 }
0x100e   : > { %v4837_v31 = vpop.xlane.xlu1 %4836 }
0x100f   : > { %v4853_v0 = vadd.f32 %v7613_v50, %v4837_v31  ;;  %7624 = vrcp.f32 %v4852_v21 }
0x1010   : > { %v4828_v49 = vpop.xlane.xlu0 %4827 }
0x1011   : > { %v4850_v9 = vadd.f32 %v7611_v38, %v4828_v49 }
0x1012   : > { %v4831_v14 = vpop.xlane.xlu1 %4830 }
0x1013   : > { %v4851_v47 = vadd.f32 %v7615_v5, %v4831_v14  ;;  %7626 = vrcp.f32 %v4850_v9 }
0x1014   : > { %7628 = vrcp.f32 %v4853_v0 }
0x1015   : > { %v4840_v1 = vpop.xlane.xlu0 %4839  ;;  %7630 = vrcp.f32 %v4851_v47 }
0x1016   : > { %v4843_v24 = vpop.xlane.xlu1 %4842  ;;  %v4854_v11 = vadd.f32 %v7619_v3, %v4840_v1 }
0x1017   : > { %v4855_v36 = vadd.f32 %v7623_v28, %v4843_v24 }
0x1019   : > { %v4846_v41 = vpop.xlane.xlu0 %4845  ;;  %v7625_v18 = vpop.eup %7624 }
0x101a   : > { %v4849_v23 = vpop.xlane.xlu1 %4848  ;;  %v4856_v61 = vadd.f32 %v7617_v62, %v4846_v41 }
0x101b   : > { %v4857_v16 = vadd.f32 %v7621_v32, %v4849_v23 }
0x101c   : > { %7632 = vrcp.f32 %v4856_v61 }
0x101d   : > { %7634 = vrcp.f32 %v4854_v11  ;;  %v7627_v7 = vpop.eup %7626  ;;  %v5140_v23 = vpop.xlane.xlu0 %5139 }
0x101e   : > { %7636 = vrcp.f32 %v4857_v16  ;;  %v7629_v39 = vpop.eup %7628  ;;  %v5143_v3 = vpop.xlane.xlu1 %5142  ;;  %v5162_v16 = vmul.f32 0.03125, %v5140_v23 }
0x101f   : > { %7638 = vrcp.f32 %v4855_v36  ;;  %v7631_v60 = vpop.eup %7630 }
0x1026   : > { %v7633_v31 = vpop.eup %7632 }
0x1027   : > { %v7635_v63 = vpop.eup %7634 }
0x1028   : > { %v7637_v12 = vpop.eup %7636 }
0x1029   : > { %v7639_v24 = vpop.eup %7638 }
0x105a   : > { %v7138_v48 = vpop.f32.mrb[76].mxu0 }
0x105b   : > { %v4932_v51 = vadd.f32 %v7138_v48, %v4874_v45  ;;  %v4923_v55 = vpop.f32.mrb[77].mxu0 }
0x105c   : > { %v4924_v53 = vadd.f32 %v4923_v55, %v4872_v10  ;;  %v7139_v13 = vpop.f32.mrb[78].mxu0 }
0x105d   : > { %v4998_v17 = vmul.f32 %v7625_v18, %v4932_v51  ;;  %v4935_v57 = vadd.f32 %v7139_v13, %v4875_v46  ;;  %v4926_v58 = vpop.f32.mrb[79].mxu0 }
0x105e   : > { %v4996_v2 = vmul.f32 %v7627_v7, %v4924_v53  ;;  %v4927_v6 = vadd.f32 %v4926_v58, %v4873_v20  ;;  %v5146_v53 = vpop.xlane.xlu0 %5145 }
0x105f   : > { %v4999_v34 = vmul.f32 %v7629_v39, %v4935_v57  ;;  %v9823_v39 = vsub.f32 %v9748_v35, %v5162_v16 }
0x1060   : > { %v4997_v26 = vmul.f32 %v7631_v60, %v4927_v6  ;;  %v5164_v6 = vmul.f32 0.03125, %v5146_v53 }
0x1061   : > { %v5005_v42 = vpack.c.bf16 %v4999_v34, %v4998_v17  ;;  %v7144_v54 = vpop.f32.mrb[84].mxu1  ;;  %v5163_v17 = vmul.f32 0.03125, %v5143_v3 }
0x1062   : > { %v5004_v29 = vpack.c.bf16 %v4997_v26, %v4996_v2  ;;  %v4990_v19 = vadd.f32 %v7144_v54, %v4878_v4  ;;  %v4981_v37 = vpop.f32.mrb[85].mxu1  ;;  %v5149_v2 = vpop.xlane.xlu1 %5148 }
0x1063   : > { %v4982_v27 = vadd.f32 %v4981_v37, %v4876_v15  ;;  %v7145_v49 = vpop.f32.mrb[86].mxu1  ;;  %v9834_v4 = vsub.f32 %v9754_v8, %v5163_v17  ;;  %v5178_v15 = vmul.f32 %v9823_v39, %v9823_v39 }
0x1064   : > { %v5002_v14 = vmul.f32 %v7633_v31, %v4990_v19  ;;  %v4993_v33 = vadd.f32 %v7145_v49, %v4879_v52  ;;  %v4984_v1 = vpop.f32.mrb[87].mxu1  ;;  %7148 = vmatprep.mubr.msk.bf16.mxu0 %vm1805_vm2, %v5004_v29 }
0x1065   : > { %v5000_v38 = vmul.f32 %v7635_v63, %v4982_v27  ;;  %v4985_v21 = vadd.f32 %v4984_v1, %v4877_v43  ;;  %7149 = vmatmul.mubr.msk.bf16.vlgmr.msra.gmra.mrb[80].mxu0 %vm1805_vm2, %v5005_v42  ;;  %v5179_v19 = vmul.f32 %v9834_v4, %v9834_v4  ;;  %v5186_v37 = vsel %vm1160_vm1, %v5178_v15, 0.0  ;;  %v7296_v63 = vld [vmem:[%s8072_s9] sm:$0xff]   ;;  %v7299_v1 = vld [vmem:[%s8077_s25 + $0x8] sm:$0xff]  }
0x1066   : > { %v5003_v50 = vmul.f32 %v7637_v12, %v4993_v33  ;;  %v7298_v33 = vld [vmem:[%s8072_s9 + $0x8] sm:$0xff]   ;;  %7158 = vmatprep.subr.bf16.mxu0 %v7296_v63 }
0x1067   : > { %v5001_v9 = vmul.f32 %v7639_v24, %v4985_v21  ;;  %v5189_v31 = vsel %vm1160_vm1, %v5179_v19, 0.0  ;;  %7159 = vmatpush3.bf16.msra.mxu0 %v7296_v63 }
0x1068   : > { %v5007_v5 = vpack.c.bf16 %v5003_v50, %v5002_v14  ;;  %v7297_v14 = vld [vmem:[%s8077_s25] sm:$0xff]   ;;  %7160 = vmatprep.subr.bf16.mxu0 %v7298_v33  ;;  %s10373_s25 = sld [smem:[#allocation22_spill]] }
0x1069   : > { %v5006_v0 = vpack.c.bf16 %v5001_v9, %v5000_v38  ;;  %7170 = vmatprep.subr.bf16.mxu1 %v7297_v14 }
0x106b   : > { %7154 = vmatprep.mubr.msk.bf16.mxu1 %vm1805_vm2, %v5006_v0  ;;  %7161 = vmatpush3.bf16.msra.mxu0 %v7298_v33 }
0x106c   : > { %7155 = vmatmul.mubr.msk.bf16.vlgmr.msra.gmra.mrb[88].mxu1 %vm1805_vm2, %v5007_v5 }
0x106d   : > { %7171 = vmatpush3.bf16.msra.mxu1 %v7297_v14 }
0x106e   : > { %7172 = vmatprep.subr.bf16.mxu1 %v7299_v1 }
0x1071   : > { %7173 = vmatpush3.bf16.msra.mxu1 %v7299_v1 }
0x1138   : > { %v7150_v25 = vpop.f32.mrb[80].mxu0 }
0x1139   : > { %v5048_v47 = vpop.f32.mrb[81].mxu0  ;;  %v5124_v32 = vsel %vm1160_vm1, %v7150_v25, 0.0 }
0x113a   : > { %v7151_v41 = vpop.f32.mrb[82].mxu0  ;;  %v5118_v36 = vsel %vm1160_vm1, %v5048_v47, 0.0 }
0x113b   : > { %v5051_v62 = vpop.f32.mrb[83].mxu0  ;;  %v5127_v51 = vsel %vm1160_vm1, %v7151_v41, 0.0 }
0x113c   : > { %v5121_v13 = vsel %vm1160_vm1, %v5051_v62, 0.0 }
0x113f   : > { %v7156_v61 = vpop.f32.mrb[88].mxu1 }
0x1140   : > { %v5125_v11 = vsel %vm1160_vm1, %v7156_v61, 0.0  ;;  %v5103_v28 = vpop.f32.mrb[89].mxu1 }
0x1141   : > { %v5126_v45 = vadd.f32 %v5125_v11, %v5124_v32  ;;  %v5119_v48 = vsel %vm1160_vm1, %v5103_v28, 0.0  ;;  %v7157_v10 = vpop.f32.mrb[90].mxu1 }
0x1142   : > { %v5120_v55 = vadd.f32 %v5119_v48, %v5118_v36  ;;  %v5128_v46 = vsel %vm1160_vm1, %v7157_v10, 0.0  ;;  %v5106_v18 = vpop.f32.mrb[91].mxu1 }
0x1143   : > { %v5129_v20 = vadd.f32 %v5128_v46, %v5127_v51  ;;  %v5122_v7 = vsel %vm1160_vm1, %v5106_v18, 0.0  ;;  %v9826_v60 = vadd.f32 %v5126_v45, %v9021_v59  ;;  %v9842_v59 = vsub.f32 %v9759_v40, %v5164_v6 }
0x1144   : > { %v9820_v57 = vadd.f32 %v5120_v55, %v9016_v56  ;;  %v5123_v58 = vadd.f32 %v5122_v7, %v5121_v13  ;;  %v5165_v56 = vmul.f32 0.03125, %v5149_v2 }
0x1145   : > { %v9837_v42 = vadd.f32 %v5129_v20, %v9030_v44  ;;  %v5180_v52 = vmul.f32 %v9842_v59, %v9842_v59 }
0x1146   : > { %v9829_v34 = vadd.f32 %v5123_v58, %v9023_v30  ;;  %v5150_v26 = vsel %vm1160_vm1, %v9820_v57, 0.0  ;;  %v5156_v30 = vsel %vm1160_vm1, %v9826_v60, 0.0  ;;  %v9849_v29 = vsub.f32 %v9767_v22, %v5165_v56  ;;  %v10371_v58 = vld [vmem:[#allocation18_spill] sm:$0xff] }
0x1147   : > { %5151 = vadd.xlane.f32.xlu0 %v5150_v26  ;;  %v5159_v44 = vsel %vm1160_vm1, %v9837_v42, 0.0  ;;  %v5192_v49 = vsel %vm1160_vm1, %v5180_v52, 0.0  ;;  %v5244_v2 = vsub.s32 2, %v10371_v58  ;;  %v7715_v56 = vld [vmem:[%s7990_s1] sm:$0x7]  ;;  %s10372_s1 = sld [smem:[#allocation13_spill]] }
0x1148   : > { %v5153_v54 = vsel %vm1160_vm1, %v9829_v34, 0.0  ;;  %v5181_v27 = vmul.f32 %v9849_v29, %v9849_v29 }
0x1149   : > { %5154 = vadd.xlane.f32.xlu1 %v5153_v54  ;;  %v5245_v54 = vrot.slane %v7715_v56, %v5244_v2 }
0x114a   : > { %v5195_v43 = vsel %vm1160_vm1, %v5181_v27, 0.0 }
0x114b   : > { %5157 = vadd.xlane.f32.xlu0 %v5156_v30 }
0x114d   : > { %5160 = vadd.xlane.f32.xlu1 %v5159_v44 }
0x114f   : > { %5187 = vadd.xlane.f32.xlu0 %v5186_v37 }
0x1151   : > { %5190 = vadd.xlane.f32.xlu1 %v5189_v31 }
0x1153   : > { %5193 = vadd.xlane.f32.xlu0 %v5192_v49 }
0x1155   : > { %5196 = vadd.xlane.f32.xlu1 %v5195_v43 }
0x11d4   : > { %v5152_v12 = vpop.xlane.xlu0 %5151 }
0x11d5   : > { %v5166_v38 = vmul.f32 0.03125, %v5152_v12 }
0x11d6   : > { %v5155_v21 = vpop.xlane.xlu1 %5154 }
0x11d7   : > { %v9868_v24 = vsub.f32 %v9820_v57, %v5166_v38  ;;  %v5167_v50 = vmul.f32 0.03125, %v5155_v21 }
0x11d8   : > { %v5158_v9 = vpop.xlane.xlu0 %5157 }
0x11d9   : > { %v9871_v5 = vsub.f32 %v9829_v34, %v5167_v50  ;;  %v5168_v0 = vmul.f32 0.03125, %v5158_v9  ;;  %v5182_v25 = vmul.f32 %v9868_v24, %v9868_v24 }
0x11da   : > { %v5161_v47 = vpop.xlane.xlu1 %5160 }
0x11db   : > { %v9876_v41 = vsub.f32 %v9826_v60, %v5168_v0  ;;  %v5169_v62 = vmul.f32 0.03125, %v5161_v47  ;;  %v5198_v23 = vsel %vm1160_vm1, %v5182_v25, 0.0  ;;  %v5183_v3 = vmul.f32 %v9871_v5, %v9871_v5 }
0x11dc   : > { %5199 = vadd.xlane.f32.xlu0 %v5198_v23  ;;  %v5188_v61 = vpop.xlane.xlu0 %5187 }
0x11dd   : > { %v9882_v32 = vsub.f32 %v9837_v42, %v5169_v62  ;;  %v5210_v11 = vmul.f32 0.03125, %v5188_v61  ;;  %v5201_v28 = vsel %vm1160_vm1, %v5183_v3, 0.0  ;;  %v5184_v16 = vmul.f32 %v9876_v41, %v9876_v41 }
0x11de   : > { %5202 = vadd.xlane.f32.xlu1 %v5201_v28  ;;  %v5191_v36 = vpop.xlane.xlu1 %5190 }
0x11df   : > { %v5218_v45 = vadd.f32 1e-05, %v5210_v11  ;;  %v5211_v48 = vmul.f32 0.03125, %v5191_v36  ;;  %v5204_v10 = vsel %vm1160_vm1, %v5184_v16, 0.0  ;;  %v5185_v51 = vmul.f32 %v9882_v32, %v9882_v32 }
0x11e0   : > { %5205 = vadd.xlane.f32.xlu0 %v5204_v10  ;;  %v5194_v55 = vpop.xlane.xlu0 %5193 }
0x11e1   : > { %7640 = vrsqrt.f32 %v5218_v45  ;;  %v5219_v46 = vadd.f32 1e-05, %v5211_v48  ;;  %v5212_v18 = vmul.f32 0.03125, %v5194_v55  ;;  %v5207_v53 = vsel %vm1160_vm1, %v5185_v51, 0.0 }
0x11e2   : > { %5208 = vadd.xlane.f32.xlu1 %v5207_v53  ;;  %v5197_v13 = vpop.xlane.xlu1 %5196 }
0x11e3   : > { %7642 = vrsqrt.f32 %v5219_v46  ;;  %v5220_v20 = vadd.f32 1e-05, %v5212_v18  ;;  %v5213_v7 = vmul.f32 0.03125, %v5197_v13 }
0x11e5   : > { %7644 = vrsqrt.f32 %v5220_v20  ;;  %v5221_v17 = vadd.f32 1e-05, %v5213_v7 }
0x11e7   : > { %7646 = vrsqrt.f32 %v5221_v17 }
0x11eb   : > { %v7641_v6 = vpop.eup %7640 }
0x11ec   : > { %v5234_v26 = vmul.f32 %v7641_v6, %v9823_v39 }
0x11ed   : > { %v7643_v30 = vpop.eup %7642 }
0x11ee   : > { %v5235_v15 = vmul.f32 %v7643_v30, %v9834_v4  ;;  %v5246_v37 = vmul.f32 %v5245_v54, %v5234_v26 }
0x11ef   : > { %v7645_v44 = vpop.eup %7644 }
0x11f0   : > { %v5236_v19 = vmul.f32 %v7645_v44, %v9842_v59  ;;  %v5247_v52 = vmul.f32 %v5245_v54, %v5235_v15 }
0x11f1   : > { %v7647_v31 = vpop.eup %7646 }
0x11f2   : > { %v5237_v27 = vmul.f32 %v7647_v31, %v9849_v29  ;;  %v5254_v49 = vpack.c.bf16 %v5247_v52, %v5246_v37  ;;  %v5248_v43 = vmul.f32 %v5245_v54, %v5236_v19 }
0x11f4   : > { %7162 = vmatprep.mubr.msk.bf16.mxu0 %vm1160_vm1, %v5254_v49  ;;  %7174 = vmatprep.mubr.msk.bf16.mxu1 %vm1160_vm1, %v5254_v49  ;;  %v5249_v39 = vmul.f32 %v5245_v54, %v5237_v27 }
0x11f6   : > { %v5255_v63 = vpack.c.bf16 %v5249_v39, %v5248_v43 }
0x11f8   : > { %7163 = vmatmul.mubr.msk.bf16.vlgmr.msra.gmra.mrb[84].mxu0 %vm1160_vm1, %v5255_v63  ;;  %7175 = vmatmul.mubr.msk.bf16.vlgmr.msra.gmra.mrb[92].mxu1 %vm1160_vm1, %v5255_v63 }
0x1269   : > { %v5200_v4 = vpop.xlane.xlu0 %5199 }
0x126a   : > { %v5214_v14 = vmul.f32 0.03125, %v5200_v4 }
0x126b   : > { %v5203_v59 = vpop.xlane.xlu1 %5202 }
0x126c   : > { %v5222_v33 = vadd.f32 1e-05, %v5214_v14  ;;  %v5215_v1 = vmul.f32 0.03125, %v5203_v59 }
0x126d   : > { %v5206_v12 = vpop.xlane.xlu0 %5205 }
0x126e   : > { %7648 = vrsqrt.f32 %v5222_v33  ;;  %v5223_v29 = vadd.f32 1e-05, %v5215_v1  ;;  %v5216_v38 = vmul.f32 0.03125, %v5206_v12 }
0x126f   : > { %v5209_v21 = vpop.xlane.xlu1 %5208 }
0x1270   : > { %7650 = vrsqrt.f32 %v5223_v29  ;;  %v5224_v50 = vadd.f32 1e-05, %v5216_v38  ;;  %v5217_v9 = vmul.f32 0.03125, %v5209_v21 }
0x1272   : > { %7652 = vrsqrt.f32 %v5224_v50  ;;  %v5225_v0 = vadd.f32 1e-05, %v5217_v9 }
0x1274   : > { %7654 = vrsqrt.f32 %v5225_v0 }
0x1278   : > { %v7649_v25 = vpop.eup %7648 }
0x1279   : > { %v5238_v47 = vmul.f32 %v7649_v25, %v9868_v24 }
0x127a   : > { %v7651_v62 = vpop.eup %7650 }
0x127b   : > { %v5239_v23 = vmul.f32 %v7651_v62, %v9871_v5  ;;  %v5250_v61 = vmul.f32 %v5245_v54, %v5238_v47 }
0x127c   : > { %v7653_v3 = vpop.eup %7652 }
0x127d   : > { %v5251_v11 = vmul.f32 %v5245_v54, %v5239_v23  ;;  %v5240_v28 = vmul.f32 %v7653_v3, %v9876_v41 }
0x127e   : > { %v7655_v16 = vpop.eup %7654 }
0x127f   : > { %v5256_v36 = vpack.c.bf16 %v5251_v11, %v5250_v61  ;;  %v5241_v45 = vmul.f32 %v7655_v16, %v9882_v32  ;;  %v5252_v48 = vmul.f32 %v5245_v54, %v5240_v28 }
0x1281   : > { %7166 = vmatprep.mubr.msk.bf16.mxu0 %vm1160_vm1, %v5256_v36  ;;  %7178 = vmatprep.mubr.msk.bf16.mxu1 %vm1160_vm1, %v5256_v36  ;;  %v5253_v10 = vmul.f32 %v5245_v54, %v5241_v45 }
0x1283   : > { %v5257_v51 = vpack.c.bf16 %v5253_v10, %v5252_v48 }
0x1285   : > { %7167 = vmatmul.mubr.msk.bf16.gmra.mrb[88].mxu0 %vm1160_vm1, %v5257_v51  ;;  %7179 = vmatmul.mubr.msk.bf16.gmra.mrb[96].mxu1 %vm1160_vm1, %v5257_v51 }
0x12cb   : > { %v9909_v24 = vpop.f32.mrb[84].mxu0  ;;  %v9911_v5 = vpop.f32.mrb[92].mxu1 }
0x12cc   : > { %v9914_v41 = vmul.f32 0.70710677, %v9909_v24  ;;  %v9916_v55 = vpop.f32.mrb[85].mxu0  ;;  %v9918_v32 = vpop.f32.mrb[93].mxu1 }
0x12cd   : > { %v9921_v46 = vmul.f32 0.70710677, %v9916_v55  ;;  %v9923_v18 = vpop.f32.mrb[86].mxu0  ;;  %v9925_v53 = vpop.f32.mrb[94].mxu1 }
0x12ce   : > { %v5450_v13 = vand.u32 2147483647, %v9914_v41  ;;  %v9929_v20 = vmul.f32 0.70710677, %v9923_v18  ;;  %v9932_v17 = vpop.f32.mrb[87].mxu0  ;;  %v9934_v58 = vpop.f32.mrb[95].mxu1 }
0x12cf   : > { %v5448_v7 = vand.u32 2147483647, %v9921_v46  ;;  %v9938_v56 = vmul.f32 0.70710677, %v9932_v17  ;;  %vm5610_vm7 = vcmp.ge.f32.partialorder %v9914_v41, 0.0  ;;  %vm5608_vm8 = vcmp.ge.f32.partialorder %v9921_v46, 0.0 }
0x12d0   : > { %v5458_v2 = vmul.f32 0.3275911, %v5450_v13  ;;  %v5451_v6 = vand.u32 2147483647, %v9929_v20  ;;  %v5562_v31 = vsub.f32 0.0, %v5450_v13  ;;  %vm5611_vm9 = vcmp.ge.f32.partialorder %v9929_v20, 0.0 }
0x12d1   : > { %v5456_v26 = vmul.f32 0.3275911, %v5448_v7  ;;  %v5449_v44 = vand.u32 2147483647, %v9938_v56  ;;  %v5560_v27 = vsub.f32 0.0, %v5448_v7  ;;  %vm5609_vm11 = vcmp.ge.f32.partialorder %v9938_v56, 0.0 }
0x12d2   : > { %v5466_v54 = vadd.f32 1.0, %v5458_v2  ;;  %v5459_v30 = vmul.f32 0.3275911, %v5451_v6  ;;  %v5570_v43 = vmul.f32 %v5562_v31, %v5450_v13  ;;  %v5563_v39 = vsub.f32 0.0, %v5451_v6 }
0x12d3   : > { %v5464_v15 = vadd.f32 1.0, %v5456_v26  ;;  %v5457_v37 = vmul.f32 0.3275911, %v5449_v44  ;;  %v5568_v14 = vmul.f32 %v5560_v27, %v5448_v7  ;;  %v5561_v33 = vsub.f32 0.0, %v5449_v44 }
0x12d4   : > { %7656 = vrcp.f32 %v5466_v54  ;;  %v5467_v19 = vadd.f32 1.0, %v5459_v30  ;;  %v5580_v29 = vmul.f32 1.442695, %v5570_v43  ;;  %v5571_v21 = vmul.f32 %v5563_v39, %v5451_v6 }
0x12d5   : > { %7658 = vrcp.f32 %v5464_v15  ;;  %v5465_v52 = vadd.f32 1.0, %v5457_v37  ;;  %v5576_v9 = vmul.f32 1.442695, %v5568_v14  ;;  %v5569_v62 = vmul.f32 %v5561_v33, %v5449_v44 }
0x12d6   : > { %7660 = vrcp.f32 %v5467_v19  ;;  %v5582_v28 = vmul.f32 1.442695, %v5571_v21 }
0x12d7   : > { %7662 = vrcp.f32 %v5465_v52  ;;  %v5578_v10 = vmul.f32 1.442695, %v5569_v62 }
0x12d8   : > { %7664 = vpow2.f32 %v5580_v29 }
0x12d9   : > { %7666 = vpow2.f32 %v5576_v9 }
0x12da   : > { %7668 = vpow2.f32 %v5582_v28 }
0x12db   : > { %7670 = vpow2.f32 %v5578_v10 }
0x12de   : > { %v7657_v49 = vpop.eup %7656 }
0x12df   : > { %v7659_v63 = vpop.eup %7658  ;;  %v5490_v4 = vmul.f32 1.0614054, %v7657_v49 }
0x12e0   : > { %v5488_v59 = vmul.f32 1.0614054, %v7659_v63  ;;  %v7661_v12 = vpop.eup %7660 }
0x12e1   : > { %v5498_v1 = vadd.f32 -1.4531521, %v5490_v4  ;;  %v5491_v0 = vmul.f32 1.0614054, %v7661_v12  ;;  %v7663_v25 = vpop.eup %7662 }
0x12e2   : > { %v5496_v38 = vadd.f32 -1.4531521, %v5488_v59  ;;  %v5489_v61 = vmul.f32 1.0614054, %v7663_v25  ;;  %v7665_v43 = vpop.eup %7664 }
0x12e3   : > { %v5506_v50 = vmul.f32 %v7657_v49, %v5498_v1  ;;  %v5499_v3 = vadd.f32 -1.4531521, %v5491_v0  ;;  %v7667_v4 = vpop.eup %7666 }
0x12e4   : > { %v5504_v47 = vmul.f32 %v7659_v63, %v5496_v38  ;;  %v5497_v45 = vadd.f32 -1.4531521, %v5489_v61 }
0x12e5   : > { %v5514_v23 = vadd.f32 1.4214138, %v5506_v50  ;;  %v5507_v36 = vmul.f32 %v7661_v12, %v5499_v3  ;;  %v7669_v50 = vpop.eup %7668 }
0x12e6   : > { %v5512_v11 = vadd.f32 1.4214138, %v5504_v47  ;;  %v5505_v7 = vmul.f32 %v7663_v25, %v5497_v45 }
0x12e7   : > { %v5522_v16 = vmul.f32 %v7657_v49, %v5514_v23  ;;  %v5515_v13 = vadd.f32 1.4214138, %v5507_v36  ;;  %v7671_v23 = vpop.eup %7670 }
0x12e8   : > { %v5520_v48 = vmul.f32 %v7659_v63, %v5512_v11  ;;  %v5513_v54 = vadd.f32 1.4214138, %v5505_v7  ;;  %v5434_v11 = vmul.f32 0.5, %v9909_v24 }
0x12e9   : > { %v5530_v51 = vadd.f32 -0.28449672, %v5522_v16  ;;  %v5523_v26 = vmul.f32 %v7661_v12, %v5515_v13  ;;  %v5435_v13 = vmul.f32 0.5, %v9923_v18 }
0x12ea   : > { %v5528_v2 = vadd.f32 -0.28449672, %v5520_v48  ;;  %v5521_v19 = vmul.f32 %v7663_v25, %v5513_v54 }
0x12eb   : > { %v5538_v6 = vmul.f32 %v7657_v49, %v5530_v51  ;;  %v5531_v44 = vadd.f32 -0.28449672, %v5523_v26 }
0x12ec   : > { %v5536_v30 = vmul.f32 %v7659_v63, %v5528_v2  ;;  %v5529_v27 = vadd.f32 -0.28449672, %v5521_v19 }
0x12ed   : > { %v5546_v15 = vadd.f32 0.2548296, %v5538_v6  ;;  %v5539_v31 = vmul.f32 %v7661_v12, %v5531_v44  ;;  %v5433_v6 = vmul.f32 0.5, %v9932_v17 }
0x12ee   : > { %v5544_v37 = vadd.f32 0.2548296, %v5536_v30  ;;  %v5537_v33 = vmul.f32 %v7663_v25, %v5529_v27 }
0x12ef   : > { %v5554_v52 = vmul.f32 %v7657_v49, %v5546_v15  ;;  %v5547_v59 = vadd.f32 0.2548296, %v5539_v31 }
0x12f0   : > { %v5552_v39 = vmul.f32 %v7659_v63, %v5544_v37  ;;  %v5545_v21 = vadd.f32 0.2548296, %v5537_v33 }
0x12f1   : > { %v5594_v14 = vmul.f32 %v7665_v43, %v5554_v52  ;;  %v5555_v38 = vmul.f32 %v7661_v12, %v5547_v59  ;;  %v5432_v12 = vmul.f32 0.5, %v9916_v55 }
0x12f2   : > { %v5592_v1 = vmul.f32 %v7667_v4, %v5552_v39  ;;  %v5553_v62 = vmul.f32 %v7663_v25, %v5545_v21 }
0x12f3   : > { %v5602_v29 = vsub.f32 1.0, %v5594_v14  ;;  %v5595_v47 = vmul.f32 %v7669_v50, %v5555_v38 }
0x12f4   : > { %v5600_v9 = vsub.f32 1.0, %v5592_v1  ;;  %v5593_v61 = vmul.f32 %v7671_v23, %v5553_v62 }
0x12f5   : > { %v5618_v0 = vsub.f32 0.0, %v5602_v29  ;;  %v5603_v63 = vsub.f32 1.0, %v5595_v47 }
0x12f6   : > { %v5616_v49 = vsub.f32 0.0, %v5600_v9  ;;  %v5601_v48 = vsub.f32 1.0, %v5593_v61 }
0x12f7   : > { %v5626_v3 = vsel %vm5610_vm7, %v5602_v29, %v5618_v0  ;;  %v5619_v45 = vsub.f32 0.0, %v5603_v63 }
0x12f8   : > { %v5634_v28 = vadd.f32 1.0, %v5626_v3  ;;  %v5624_v16 = vsel %vm5608_vm8, %v5600_v9, %v5616_v49  ;;  %v5617_v51 = vsub.f32 0.0, %v5601_v48 }
0x12f9   : > { %v5632_v36 = vadd.f32 1.0, %v5624_v16  ;;  %v5627_v41 = vsel %vm5611_vm9, %v5603_v63, %v5619_v45 }
0x12fa   : > { %v5642_v10 = vmul.f32 %v5634_v28, %v5434_v11  ;;  %v5635_v24 = vadd.f32 1.0, %v5627_v41  ;;  %v5625_v7 = vsel %vm5609_vm11, %v5601_v48, %v5617_v51 }
0x12fb   : > { %v5640_v25 = vmul.f32 %v5632_v36, %v5432_v12  ;;  %v5633_v20 = vadd.f32 1.0, %v5625_v7 }
0x12fc   : > { %v9947_v46 = vmul.f32 %v9911_v5, %v5642_v10  ;;  %v5643_v2 = vmul.f32 %v5635_v24, %v5435_v13 }
0x12fd   : > { %v9952_v55 = vmul.f32 %v5640_v25, %v9918_v32  ;;  %v5641_v5 = vmul.f32 %v5633_v20, %v5433_v6 }
0x12fe   : > { %v9958_v54 = vmul.f32 %v9925_v53, %v5643_v2  ;;  %v5664_v32 = vsel %vm5657_vm10, %v9947_v46, 0.0 }
0x12ff   : > { %v5658_v26 = vsel %vm5657_vm10, %v9952_v55, 0.0  ;;  %v9961_v18 = vmul.f32 %v5641_v5, %v9934_v58 }
0x1300   : > { %5659 = vadd.xlane.f32.xlu0 %v5658_v26  ;;  %v5667_v17 = vsel %vm5657_vm10, %v9958_v54, 0.0 }
0x1301   : > { %v5661_v56 = vsel %vm5657_vm10, %v9961_v18, 0.0 }
0x1302   : > { %5662 = vadd.xlane.f32.xlu1 %v5661_v56 }
0x1304   : > { %5665 = vadd.xlane.f32.xlu0 %v5664_v32 }
0x1306   : > { %5668 = vadd.xlane.f32.xlu1 %v5667_v17 }
0x1358   : > { %v9969_v30 = vpop.f32.mrb[88].mxu0  ;;  %v9971_v53 = vpop.f32.mrb[96].mxu1 }
0x1359   : > { %v9974_v15 = vmul.f32 0.70710677, %v9969_v30  ;;  %v9976_v58 = vpop.f32.mrb[89].mxu0  ;;  %v9978_v44 = vpop.f32.mrb[97].mxu1 }
0x135a   : > { %v9981_v19 = vmul.f32 0.70710677, %v9976_v58  ;;  %v9983_v37 = vpop.f32.mrb[90].mxu0  ;;  %v9985_v52 = vpop.f32.mrb[98].mxu1 }
0x135b   : > { %v5454_v31 = vand.u32 2147483647, %v9974_v15  ;;  %v9989_v27 = vmul.f32 0.70710677, %v9983_v37  ;;  %v9992_v39 = vpop.f32.mrb[91].mxu0  ;;  %v9994_v4 = vpop.f32.mrb[99].mxu1 }
0x135c   : > { %v5452_v43 = vand.u32 2147483647, %v9981_v19  ;;  %v9998_v1 = vmul.f32 0.70710677, %v9992_v39  ;;  %vm5614_vm12 = vcmp.ge.f32.partialorder %v9974_v15, 0.0  ;;  %vm5612_vm13 = vcmp.ge.f32.partialorder %v9981_v19, 0.0 }
0x135d   : > { %v5462_v14 = vmul.f32 0.3275911, %v5454_v31  ;;  %v5455_v59 = vand.u32 2147483647, %v9989_v27  ;;  %v5566_v62 = vsub.f32 0.0, %v5454_v31  ;;  %vm5615_vm14 = vcmp.ge.f32.partialorder %v9989_v27, 0.0 }
0x135e   : > { %v5460_v33 = vmul.f32 0.3275911, %v5452_v43  ;;  %v5453_v50 = vand.u32 2147483647, %v9998_v1  ;;  %v5564_v23 = vsub.f32 0.0, %v5452_v43  ;;  %v5439_v19 = vmul.f32 0.5, %v9983_v37 }
0x135f   : > { %v5470_v29 = vadd.f32 1.0, %v5462_v14  ;;  %v5463_v38 = vmul.f32 0.3275911, %v5455_v59  ;;  %v5574_v3 = vmul.f32 %v5566_v62, %v5454_v31  ;;  %v5567_v63 = vsub.f32 0.0, %v5455_v59 }
0x1360   : > { %v5468_v21 = vadd.f32 1.0, %v5460_v33  ;;  %v5461_v0 = vmul.f32 0.3275911, %v5453_v50  ;;  %v5572_v28 = vmul.f32 %v5564_v23, %v5452_v43  ;;  %v5565_v12 = vsub.f32 0.0, %v5453_v50 }
0x1361   : > { %7672 = vrcp.f32 %v5470_v29  ;;  %v5471_v9 = vadd.f32 1.0, %v5463_v38  ;;  %v5588_v48 = vmul.f32 1.442695, %v5574_v3  ;;  %v5575_v25 = vmul.f32 %v5567_v63, %v5455_v59 }
0x1362   : > { %7674 = vrcp.f32 %v5468_v21  ;;  %v5469_v47 = vadd.f32 1.0, %v5461_v0  ;;  %v5584_v51 = vmul.f32 1.442695, %v5572_v28  ;;  %v5573_v2 = vmul.f32 %v5565_v12, %v5453_v50 }
0x1363   : > { %7676 = vrcp.f32 %v5471_v9  ;;  %v5590_v32 = vmul.f32 1.442695, %v5575_v25  ;;  %vm5613_vm15 = vcmp.ge.f32.partialorder %v9998_v1, 0.0 }
0x1364   : > { %7678 = vrcp.f32 %v5469_v47  ;;  %v5586_v14 = vmul.f32 1.442695, %v5573_v2 }
0x1365   : > { %7680 = vpow2.f32 %v5588_v48 }
0x1366   : > { %7682 = vpow2.f32 %v5584_v51 }
0x1367   : > { %7684 = vpow2.f32 %v5590_v32 }
0x1368   : > { %7686 = vpow2.f32 %v5586_v14 }
0x136b   : > { %v7673_v49 = vpop.eup %7672 }
0x136c   : > { %v7675_v61 = vpop.eup %7674  ;;  %v5494_v11 = vmul.f32 1.0614054, %v7673_v49 }
0x136d   : > { %v5492_v16 = vmul.f32 1.0614054, %v7675_v61  ;;  %v7677_v45 = vpop.eup %7676 }
0x136e   : > { %v5502_v36 = vadd.f32 -1.4531521, %v5494_v11  ;;  %v5495_v13 = vmul.f32 1.0614054, %v7677_v45  ;;  %v7679_v24 = vpop.eup %7678 }
0x136f   : > { %v5500_v10 = vadd.f32 -1.4531521, %v5492_v16  ;;  %v5493_v26 = vmul.f32 1.0614054, %v7679_v24  ;;  %v7681_v16 = vpop.eup %7680 }
0x1370   : > { %v5510_v41 = vmul.f32 %v7673_v49, %v5502_v36  ;;  %v5503_v20 = vadd.f32 -1.4531521, %v5495_v13  ;;  %v7683_v36 = vpop.eup %7682 }
0x1371   : > { %v5508_v7 = vmul.f32 %v7675_v61, %v5500_v10  ;;  %v5501_v31 = vadd.f32 -1.4531521, %v5493_v26  ;;  %v7685_v2 = vpop.eup %7684 }
0x1372   : > { %v5518_v6 = vadd.f32 1.4214138, %v5510_v41  ;;  %v5511_v17 = vmul.f32 %v7677_v45, %v5503_v20  ;;  %v7687_v32 = vpop.eup %7686 }
0x1373   : > { %v5516_v5 = vadd.f32 1.4214138, %v5508_v7  ;;  %v5509_v29 = vmul.f32 %v7679_v24, %v5501_v31  ;;  %v5438_v31 = vmul.f32 0.5, %v9969_v30 }
0x1374   : > { %v5526_v56 = vmul.f32 %v7673_v49, %v5518_v6  ;;  %v5519_v59 = vadd.f32 1.4214138, %v5511_v17 }
0x1375   : > { %v5524_v43 = vmul.f32 %v7675_v61, %v5516_v5  ;;  %v5517_v50 = vadd.f32 1.4214138, %v5509_v29 }
0x1376   : > { %v5534_v33 = vadd.f32 -0.28449672, %v5526_v56  ;;  %v5527_v9 = vmul.f32 %v7677_v45, %v5519_v59 }
0x1377   : > { %v5532_v38 = vadd.f32 -0.28449672, %v5524_v43  ;;  %v5525_v23 = vmul.f32 %v7679_v24, %v5517_v50 }
0x1378   : > { %v5542_v21 = vmul.f32 %v7673_v49, %v5534_v33  ;;  %v5535_v62 = vadd.f32 -0.28449672, %v5527_v9 }
0x1379   : > { %v5540_v0 = vmul.f32 %v7675_v61, %v5532_v38  ;;  %v5533_v28 = vadd.f32 -0.28449672, %v5525_v23 }
0x137a   : > { %v5550_v47 = vadd.f32 0.2548296, %v5542_v21  ;;  %v5543_v11 = vmul.f32 %v7677_v45, %v5535_v62 }
0x137b   : > { %v5548_v3 = vadd.f32 0.2548296, %v5540_v0  ;;  %v5541_v25 = vmul.f32 %v7679_v24, %v5533_v28 }
0x137c   : > { %v5558_v63 = vmul.f32 %v7673_v49, %v5550_v47  ;;  %v5551_v10 = vadd.f32 0.2548296, %v5543_v11  ;;  %v5437_v47 = vmul.f32 0.5, %v9992_v39 }
0x137d   : > { %v5556_v12 = vmul.f32 %v7675_v61, %v5548_v3  ;;  %v5549_v7 = vadd.f32 0.2548296, %v5541_v25 }
0x137e   : > { %v5598_v48 = vmul.f32 %v7681_v16, %v5558_v63  ;;  %v5559_v13 = vmul.f32 %v7677_v45, %v5551_v10  ;;  %v5436_v45 = vmul.f32 0.5, %v9976_v58 }
0x137f   : > { %v5596_v41 = vmul.f32 %v7683_v36, %v5556_v12  ;;  %v5557_v5 = vmul.f32 %v7679_v24, %v5549_v7 }
0x1380   : > { %v5606_v51 = vsub.f32 1.0, %v5598_v48  ;;  %v5599_v26 = vmul.f32 %v7685_v2, %v5559_v13 }
0x1381   : > { %v5604_v6 = vsub.f32 1.0, %v5596_v41  ;;  %v5597_v17 = vmul.f32 %v7687_v32, %v5557_v5 }
0x1382   : > { %v5622_v20 = vsub.f32 0.0, %v5606_v51  ;;  %v5607_v61 = vsub.f32 1.0, %v5599_v26  ;;  %v7302_v26 = vld [vmem:[%s8082_s11 + $0x10] sm:$0xff]  }
0x1383   : > { %v5620_v49 = vsub.f32 0.0, %v5604_v6  ;;  %v5605_v29 = vsub.f32 1.0, %v5597_v17 }
0x1384   : > { %v5630_v56 = vsel %vm5614_vm12, %v5606_v51, %v5622_v20  ;;  %v5623_v59 = vsub.f32 0.0, %v5607_v61  ;;  %v7301_v20 = vld [vmem:[%s8082_s11 + $0x8] sm:$0xff]  }
0x1385   : > { %v5638_v43 = vadd.f32 1.0, %v5630_v56  ;;  %v5628_v14 = vsel %vm5612_vm13, %v5604_v6, %v5620_v49  ;;  %v5621_v21 = vsub.f32 0.0, %v5605_v29  ;;  %v7300_v6 = vld [vmem:[%s8082_s11] sm:$0xff]  }
0x1386   : > { %v5636_v33 = vadd.f32 1.0, %v5628_v14  ;;  %v5631_v15 = vsel %vm5615_vm14, %v5607_v61, %v5623_v59  ;;  %7182 = vmatprep.subr.bf16.mxu0 %v7300_v6 }
0x1387   : > { %v5646_v38 = vmul.f32 %v5638_v43, %v5438_v31  ;;  %v5639_v50 = vadd.f32 1.0, %v5631_v15  ;;  %v5629_v58 = vsel %vm5613_vm15, %v5605_v29, %v5621_v21  ;;  %7183 = vmatpush3.bf16.msra.mxu0 %v7300_v6 }
0x1388   : > { %v5644_v24 = vmul.f32 %v5636_v33, %v5436_v45  ;;  %v5637_v62 = vadd.f32 1.0, %v5629_v58  ;;  %7184 = vmatprep.subr.bf16.mxu0 %v7301_v20 }
0x1389   : > { %v10007_v9 = vmul.f32 %v9971_v53, %v5646_v38  ;;  %v5647_v0 = vmul.f32 %v5639_v50, %v5439_v19 }
0x138a   : > { %v5652_v30 = vmul.f32 %v5644_v24, %v9978_v44  ;;  %v5645_v3 = vmul.f32 %v5637_v62, %v5437_v47 }
0x138b   : > { %v10015_v23 = vmul.f32 %v9985_v52, %v5647_v0  ;;  %v5676_v44 = vsel %vm5657_vm10, %v10007_v9, 0.0  ;;  %7185 = vmatpush3.bf16.msra.mxu0 %v7301_v20 }
0x138c   : > { %v5670_v27 = vsel %vm5657_vm10, %v5652_v30, 0.0  ;;  %v5653_v37 = vmul.f32 %v5645_v3, %v9994_v4  ;;  %7186 = vmatprep.subr.bf16.mxu0 %v7302_v26 }
0x138d   : > { %v5660_v53 = vpop.xlane.xlu0 %5659  ;;  %5671 = vadd.xlane.f32.xlu0 %v5670_v27  ;;  %v5679_v48 = vsel %vm5657_vm10, %v10015_v23, 0.0 }
0x138e   : > { %v5683_v63 = vmul.f32 0.015625, %v5660_v53  ;;  %v5673_v39 = vsel %vm5657_vm10, %v5653_v37, 0.0 }
0x138f   : > { %5674 = vadd.xlane.f32.xlu1 %v5673_v39  ;;  %v5663_v28 = vpop.xlane.xlu1 %5662  ;;  %7187 = vmatpush3.bf16.msra.mxu0 %v7302_v26 }
0x1390   : > { %v10019_v1 = vsub.f32 %v9952_v55, %v5683_v63  ;;  %v5684_v12 = vmul.f32 0.015625, %v5663_v28 }
0x1391   : > { %v5666_v11 = vpop.xlane.xlu0 %5665  ;;  %5677 = vadd.xlane.f32.xlu0 %v5676_v44 }
0x1392   : > { %v5685_v52 = vmul.f32 0.015625, %v5666_v11  ;;  %v5699_v16 = vmul.f32 %v10019_v1, %v10019_v1  ;;  %v10031_v4 = vsub.f32 %v9961_v18, %v5684_v12 }
0x1393   : > { %5680 = vadd.xlane.f32.xlu1 %v5679_v48  ;;  %v5669_v10 = vpop.xlane.xlu1 %5668 }
0x1394   : > { %v10027_v36 = vsub.f32 %v9947_v46, %v5685_v52  ;;  %v5707_v55 = vsel %vm5657_vm10, %v5699_v16, 0.0  ;;  %v5686_v41 = vmul.f32 0.015625, %v5669_v10  ;;  %v5700_v46 = vmul.f32 %v10031_v4, %v10031_v4 }
0x1395   : > { %5708 = vadd.xlane.f32.xlu0 %v5707_v55 }
0x1396   : > { %v5701_v25 = vmul.f32 %v10027_v36, %v10027_v36  ;;  %v10041_v18 = vsub.f32 %v9958_v54, %v5686_v41  ;;  %v5710_v13 = vsel %vm5657_vm10, %v5700_v46, 0.0  ;;  %v7303_v54 = vld [vmem:[%s8082_s11 + $0x18] sm:$0xff]   ;;  %s10374_s11 = scalar_lea.vmem %s10373_s25, %s10372_s1 }
0x1397   : > { %5711 = vadd.xlane.f32.xlu1 %v5710_v13  ;;  %7188 = vmatprep.subr.bf16.mxu0 %v7303_v54  ;;  %v6674_v16 = vld [vmem:[%s10374_s11] ss:$0 sm:$0xff] }
0x1398   : > { %v5713_v51 = vsel %vm5657_vm10, %v5701_v25, 0.0  ;;  %v5702_v7 = vmul.f32 %v10041_v18, %v10041_v18  ;;  %7189 = vmatpush3.bf16.msra.mxu0 %v7303_v54 }
0x1399   : > { %5714 = vadd.xlane.f32.xlu0 %v5713_v51 }
0x139a   : > { %v5716_v2 = vsel %vm5657_vm10, %v5702_v7, 0.0 }
0x139b   : > { %5717 = vadd.xlane.f32.xlu1 %v5716_v2 }
0x141a   : > { %v5672_v5 = vpop.xlane.xlu0 %5671 }
0x141b   : > { %v5687_v32 = vmul.f32 0.015625, %v5672_v5 }
0x141c   : > { %v5675_v61 = vpop.xlane.xlu1 %5674 }
0x141d   : > { %v10051_v49 = vsub.f32 %v5652_v30, %v5687_v32  ;;  %v5688_v43 = vmul.f32 0.015625, %v5675_v61 }
0x141e   : > { %v5678_v56 = vpop.xlane.xlu0 %5677 }
0x141f   : > { %v5689_v17 = vmul.f32 0.015625, %v5678_v56  ;;  %v5703_v31 = vmul.f32 %v10051_v49, %v10051_v49  ;;  %v10059_v33 = vsub.f32 %v5653_v37, %v5688_v43 }
0x1420   : > { %v5681_v29 = vpop.xlane.xlu1 %5680 }
0x1421   : > { %v10056_v14 = vsub.f32 %v10007_v9, %v5689_v17  ;;  %v5719_v45 = vsel %vm5657_vm10, %v5703_v31, 0.0  ;;  %v5690_v15 = vmul.f32 0.015625, %v5681_v29  ;;  %v5704_v21 = vmul.f32 %v10059_v33, %v10059_v33 }
0x1422   : > { %5720 = vadd.xlane.f32.xlu0 %v5719_v45  ;;  %v5709_v59 = vpop.xlane.xlu0 %5708 }
0x1423   : > { %v5731_v38 = vmul.f32 0.015625, %v5709_v59  ;;  %v5705_v24 = vmul.f32 %v10056_v14, %v10056_v14  ;;  %v10067_v9 = vsub.f32 %v10015_v23, %v5690_v15  ;;  %v5722_v30 = vsel %vm5657_vm10, %v5704_v21, 0.0 }
0x1424   : > { %5723 = vadd.xlane.f32.xlu1 %v5722_v30  ;;  %v5712_v0 = vpop.xlane.xlu1 %5711 }
0x1425   : > { %v5739_v19 = vadd.f32 1e-05, %v5731_v38  ;;  %v5725_v50 = vsel %vm5657_vm10, %v5705_v24, 0.0  ;;  %v5732_v62 = vmul.f32 0.015625, %v5712_v0  ;;  %v5706_v27 = vmul.f32 %v10067_v9, %v10067_v9 }
0x1426   : > { %5726 = vadd.xlane.f32.xlu0 %v5725_v50  ;;  %v5715_v58 = vpop.xlane.xlu0 %5714 }
0x1427   : > { %v5733_v47 = vmul.f32 0.015625, %v5715_v58  ;;  %7688 = vrsqrt.f32 %v5739_v19  ;;  %v5740_v53 = vadd.f32 1e-05, %v5732_v62  ;;  %v5728_v63 = vsel %vm5657_vm10, %v5706_v27, 0.0 }
0x1428   : > { %5729 = vadd.xlane.f32.xlu1 %v5728_v63  ;;  %v5718_v23 = vpop.xlane.xlu1 %5717 }
0x1429   : > { %v5741_v3 = vadd.f32 1e-05, %v5733_v47  ;;  %v5734_v37 = vmul.f32 0.015625, %v5718_v23 }
0x142b   : > { %7690 = vrsqrt.f32 %v5741_v3  ;;  %v5742_v44 = vadd.f32 1e-05, %v5734_v37 }
0x142c   : > { %7692 = vrsqrt.f32 %v5740_v53 }
0x142d   : > { %7694 = vrsqrt.f32 %v5742_v44 }
0x1431   : > { %v7689_v39 = vpop.eup %7688 }
0x1432   : > { %v5755_v28 = vmul.f32 %v7689_v39, %v10019_v1 }
0x1434   : > { %v5769_v48 = vmul.f32 %v6674_v16, %v5755_v28 }
0x1435   : > { %v7691_v11 = vpop.eup %7690 }
0x1436   : > { %v7693_v52 = vpop.eup %7692  ;;  %v5757_v55 = vmul.f32 %v7691_v11, %v10027_v36 }
0x1437   : > { %v5756_v12 = vmul.f32 %v7693_v52, %v10031_v4  ;;  %v7695_v25 = vpop.eup %7694 }
0x1438   : > { %v5758_v41 = vmul.f32 %v7695_v25, %v10041_v18  ;;  %v5771_v51 = vmul.f32 %v6674_v16, %v5757_v55 }
0x1439   : > { %v5770_v10 = vmul.f32 %v6674_v16, %v5756_v12 }
0x143a   : > { %v5772_v13 = vmul.f32 %v6674_v16, %v5758_v41 }
0x143b   : > { %v5777_v46 = vpack.c.bf16 %v5770_v10, %v5769_v48 }
0x143c   : > { %v5778_v1 = vpack.c.bf16 %v5772_v13, %v5771_v51 }
0x143d   : > { %7190 = vmatprep.mubr.msk.bf16.mxu0 %vm5657_vm10, %v5777_v46 }
0x143e   : > { %7191 = vmatmul.mubr.msk.bf16.vlgmr.msra.gmra.mrb[92].mxu0 %vm5657_vm10, %v5778_v1 }
0x14af   : > { %v5721_v7 = vpop.xlane.xlu0 %5720 }
0x14b0   : > { %v5735_v2 = vmul.f32 0.015625, %v5721_v7 }
0x14b1   : > { %v5724_v4 = vpop.xlane.xlu1 %5723 }
0x14b2   : > { %v5743_v6 = vadd.f32 1e-05, %v5735_v2  ;;  %v5736_v36 = vmul.f32 0.015625, %v5724_v4 }
0x14b3   : > { %v5727_v20 = vpop.xlane.xlu0 %5726 }
0x14b4   : > { %v5737_v26 = vmul.f32 0.015625, %v5727_v20  ;;  %7696 = vrsqrt.f32 %v5743_v6  ;;  %v5744_v5 = vadd.f32 1e-05, %v5736_v36 }
0x14b5   : > { %v5730_v18 = vpop.xlane.xlu1 %5729 }
0x14b6   : > { %v5745_v54 = vadd.f32 1e-05, %v5737_v26  ;;  %v5738_v32 = vmul.f32 0.015625, %v5730_v18 }
0x14b8   : > { %7698 = vrsqrt.f32 %v5745_v54  ;;  %v5746_v56 = vadd.f32 1e-05, %v5738_v32 }
0x14b9   : > { %7700 = vrsqrt.f32 %v5744_v5 }
0x14ba   : > { %7702 = vrsqrt.f32 %v5746_v56 }
0x14be   : > { %v7697_v61 = vpop.eup %7696 }
0x14bf   : > { %v5759_v31 = vmul.f32 %v7697_v61, %v10051_v49 }
0x14c1   : > { %v5773_v59 = vmul.f32 %v6674_v16, %v5759_v31 }
0x14c2   : > { %v7699_v17 = vpop.eup %7698 }
0x14c3   : > { %v7701_v43 = vpop.eup %7700  ;;  %v5761_v38 = vmul.f32 %v7699_v17, %v10056_v14 }
0x14c4   : > { %v5760_v45 = vmul.f32 %v7701_v43, %v10059_v33  ;;  %v7703_v24 = vpop.eup %7702 }
0x14c5   : > { %v5762_v21 = vmul.f32 %v7703_v24, %v10067_v9  ;;  %v5775_v19 = vmul.f32 %v6674_v16, %v5761_v38 }
0x14c6   : > { %v5774_v29 = vmul.f32 %v6674_v16, %v5760_v45 }
0x14c7   : > { %v5776_v50 = vmul.f32 %v6674_v16, %v5762_v21 }
0x14c8   : > { %v5779_v15 = vpack.c.bf16 %v5774_v29, %v5773_v59 }
0x14c9   : > { %v5780_v30 = vpack.c.bf16 %v5776_v50, %v5775_v19 }
0x14ca   : > { %7194 = vmatprep.mubr.msk.bf16.mxu0 %vm5657_vm10, %v5779_v15 }
0x14cb   : > { %7195 = vmatmul.mubr.msk.bf16.gmra.mrb[96].mxu0 %vm5657_vm10, %v5780_v30 }
0x1511   : > { %v7192_v58 = vpop.f32.mrb[92].mxu0 }
0x1512   : > { %v10091_v49 = vadd.f32 %v7192_v58, %v9759_v40  ;;  %v5859_v33 = vpop.f32.mrb[93].mxu0  ;;  %v7716_v58 = vld [vmem:[%s10376_s12 + $0x4] ss:$8 sps:$4 sm:$0xff] (!%p6683_p6)  }
0x1513   : > { %v5890_v0 = vadd.f32 %v5859_v33, %v9748_v35  ;;  %v7193_v47 = vpop.f32.mrb[94].mxu0  ;;  %6069 = vmatprep.subr.bf16.mxu0 (!%p6683_p6), %v7716_v58  ;;  %7202 = vmatprep.subr.bf16.mxu1 (!%p6683_p6), %v7716_v58  ;;  %v7719_v33 = vld [vmem:[%s10376_s12 + $0x14] ss:$8 sps:$4 sm:$0xff] (!%p6683_p6)  }
0x1514   : > { %5900 = vst.msk [vmem:[#allocation2 + $0x10] sm:$0xff] %vm1160_vm1, %v10091_v49  ;;  %v5893_v14 = vadd.f32 %v7193_v47, %v9767_v22  ;;  %v5862_v9 = vpop.f32.mrb[95].mxu0  ;;  %v7825_v47 = vmov (!%p6683_p6), 0  }
0x1515   : > { %5898 = vst.msk [vmem:[#allocation2] sm:$0xff] %vm1160_vm1, %v5890_v0  ;;  %v5891_v62 = vadd.f32 %v5862_v9, %v9754_v8  ;;  %6101 = vmatprep.mubr.bf16.mxu0 (!%p6683_p6), %v7825_v47  ;;  %6121 = vmatprep.mubr.bf16.mxu1 (!%p6683_p6), %v7825_v47 }
0x1516   : > { %5901 = vst.msk [vmem:[#allocation2 + $0x18] sm:$0xff] %vm1160_vm1, %v5893_v14  ;;  %v5920_v37 = vsel (!%p6683_p6), %vm1160_vm1, %v5893_v14, 0.0 }
0x1517   : > { %5899 = vst.msk [vmem:[#allocation2 + $0x8] sm:$0xff] %vm1160_vm1, %v5891_v62 }
0x159e   : > { %v7196_v40 = vpop.f32.mrb[96].mxu0  ;;  %5909 = sbr.rel (%p6683_p6) target bundleno = 6081 (0x17c1), region = 120 }
0x159f   : > { %v10102_v27 = vadd.f32 %v7196_v40, %v9826_v60  ;;  %v5875_v35 = vpop.f32.mrb[97].mxu0 }
0x15a0   : > { %v5894_v3 = vadd.f32 %v5875_v35, %v9820_v57  ;;  %v7197_v53 = vpop.f32.mrb[98].mxu0  ;;  %v5911_v57 = vsel (!%p6683_p6), %vm1160_vm1, %v5890_v0, 0.0 }
0x15a1   : > { %5904 = vst.msk [vmem:[#allocation2 + $0x30] sm:$0xff] %vm1160_vm1, %v10102_v27  ;;  %v5897_v22 = vadd.f32 %v7197_v53, %v9837_v42  ;;  %v5878_v63 = vpop.f32.mrb[99].mxu0  ;;  %5912 = vadd.xlane.f32.xlu0 (!%p6683_p6), %v5911_v57  ;;  %v5914_v42 = vsel (!%p6683_p6), %vm1160_vm1, %v5891_v62, 0.0  ;;  %v5929_v44 = vsel (!%p6683_p6), %vm1160_vm1, %v10102_v27, 0.0 }
0x15a2   : > { %5902 = vst.msk [vmem:[#allocation2 + $0x20] sm:$0xff] %vm1160_vm1, %v5894_v3  ;;  %v5895_v8 = vadd.f32 %v5878_v63, %v9829_v34  ;;  %v5923_v60 = vsel (!%p6683_p6), %vm1160_vm1, %v5894_v3, 0.0  ;;  %v5917_v34 = vsel (!%p6683_p6), %vm1160_vm1, %v10091_v49, 0.0 }
0x15a3   : > { %5905 = vst.msk [vmem:[#allocation2 + $0x38] sm:$0xff] %vm1160_vm1, %v5897_v22  ;;  %5924 = vadd.xlane.f32.xlu1 (!%p6683_p6), %v5923_v60  ;;  %v5932_v39 = vsel (!%p6683_p6), %vm1160_vm1, %v5897_v22, 0.0 }
0x15a4   : > { %5903 = vst.msk [vmem:[#allocation2 + $0x28] sm:$0xff] %vm1160_vm1, %v5895_v8  ;;  %v5926_v23 = vsel (!%p6683_p6), %vm1160_vm1, %v5895_v8, 0.0 }
0x15a5   : > { %5915 = vadd.xlane.f32.xlu0 %v5914_v42 }
0x15a7   : > { %5927 = vadd.xlane.f32.xlu1 %v5926_v23 }
0x15a9   : > { %5918 = vadd.xlane.f32.xlu0 %v5917_v34 }
0x15ab   : > { %5921 = vadd.xlane.f32.xlu1 %v5920_v37 }
0x15ad   : > { %5930 = vadd.xlane.f32.xlu0 %v5929_v44 }
0x15af   : > { %5933 = vadd.xlane.f32.xlu1 %v5932_v39 }
0x162e   : > { %v5913_v11 = vpop.xlane.xlu0 %5912 }
0x162f   : > { %v5935_v52 = vmul.f32 0.03125, %v5913_v11 }
0x1630   : > { %v5925_v28 = vpop.xlane.xlu1 %5924 }
0x1631   : > { %v5939_v16 = vmul.f32 0.03125, %v5925_v28  ;;  %v10123_v12 = vsub.f32 %v5890_v0, %v5935_v52  ;;  %v7721_v0 = vld [vmem:[%s10376_s12 + $0x10] ss:$8 sps:$4 sm:$0xff]  }
0x1632   : > { %v5916_v48 = vpop.xlane.xlu0 %5915 }
0x1633   : > { %v10125_v55 = vsub.f32 %v5894_v3, %v5939_v16  ;;  %v5936_v25 = vmul.f32 0.03125, %v5916_v48  ;;  %v5951_v46 = vmul.f32 %v10123_v12, %v10123_v12  ;;  %v6684_v16 = vld [vmem:[%s10377_s22] ss:$0 sm:$0xff] }
0x1634   : > { %v5928_v10 = vpop.xlane.xlu1 %5927 }
0x1635   : > { %v5940_v41 = vmul.f32 0.03125, %v5928_v10  ;;  %v5955_v51 = vmul.f32 %v10125_v55, %v10125_v55  ;;  %v10131_v13 = vsub.f32 %v5891_v62, %v5936_v25  ;;  %v5959_v7 = vsel %vm1160_vm1, %v5951_v46, 0.0 }
0x1636   : > { %5960 = vadd.xlane.f32.xlu0 %v5959_v7  ;;  %v5919_v2 = vpop.xlane.xlu0 %5918 }
0x1637   : > { %v10133_v1 = vsub.f32 %v5895_v8, %v5940_v41  ;;  %v5971_v20 = vsel %vm1160_vm1, %v5955_v51, 0.0  ;;  %v5937_v4 = vmul.f32 0.03125, %v5919_v2  ;;  %v5952_v36 = vmul.f32 %v10131_v13, %v10131_v13 }
0x1638   : > { %v5922_v6 = vpop.xlane.xlu1 %5921 }
0x1639   : > { %v5938_v26 = vmul.f32 0.03125, %v5922_v6  ;;  %v5956_v54 = vmul.f32 %v10133_v1, %v10133_v1  ;;  %v10142_v5 = vsub.f32 %v10091_v49, %v5937_v4  ;;  %v5962_v32 = vsel %vm1160_vm1, %v5952_v36, 0.0  ;;  %v7718_v49 = vld [vmem:[%s10376_s12] ss:$8 sps:$4 sm:$0xff]  }
0x163a   : > { %5972 = vadd.xlane.f32.xlu0 %v5971_v20  ;;  %5963 = vadd.xlane.f32.xlu1 %v5962_v32  ;;  %v5931_v56 = vpop.xlane.xlu0 %5930 }
0x163b   : > { %v10144_v18 = vsub.f32 %v5893_v14, %v5938_v26  ;;  %v5974_v17 = vsel %vm1160_vm1, %v5956_v54, 0.0  ;;  %v5941_v31 = vmul.f32 0.03125, %v5931_v56  ;;  %v5953_v45 = vmul.f32 %v10142_v5, %v10142_v5  ;;  %6070 = vmatpush1.bf16.msra.mxu0 %v7718_v49  ;;  %7204 = vmatpush1.bf16.msra.mxu1 %v7718_v49 }
0x163c   : > { %v5934_v61 = vpop.xlane.xlu1 %5933  ;;  %6071 = vmatprep.subr.bf16.mxu0 %v7719_v33  ;;  %7203 = vmatprep.subr.bf16.mxu1 %v7719_v33 }
0x163d   : > { %v5942_v43 = vmul.f32 0.03125, %v5934_v61  ;;  %v5954_v59 = vmul.f32 %v10144_v18, %v10144_v18  ;;  %v10153_v29 = vsub.f32 %v10102_v27, %v5941_v31  ;;  %v5965_v24 = vsel %vm1160_vm1, %v5953_v45, 0.0 }
0x163e   : > { %5975 = vadd.xlane.f32.xlu1 %v5974_v17  ;;  %5966 = vadd.xlane.f32.xlu0 %v5965_v24 }
0x163f   : > { %v10155_v38 = vsub.f32 %v5897_v22, %v5942_v43  ;;  %v5968_v15 = vsel %vm1160_vm1, %v5954_v59, 0.0  ;;  %v5957_v21 = vmul.f32 %v10153_v29, %v10153_v29  ;;  %6072 = vmatpush1.bf16.msra.mxu0 %v7721_v0  ;;  %7205 = vmatpush1.bf16.msra.mxu1 %v7721_v0 }
0x1641   : > { %v5958_v19 = vmul.f32 %v10155_v38, %v10155_v38  ;;  %v5977_v50 = vsel %vm1160_vm1, %v5957_v21, 0.0 }
0x1642   : > { %5969 = vadd.xlane.f32.xlu1 %v5968_v15  ;;  %5978 = vadd.xlane.f32.xlu0 %v5977_v50 }
0x1643   : > { %v5980_v30 = vsel %vm1160_vm1, %v5958_v19, 0.0 }
0x1646   : > { %5981 = vadd.xlane.f32.xlu1 %v5980_v30 }
0x16c3   : > { %v5961_v14 = vpop.xlane.xlu0 %5960 }
0x16c4   : > { %v5983_v9 = vmul.f32 0.03125, %v5961_v14 }
0x16c6   : > { %v5991_v62 = vadd.f32 1e-05, %v5983_v9 }
0x16c7   : > { %v5964_v40 = vpop.xlane.xlu1 %5963  ;;  %v5973_v27 = vpop.xlane.xlu0 %5972 }
0x16c8   : > { %7722 = vrsqrt.f32 %v5991_v62  ;;  %v5984_v35 = vmul.f32 0.03125, %v5964_v40  ;;  %v5987_v3 = vmul.f32 0.03125, %v5973_v27 }
0x16ca   : > { %v5992_v53 = vadd.f32 1e-05, %v5984_v35  ;;  %v5995_v22 = vadd.f32 1e-05, %v5987_v3 }
0x16cb   : > { %v5976_v63 = vpop.xlane.xlu1 %5975  ;;  %v5967_v8 = vpop.xlane.xlu0 %5966 }
0x16cc   : > { %7724 = vrsqrt.f32 %v5992_v53  ;;  %v5988_v57 = vmul.f32 0.03125, %v5976_v63  ;;  %v5985_v60 = vmul.f32 0.03125, %v5967_v8 }
0x16cd   : > { %7726 = vrsqrt.f32 %v5995_v22 }
0x16ce   : > { %v5996_v42 = vadd.f32 1e-05, %v5988_v57  ;;  %v5993_v23 = vadd.f32 1e-05, %v5985_v60 }
0x16cf   : > { %v5970_v34 = vpop.xlane.xlu1 %5969  ;;  %v5979_v37 = vpop.xlane.xlu0 %5978 }
0x16d0   : > { %7728 = vrsqrt.f32 %v5996_v42  ;;  %v5986_v44 = vmul.f32 0.03125, %v5970_v34  ;;  %v5989_v39 = vmul.f32 0.03125, %v5979_v37 }
0x16d1   : > { %7730 = vrsqrt.f32 %v5993_v23 }
0x16d2   : > { %v7723_v11 = vpop.eup %7722  ;;  %v5994_v28 = vadd.f32 1e-05, %v5986_v44  ;;  %v5997_v52 = vadd.f32 1e-05, %v5989_v39 }
0x16d3   : > { %v5982_v48 = vpop.xlane.xlu1 %5981  ;;  %v6007_v10 = vmul.f32 %v7723_v11, %v10123_v12 }
0x16d4   : > { %7732 = vrsqrt.f32 %v5994_v28  ;;  %v5990_v25 = vmul.f32 0.03125, %v5982_v48 }
0x16d5   : > { %7734 = vrsqrt.f32 %v5997_v52  ;;  %v6021_v41 = vmul.f32 %v6684_v16, %v6007_v10 }
0x16d6   : > { %v7725_v46 = vpop.eup %7724  ;;  %v5998_v51 = vadd.f32 1e-05, %v5990_v25 }
0x16d7   : > { %v7727_v7 = vpop.eup %7726  ;;  %v6008_v2 = vmul.f32 %v7725_v46, %v10131_v13  ;;  %v6158_v6 = vsel %vm1160_vm1, %v6021_v41, 0.0 }
0x16d8   : > { %7736 = vrsqrt.f32 %v5998_v51  ;;  %6166 = vst [vmem:[#allocation5] sm:$0xff] %v6158_v6  ;;  %v6011_v20 = vmul.f32 %v7727_v7, %v10125_v55 }
0x16d9   : > { %v6022_v4 = vmul.f32 %v6684_v16, %v6008_v2 }
0x16da   : > { %v7729_v26 = vpop.eup %7728  ;;  %v6025_v36 = vmul.f32 %v6684_v16, %v6011_v20 }
0x16db   : > { %v7731_v54 = vpop.eup %7730  ;;  %v6029_v12 = vpack.c.bf16 %v6022_v4, %v6021_v41  ;;  %v6159_v32 = vsel %vm1160_vm1, %v6022_v4, 0.0  ;;  %v6012_v56 = vmul.f32 %v7729_v26, %v10133_v1 }
0x16dc   : > { %6167 = vst [vmem:[#allocation5 + $0x8] sm:$0xff] %v6159_v32  ;;  %v6162_v61 = vsel %vm1160_vm1, %v6025_v36, 0.0  ;;  %v6009_v13 = vmul.f32 %v7731_v54, %v10142_v5 }
0x16dd   : > { %6689 = vmatmul.mubr.msk.bf16.vlgmr.msra.gmra.mrb[0].mxu0 %vm1160_vm1, %v6029_v12  ;;  %v6026_v17 = vmul.f32 %v6684_v16, %v6012_v56  ;;  %6170 = vst [vmem:[#allocation5 + $0x20] sm:$0xff] %v6162_v61 }
0x16de   : > { %v7733_v31 = vpop.eup %7732  ;;  %6111 = vmatprep.mubr.bf16.mxu0 %v7825_v47  ;;  %v6023_v55 = vmul.f32 %v6684_v16, %v6009_v13 }
0x16df   : > { %v7735_v43 = vpop.eup %7734  ;;  %v6031_v45 = vpack.c.bf16 %v6026_v17, %v6025_v36  ;;  %v6163_v59 = vsel %vm1160_vm1, %v6026_v17, 0.0  ;;  %v6010_v24 = vmul.f32 %v7733_v31, %v10144_v18 }
0x16e0   : > { %6171 = vst [vmem:[#allocation5 + $0x28] sm:$0xff] %v6163_v59  ;;  %v6160_v1 = vsel %vm1160_vm1, %v6023_v55, 0.0  ;;  %v6013_v15 = vmul.f32 %v7735_v43, %v10153_v29 }
0x16e1   : > { %6691 = vmatmul.mubr.msk.bf16.vlgmr.msra.gmra.mrb[0].mxu1 %vm1160_vm1, %v6031_v45  ;;  %v6024_v5 = vmul.f32 %v6684_v16, %v6010_v24  ;;  %6168 = vst [vmem:[#allocation5 + $0x10] sm:$0xff] %v6160_v1 }
0x16e2   : > { %v7737_v21 = vpop.eup %7736  ;;  %6131 = vmatprep.mubr.bf16.mxu1 %v7825_v47  ;;  %v6027_v19 = vmul.f32 %v6684_v16, %v6013_v15 }
0x16e3   : > { %v6030_v50 = vpack.c.bf16 %v6024_v5, %v6023_v55  ;;  %v6161_v30 = vsel %vm1160_vm1, %v6024_v5, 0.0  ;;  %v6014_v58 = vmul.f32 %v7737_v21, %v10155_v38 }
0x16e4   : > { %6169 = vst [vmem:[#allocation5 + $0x18] sm:$0xff] %v6161_v30  ;;  %v6164_v18 = vsel %vm1160_vm1, %v6027_v19, 0.0 }
0x16e5   : > { %6690 = vmatmul.mubr.msk.bf16.gmra.mrb[4].mxu0 %vm1160_vm1, %v6030_v50  ;;  %v6028_v49 = vmul.f32 %v6684_v16, %v6014_v58  ;;  %6172 = vst [vmem:[#allocation5 + $0x30] sm:$0xff] %v6164_v18 }
0x16e7   : > { %v6032_v29 = vpack.c.bf16 %v6028_v49, %v6027_v19  ;;  %v6165_v33 = vsel %vm1160_vm1, %v6028_v49, 0.0 }
0x16e8   : > { %6173 = vst [vmem:[#allocation5 + $0x38] sm:$0xff] %v6165_v33 }
0x16e9   : > { %6692 = vmatmul.mubr.msk.bf16.gmra.mrb[4].mxu1 %vm1160_vm1, %v6032_v29 }
0x17b0   : > { %v6103_v0 = vpop.f32.mrb[0].mxu0 }
0x17b1   : > { %6142 = vst [vmem:[#allocation3] sm:$0xff] %v6103_v0  ;;  %v6105_v47 = vpop.f32.mrb[1].mxu0 }
0x17b2   : > { %6143 = vst [vmem:[#allocation3 + $0x8] sm:$0xff] %v6105_v47  ;;  %v6107_v14 = vpop.f32.mrb[2].mxu0 }
0x17b3   : > { %6144 = vst [vmem:[#allocation3 + $0x10] sm:$0xff] %v6107_v14  ;;  %v6109_v38 = vpop.f32.mrb[3].mxu0 }
0x17b4   : > { %6145 = vst [vmem:[#allocation3 + $0x18] sm:$0xff] %v6109_v38  ;;  %v6123_v9 = vpop.f32.mrb[0].mxu1 }
0x17b5   : > { %6150 = vst [vmem:[#allocation3 + $0x40] sm:$0xff] %v6123_v9  ;;  %v6125_v62 = vpop.f32.mrb[1].mxu1 }
0x17b6   : > { %6151 = vst [vmem:[#allocation3 + $0x48] sm:$0xff] %v6125_v62  ;;  %v6127_v40 = vpop.f32.mrb[2].mxu1 }
0x17b7   : > { %6152 = vst [vmem:[#allocation3 + $0x50] sm:$0xff] %v6127_v40  ;;  %v6129_v27 = vpop.f32.mrb[3].mxu1 }
0x17b8   : > { %6153 = vst [vmem:[#allocation3 + $0x58] sm:$0xff] %v6129_v27  ;;  %v6113_v35 = vpop.f32.mrb[4].mxu0 }
0x17b9   : > { %6146 = vst [vmem:[#allocation3 + $0x20] sm:$0xff] %v6113_v35  ;;  %v6115_v3 = vpop.f32.mrb[5].mxu0 }
0x17ba   : > { %6147 = vst [vmem:[#allocation3 + $0x28] sm:$0xff] %v6115_v3  ;;  %v6117_v53 = vpop.f32.mrb[6].mxu0 }
0x17bb   : > { %6148 = vst [vmem:[#allocation3 + $0x30] sm:$0xff] %v6117_v53  ;;  %v6119_v22 = vpop.f32.mrb[7].mxu0 }
0x17bc   : > { %6149 = vst [vmem:[#allocation3 + $0x38] sm:$0xff] %v6119_v22  ;;  %v6133_v63 = vpop.f32.mrb[4].mxu1 }
0x17bd   : > { %6154 = vst [vmem:[#allocation3 + $0x60] sm:$0xff] %v6133_v63  ;;  %v6135_v8 = vpop.f32.mrb[5].mxu1 }
0x17be   : > { %6155 = vst [vmem:[#allocation3 + $0x68] sm:$0xff] %v6135_v8  ;;  %v6137_v57 = vpop.f32.mrb[6].mxu1 }
0x17bf   : > { %6156 = vst [vmem:[#allocation3 + $0x70] sm:$0xff] %v6137_v57  ;;  %v6139_v60 = vpop.f32.mrb[7].mxu1 }
0x17c0   : > { %6157 = vst [vmem:[#allocation3 + $0x78] sm:$0xff] %v6139_v60 }
0x17c1 PF: > { %s10378_s30 = sld [smem:[#allocation11_spill]]  ;;  %s7826_s28 = smov [#allocation3]  }
0x17c2   : > { %s6184_s27 = sshll.u32 %s7826_s28, 4  ;;  %s6185_s27 = int_to_ptr.vmem [resolvable:$true] %s6184_s27 }
0x17c3   : > { %s7738_s29 = scalar_lea.vmem %s6185_s27, 2048  ;;  %p7745_p11 = scmp.lt.s32.totalorder %s6185_s27, %s6185_s27 }
0x17c4   : > { %p7739_p8 = scmp.ne.s32.totalorder %s6185_s27, %s7738_s29  ;;  %p7746_p12 = scmp.lt.s32.totalorder %s7738_s29, %s7738_s29 }
0x17c6   : > { %p7747_p13 = por %p7746_p12, %p7745_p11 }
0x17c7   : > { %s10379_s15 = sadd.s32 4294967295, %s10378_s30  }
0x17c8   : > { %p10206_p7 = scmp.eq.s32.totalorder %s10379_s15, 1 }
0x17ca   : > { %p7740_p9 = pnand %p7739_p8, %p10206_p7 }
0x17cc   : > { %p7741_p10 = pneg %p7740_p9 }
0x17ce   : > { %p7748_p0 = pnand %p7747_p13, %p7741_p10 }
0x17d0   : > { %7751 = shalt.err (!%p7748_p0)
}
0x17d1   : > { %s10381_s2 = sld [smem:[#allocation38_spill]] }
0x17d7   : > { %s7752_s9 = scalar_lea.hbm %s10381_s2, 2048 }
0x17d8   : > { %p7753_p1 = scmp.ne.s32.totalorder %s10381_s2, %s7752_s9  ;;  %p7758_p4 = scmp.lt.u32.totalorder %s7752_s9, %s10381_s2 }
0x17da   : > { %p7754_p2 = pnand %p7753_p1, %p10206_p7 }
0x17dc   : > { %p7755_p3 = pneg %p7754_p2 }
0x17de   : > { %p7760_p5 = pnand %p7758_p4, %p7755_p3 }
0x17e0   : > { %7763 = shalt.err (!%p7760_p5)
}
0x17e1   : > { %s7827_s8 = smov 256   ;;  %s7828_s26 = smov 16  }
0x17e2   : > { %7223 = dma.vmem_to_hbm [thread:$0]  (%p10206_p7), %s6185_s27, 2048, %s10381_s2, [#allocation4], %s7827_s8, %s7827_s8, %s7828_s26  }
0x17e3   : > { %s7829_s5 = smov [#allocation5]  }
0x17e4   : > { %s6201_s7 = sshll.u32 %s7829_s5, 4  ;;  %s6202_s7 = int_to_ptr.vmem [resolvable:$true] %s6201_s7 }
0x17e5   : > { %s7764_s6 = scalar_lea.vmem %s6202_s7, 1024  ;;  %p7771_p10 = scmp.lt.s32.totalorder %s6202_s7, %s6202_s7 }
0x17e6   : > { %p7765_p6 = scmp.ne.s32.totalorder %s6202_s7, %s7764_s6  ;;  %p7772_p11 = scmp.lt.s32.totalorder %s7764_s6, %s7764_s6 }
0x17e8   : > { %p7766_p8 = pnand %p7765_p6, %p10206_p7  ;;  %p7773_p12 = por %p7772_p11, %p7771_p10 }
0x17ea   : > { %p7767_p9 = pneg %p7766_p8 }
0x17ec   : > { %p7774_p13 = pnand %p7773_p12, %p7767_p9 }
0x17ee   : > { %7777 = shalt.err (!%p7774_p13)
}
0x17ef   : > { %s10382_s22 = sld [smem:[#allocation39_spill]] }
0x17f5   : > { %s7778_s30 = scalar_lea.hbm %s10382_s22, 1024 }
0x17f6   : > { %p7779_p0 = scmp.ne.s32.totalorder %s10382_s22, %s7778_s30  ;;  %p7784_p3 = scmp.lt.u32.totalorder %s7778_s30, %s10382_s22 }
0x17f8   : > { %p7780_p1 = pnand %p7779_p0, %p10206_p7 }
0x17fa   : > { %p7781_p2 = pneg %p7780_p1 }
0x17fc   : > { %p7786_p4 = pnand %p7784_p3, %p7781_p2 }
0x17fe   : > { %7789 = shalt.err (!%p7786_p4)
}
0x17ff   : > { %s7830_s3 = smov 128   ;;  %s7831_s1 = smov 8  }
0x1800   : > { %7225 = dma.vmem_to_hbm [thread:$0]  (%p10206_p7), %s6202_s7, 1024, %s10382_s22, [#allocation6], %s7830_s3, %s7830_s3, %s7831_s1  }
0x1801   : > { %7803 = dma.done.wait (%p10206_p7), [#allocation4], 2048  }
0x1802   : > { %7805 = vsyncadd (%p10206_p7), [#allocation4], 4294965248 }
0x1803   : > { %7807 = dma.done.wait (%p10206_p7), [#allocation6], 1024  }
0x1804   : > { %7809 = vsyncadd (%p10206_p7), [#allocation6], 4294966272 }
0x1805 PF: > { %s10383_s11 = sld [smem:[#allocation11_spill]]  ;;  %s10384_s5 = sld [smem:[#allocation10_spill]] }
0x1806   : > { %s10385_s26 = sld [smem:[#allocation12_spill]] }
0x180b   : > { %s37_s27 = sadd.s32 1, %s10383_s11  }
0x180c   : > { %p34_p5 = scmp.ge.s32.totalorder %s37_s27, 4  }
0x180e   :  { %36 = sbr.rel (!%p34_p5) target bundleno = 25 (0x19), region = 217 }
0x1815   :  { %6221 = vsyncpa [#allocation4], 1 }
0x1816   :  { %6223 = vsyncpa [#allocation4 + $0x1], 1 }
0x1817   :  { %6224 = vsyncpa [#allocation6], 1 }

</bundles_post_ra>
